<compile_context>
chip_gen: v7x
topology: tpu7x:2x2x1
jax: 0.10.0
libtpu: 0.0.40
codegen_flags: <defaults>
</compile_context>

<pallas_src>
import functools

import numpy as np
import jax
import jax.numpy as jnp
from jax.experimental import pallas as pl
from jax.experimental.pallas import tpu as pltpu

F32 = jnp.float32
BF16 = jnp.bfloat16


def _mm(a, w):
    return jnp.dot(a, w, preferred_element_type=jnp.float32)


# ---------------------------------------------------------------------------
# The single fused kernel
# ---------------------------------------------------------------------------
def _ae_kernel(x_ref,
               w1, b1, w2, b2, w3, b3, w4, b4, w5, b5,
               w6, b6, w7, b7,
               wd2, bd2, wd3, bd3, wd4, bd4, wd5, bd5, wd6, bd6,
               o_ref,
               s1, se2, so2, s3, se4, so4, sd1, sd3i, sd3, sd5i, sd5e, sd5o,
               *, T, c, ni):
    c2 = 2 * c

    def zrow(s, lo, hi):  # zero only the pad row-blocks
        s[lo * T:hi * T, :] = jnp.zeros(((hi - lo) * T, s.shape[1]), s.dtype)

    # ------------------------------ encoder ------------------------------
    # conv1 (s2, 32x32xni -> 16x16xc): height taps pre-concatenated along K -> 1 matmul
    a1 = jnp.maximum(_mm(x_ref[...], w1[...]) + b1[...], 0.0)           # (16T, 16c)
    zrow(s1, 0, 1)
    zrow(s1, 17, 18)
    s1[T:17 * T, :] = a1.astype(s1.dtype)

    # conv2 (s1, 16x16xc -> 16x16xc)
    acc = _mm(s1[0:16 * T, :], w2[0])
    acc += _mm(s1[T:17 * T, :], w2[1])
    acc += _mm(s1[2 * T:18 * T, :], w2[2])
    a2 = jnp.maximum(acc + b2[...], 0.0)                                # (16T, 16c)

    # parity-split + 1-row pad feeding the stride-2 conv3
    # se2 = [zero(h=-1), h=1,3,...,15] ; so2 = [h=0,2,...,14, zero(h=16)]
    zrow(se2, 0, 1)
    zrow(so2, 8, 9)
    for m in range(8):
        so2[m * T:(m + 1) * T, :] = a2[2 * m * T:(2 * m + 1) * T, :].astype(so2.dtype)
        se2[(m + 1) * T:(m + 2) * T, :] = a2[(2 * m + 1) * T:(2 * m + 2) * T, :].astype(se2.dtype)

    # conv3 (s2, 16x16xc -> 8x8x2c)
    acc = _mm(se2[0:8 * T, :], w3[0])
    acc += _mm(so2[0:8 * T, :], w3[1])
    acc += _mm(se2[T:9 * T, :], w3[2])
    a3 = jnp.maximum(acc + b3[...], 0.0)                                # (8T, 16c)
    zrow(s3, 0, 1)
    zrow(s3, 9, 10)
    s3[T:9 * T, :] = a3.astype(s3.dtype)

    # conv4 (s1, 8x8x2c -> 8x8x2c)
    acc = _mm(s3[0:8 * T, :], w4[0])
    acc += _mm(s3[T:9 * T, :], w4[1])
    acc += _mm(s3[2 * T:10 * T, :], w4[2])
    a4 = jnp.maximum(acc + b4[...], 0.0)                                # (8T, 16c)

    zrow(se4, 0, 1)
    zrow(so4, 4, 5)
    for m in range(4):
        so4[m * T:(m + 1) * T, :] = a4[2 * m * T:(2 * m + 1) * T, :].astype(so4.dtype)
        se4[(m + 1) * T:(m + 2) * T, :] = a4[(2 * m + 1) * T:(2 * m + 2) * T, :].astype(se4.dtype)

    # conv5 (s2, 8x8x2c -> 4x4x2c); keep f32 for the latent Linear pair
    acc = _mm(se4[0:4 * T, :], w5[0])
    acc += _mm(so4[0:4 * T, :], w5[1])
    acc += _mm(se4[T:5 * T, :], w5[2])
    y5 = jnp.maximum(acc + b5[...], 0.0)                                # (4T, 4*c2) f32

    # encoder Linear (NCHW Flatten folded into per-height weight permutation), f32
    z = _mm(y5[0:T, :], w6[0])
    for h in range(1, 4):
        z += _mm(y5[h * T:(h + 1) * T, :], w6[h])
    z = z + b6[...]                                                     # (T, latent), no act

    # decoder Linear + ReLU, one output height row per matmul, written straight into the
    # bottom-padded scratch that feeds ConvTranspose d2
    zrow(sd1, 4, 5)
    for h in range(4):
        row = jnp.maximum(_mm(z, w7[h]) + b7[h], 0.0)
        sd1[h * T:(h + 1) * T, :] = row.astype(sd1.dtype)

    # ------------------------------ decoder ------------------------------
    # convT d2 (4x4x2c -> 8x8x2c) as a 2x2-window conv; lanes packed (a, q, b, co)
    acc = _mm(sd1[0:4 * T, :], wd2[0]) + _mm(sd1[T:5 * T, :], wd2[1])
    p2 = jnp.maximum(acc + bd2[...], 0.0)                               # (4T, 16*c2)

    # unpack the height phase into rows of the padded conv-d3 input (pixel shuffle)
    half = 8 * c2
    zrow(sd3i, 0, 1)
    zrow(sd3i, 9, 10)
    for r in range(4):
        sd3i[(2 * r + 1) * T:(2 * r + 2) * T, :] = p2[r * T:(r + 1) * T, 0:half].astype(sd3i.dtype)
        sd3i[(2 * r + 2) * T:(2 * r + 3) * T, :] = p2[r * T:(r + 1) * T, half:2 * half].astype(sd3i.dtype)

    # conv d3 (s1, 8x8x2c -> 8x8x2c)
    acc = _mm(sd3i[0:8 * T, :], wd3[0])
    acc += _mm(sd3i[T:9 * T, :], wd3[1])
    acc += _mm(sd3i[2 * T:10 * T, :], wd3[2])
    d3 = jnp.maximum(acc + bd3[...], 0.0)                               # (8T, 16c)
    zrow(sd3, 8, 9)
    sd3[0:8 * T, :] = d3.astype(sd3.dtype)

    # convT d4 (8x8x2c -> 16x16xc), packed lanes (a, q, b, co)
    acc = _mm(sd3[0:8 * T, :], wd4[0]) + _mm(sd3[T:9 * T, :], wd4[1])
    p4 = jnp.maximum(acc + bd4[...], 0.0)                               # (8T, 32c)

    half = 16 * c
    zrow(sd5i, 0, 1)
    zrow(sd5i, 17, 18)
    for r in range(8):
        sd5i[(2 * r + 1) * T:(2 * r + 2) * T, :] = p4[r * T:(r + 1) * T, 0:half].astype(sd5i.dtype)
        sd5i[(2 * r + 2) * T:(2 * r + 3) * T, :] = p4[r * T:(r + 1) * T, half:2 * half].astype(sd5i.dtype)

    # conv d5 (s1, 16x16xc -> 16x16xc); output written parity-split so the final
    # ConvTranspose can fold its pixel shuffle into the weights (lane-dense output)
    acc = _mm(sd5i[0:16 * T, :], wd5[0])
    acc += _mm(sd5i[T:17 * T, :], wd5[1])
    acc += _mm(sd5i[2 * T:18 * T, :], wd5[2])
    d5 = jnp.maximum(acc + bd5[...], 0.0)                               # (16T, 16c)

    zrow(sd5e, 8, 9)                                                    # h=16 zero pad
    for m in range(8):
        sd5e[m * T:(m + 1) * T, :] = d5[2 * m * T:(2 * m + 1) * T, :].astype(sd5e.dtype)
        sd5o[m * T:(m + 1) * T, :] = d5[(2 * m + 1) * T:(2 * m + 2) * T, :].astype(sd5o.dtype)

    # convT d6 (16x16xc -> 32x32xni) + tanh, row-pair folded into lanes:
    # output row rp: lanes[0:64ni]  -> image heights 4rp, 4rp+1
    #                lanes[64ni: ]  -> image heights 4rp+2, 4rp+3
    acc = _mm(sd5e[0:8 * T, :], wd6[0])
    acc += _mm(sd5o[0:8 * T, :], wd6[1])
    acc += _mm(sd5e[T:9 * T, :], wd6[2])
    o_ref[...] = jnp.tanh(acc + bd6[...]).astype(o_ref.dtype)           # (8T, 128ni), dense


# ---------------------------------------------------------------------------
# Parameter preparation: width-Toeplitz matrices (built once, outside jit)
# ---------------------------------------------------------------------------
def prepare_params(params, c=8, ni=1, latent=32):
    c2 = 2 * c

    def toep_conv(w, b, wi, stride):
        # w: (Cout, Cin, 3, 3) torch layout.  Input lanes = (width, Cin).
        w = np.asarray(w, np.float32)
        b = np.asarray(b, np.float32)
        cout, cin = w.shape[0], w.shape[1]
        wo = (wi + 2 - 3) // stride + 1
        t = np.zeros((3, wi * cin, wo * cout), np.float32)
        for kh in range(3):
            for o in range(wo):
                for kw in range(3):
                    wiu = o * stride + kw - 1                 # padding = 1
                    if 0 <= wiu < wi:
                        t[kh, wiu * cin:(wiu + 1) * cin,
                          o * cout:(o + 1) * cout] = w[:, :, kh, kw].T
        return t, np.tile(b, wo).reshape(1, -1)

    def toep_convt(w, b, wi):
        # w: (Cin, Cout, 3, 3) torch ConvTranspose layout.
        # Sub-pixel decomposition: output lanes ordered (phase_a, q, phase_b, co).
        w = np.asarray(w, np.float32)
        b = np.asarray(b, np.float32)
        cin, cout = w.shape[0], w.shape[1]
        kmap = {(0, 0): 1, (1, 0): 2, (1, 1): 0}              # (phase, window offset) -> tap
        n = 2 * wi * 2 * cout
        t = np.zeros((2, wi * cin, n), np.float32)
        brow = np.zeros((1, n), np.float32)
        for a in range(2):
            for o in range(wi):
                for bb in range(2):
                    n0 = a * (wi * 2 * cout) + o * (2 * cout) + bb * cout
                    brow[0, n0:n0 + cout] = b
                    for dy in range(2):
                        if (a, dy) not in kmap:
                            continue
                        kh = kmap[(a, dy)]
                        for dx in range(2):
                            if (bb, dx) not in kmap:
                                continue
                            kw = kmap[(bb, dx)]
                            wiu = o + dx
                            if wiu < wi:
                                t[dy, wiu * cin:(wiu + 1) * cin, n0:n0 + cout] = w[:, :, kh, kw]
        return t, brow

    prep = {}

    def put(name, t, brow):
        prep["w" + name] = jnp.asarray(t, BF16)
        prep["b" + name] = jnp.asarray(brow, F32)

    # conv1: concatenate the 3 height taps along K (matches the wrapper's lane concat)
    t1, b1r = toep_conv(params["e1_w"], params["e1_b"], 32, 2)
    put("1", np.concatenate([t1[0], t1[1], t1[2]], axis=0), b1r)        # (96ni, 16c)
    put("2", *toep_conv(params["e2_w"], params["e2_b"], 16, 1))
    put("3", *toep_conv(params["e3_w"], params["e3_b"], 16, 2))
    put("4", *toep_conv(params["e4_w"], params["e4_b"], 8, 1))
    put("5", *toep_conv(params["e5_w"], params["e5_b"], 8, 2))

    # encoder Linear: fold the NCHW Flatten (index = cc*(4*4) + h*4 + w) into a
    # per-output-height weight permutation; kept in f32.
    w6 = np.asarray(params["e6_w"], np.float32)                         # (latent, c2*16)
    w6p = np.zeros((4, 4 * c2, latent), np.float32)
    for h in range(4):
        for w_ in range(4):
            for cc in range(c2):
                w6p[h, w_ * c2 + cc, :] = w6[:, cc * (4 * 4) + h * 4 + w_]
    prep["w6"] = jnp.asarray(w6p, F32)
    prep["b6"] = jnp.asarray(np.asarray(params["e6_b"], np.float32).reshape(1, -1), F32)

    # decoder Linear: emit rows (h, batch) with lanes (w, c) directly; kept in f32.
    w7 = np.asarray(params["d1_w"], np.float32)                         # (c2*16, latent)
    b7 = np.asarray(params["d1_b"], np.float32)
    w7p = np.zeros((4, latent, 4 * c2), np.float32)
    b7p = np.zeros((4, 1, 4 * c2), np.float32)
    for h in range(4):
        for w_ in range(4):
            for cc in range(c2):
                o = cc * (4 * 4) + h * 4 + w_
                w7p[h, :, w_ * c2 + cc] = w7[o, :]
                b7p[h, 0, w_ * c2 + cc] = b7[o]
    prep["w7"] = jnp.asarray(w7p, F32)
    prep["b7"] = jnp.asarray(b7p, F32)

    put("d2", *toep_convt(params["d2_w"], params["d2_b"], 4))
    put("d3", *toep_conv(params["d3_w"], params["d3_b"], 8, 1))
    put("d4", *toep_convt(params["d4_w"], params["d4_b"], 8))
    put("d5", *toep_conv(params["d5_w"], params["d5_b"], 16, 1))

    # final ConvTranspose: fold the row pixel-shuffle into the weights (3 taps over the
    # parity-split d5), giving a lane-dense (8T, 128*ni) output directly.
    t6, b6r = toep_convt(params["d6_w"], params["d6_b"], 16)            # (2, 16c, 64ni)
    n6 = t6.shape[2]
    wd6 = np.zeros((3, t6.shape[1], 2 * n6), np.float32)
    wd6[0, :, 0:n6] = t6[0]          # even-height tap (h = 2rp)   -> lanes[0:64ni]
    wd6[1, :, 0:n6] = t6[1]          # odd-height tap  (h = 2rp+1) -> lanes[0:64ni]
    wd6[1, :, n6:2 * n6] = t6[0]     # odd-height tap  (h = 2rp+1) -> lanes[64ni:]
    wd6[2, :, n6:2 * n6] = t6[1]     # even-height tap (h = 2rp+2) -> lanes[64ni:]
    prep["wd6"] = jnp.asarray(wd6, BF16)
    prep["bd6"] = jnp.asarray(np.concatenate([b6r, b6r], axis=1), F32)
    return prep


# ---------------------------------------------------------------------------
# Synthetic parameter init (same structure as the torch module)
# ---------------------------------------------------------------------------
def init_params(key, num_in=1, c=8, latent=32):
    ks = iter(jax.random.split(key, 32))

    def conv_w(cout, cin):
        return jax.random.normal(next(ks), (cout, cin, 3, 3), F32) / np.sqrt(9.0 * cin)

    def convt_w(cin, cout):
        return jax.random.normal(next(ks), (cin, cout, 3, 3), F32) / np.sqrt(9.0 * cin)

    def lin_w(cout, cin):
        return jax.random.normal(next(ks), (cout, cin), F32) / np.sqrt(float(cin))

    def bias(n):
        return jax.random.normal(next(ks), (n,), F32) * 0.01

    p = {}
    p["e1_w"], p["e1_b"] = conv_w(c, num_in), bias(c)
    p["e2_w"], p["e2_b"] = conv_w(c, c), bias(c)
    p["e3_w"], p["e3_b"] = conv_w(2 * c, c), bias(2 * c)
    p["e4_w"], p["e4_b"] = conv_w(2 * c, 2 * c), bias(2 * c)
    p["e5_w"], p["e5_b"] = conv_w(2 * c, 2 * c), bias(2 * c)
    p["e6_w"], p["e6_b"] = lin_w(latent, 2 * 16 * c), bias(latent)
    p["d1_w"], p["d1_b"] = lin_w(2 * 16 * c, latent), bias(2 * 16 * c)
    p["d2_w"], p["d2_b"] = convt_w(2 * c, 2 * c), bias(2 * c)
    p["d3_w"], p["d3_b"] = conv_w(2 * c, 2 * c), bias(2 * c)
    p["d4_w"], p["d4_b"] = convt_w(2 * c, c), bias(c)
    p["d5_w"], p["d5_b"] = conv_w(c, c), bias(c)
    p["d6_w"], p["d6_b"] = convt_w(c, num_in), bias(num_in)
    return p


# ---------------------------------------------------------------------------
# Forward pass: single fused pallas_call with a batch grid
# ---------------------------------------------------------------------------
_W_ORDER = ["w1", "b1", "w2", "b2", "w3", "b3", "w4", "b4", "w5", "b5",
            "w6", "b6", "w7", "b7",
            "wd2", "bd2", "wd3", "bd3", "wd4", "bd4", "wd5", "bd5", "wd6", "bd6"]


def autoencoder_forward(prep, x_nchw, *, c=8, ni=1, tb=8):
    B = x_nchw.shape[0]
    T = int(tb)
    nb = -(-B // T)
    Bp = nb * T
    if Bp != B:
        x_nchw = jnp.pad(x_nchw, ((0, Bp - B), (0, 0), (0, 0), (0, 0)))

    # NCHW -> rows (h, b), lanes (w, ci); pre-concatenate conv1's 3 height taps on lanes.
    xl = jnp.transpose(x_nchw, (2, 0, 3, 1)).reshape(32, Bp, 32 * ni).astype(BF16)
    xp = jnp.pad(xl, ((1, 1), (0, 0), (0, 0)))
    xcat = jnp.concatenate([xp[0:32:2], xp[1:33:2], xp[2:34:2]], axis=-1)   # (16, Bp, 96ni)
    xcat = (xcat.reshape(16, nb, T, 96 * ni)
                .transpose(1, 0, 2, 3)
                .reshape(nb * 16 * T, 96 * ni))

    wargs = [prep[n] for n in _W_ORDER]

    def _wspec(a):
        nd = a.ndim
        return pl.BlockSpec(a.shape, lambda i: (0,) * nd)   # weights resident across grid

    out = pl.pallas_call(
        functools.partial(_ae_kernel, T=T, c=c, ni=ni),
        grid=(nb,),
        in_specs=[pl.BlockSpec((16 * T, 96 * ni), lambda i: (i, 0))]
                 + [_wspec(a) for a in wargs],
        out_specs=pl.BlockSpec((8 * T, 128 * ni), lambda i: (i, 0)),
        out_shape=jax.ShapeDtypeStruct((nb * 8 * T, 128 * ni), F32),
        scratch_shapes=[
            pltpu.VMEM((18 * T, 16 * c), BF16),   # s1   : padded conv2 input
            pltpu.VMEM((9 * T, 16 * c), BF16),    # se2  : pad + odd rows of a2
            pltpu.VMEM((9 * T, 16 * c), BF16),    # so2  : even rows of a2 + pad
            pltpu.VMEM((10 * T, 16 * c), BF16),   # s3   : padded conv4 input
            pltpu.VMEM((5 * T, 16 * c), BF16),    # se4
            pltpu.VMEM((5 * T, 16 * c), BF16),    # so4
            pltpu.VMEM((5 * T, 8 * c), BF16),     # sd1  : decoder-Linear output + pad
            pltpu.VMEM((10 * T, 16 * c), BF16),   # sd3i : padded conv-d3 input
            pltpu.VMEM((9 * T, 16 * c), BF16),    # sd3  : conv-d3 output + pad
            pltpu.VMEM((18 * T, 16 * c), BF16),   # sd5i : padded conv-d5 input
            pltpu.VMEM((9 * T, 16 * c), BF16),    # sd5e : even rows of d5 + pad
            pltpu.VMEM((8 * T, 16 * c), BF16),    # sd5o : odd rows of d5
        ],
        compiler_params=pltpu.CompilerParams(
            dimension_semantics=("parallel",)),
    )(xcat, *wargs)

    # (nb*8T, 128*ni): rows (rp, b), lanes (sub, a, q, bphase, co);
    # image height = 4*rp + 2*sub + a, width = 2*q + bphase.
    o = out.reshape(nb, 8, T, 2, 2, 16, 2, ni)
    o = jnp.transpose(o, (0, 2, 7, 1, 3, 4, 5, 6)).reshape(Bp, ni, 32, 32)
    return o[:B]


# ---------------------------------------------------------------------------
# Pure-JAX reference (f32) for end-to-end verification
# ---------------------------------------------------------------------------
def reference_forward(params, x):
    prec = jax.lax.Precision.HIGHEST

    def conv(x, w, b, stride):
        y = jax.lax.conv_general_dilated(
            x, jnp.asarray(w), (stride, stride), ((1, 1), (1, 1)),
            dimension_numbers=("NCHW", "OIHW", "NCHW"), precision=prec)
        return y + jnp.asarray(b).reshape(1, -1, 1, 1)

    def convt(x, w, b):
        # ConvTranspose2d(k=3, s=2, p=1, op=1) == input-dilated conv with flipped kernel.
        wr = jnp.transpose(jnp.asarray(w)[:, :, ::-1, ::-1], (1, 0, 2, 3))
        y = jax.lax.conv_general_dilated(
            x, wr, (1, 1), ((1, 2), (1, 2)), lhs_dilation=(2, 2),
            dimension_numbers=("NCHW", "OIHW", "NCHW"), precision=prec)
        return y + jnp.asarray(b).reshape(1, -1, 1, 1)

    r = jax.nn.relu
    h = r(conv(x, params["e1_w"], params["e1_b"], 2))
    h = r(conv(h, params["e2_w"], params["e2_b"], 1))
    h = r(conv(h, params["e3_w"], params["e3_b"], 2))
    h = r(conv(h, params["e4_w"], params["e4_b"], 1))
    h = r(conv(h, params["e5_w"], params["e5_b"], 2))
    z = jnp.matmul(h.reshape(h.shape[0], -1), params["e6_w"].T, precision=prec) + params["e6_b"]
    d = r(jnp.matmul(z, params["d1_w"].T, precision=prec) + params["d1_b"])
    d = d.reshape(d.shape[0], -1, 4, 4)
    d = r(convt(d, params["d2_w"], params["d2_b"]))
    d = r(conv(d, params["d3_w"], params["d3_b"], 1))
    d = r(convt(d, params["d4_w"], params["d4_b"]))
    d = r(conv(d, params["d5_w"], params["d5_b"], 1))
    return jnp.tanh(convt(d, params["d6_w"], params["d6_b"]))


if __name__ == "__main__":
    key = jax.random.PRNGKey(0)
    pkey, xkey = jax.random.split(key)

    num_input_channels, base_channel_size, latent_dim = 1, 8, 32
    params = init_params(pkey, num_in=num_input_channels, c=base_channel_size,
                         latent=latent_dim)
    prep = prepare_params(params, c=base_channel_size, ni=num_input_channels,
                          latent=latent_dim)

    # Architecture requires 32x32 spatial input (flatten at 4x4 after 3 stride-2 convs).
    # B=16 with an 8-image batch tile -> a 2-step "parallel" batch grid.
    B = 16
    x = jax.random.normal(xkey, (B, num_input_channels, 32, 32), F32)

    fwd = jax.jit(functools.partial(autoencoder_forward, prep,
                                    c=base_channel_size, ni=num_input_channels, tb=8))
    out = fwd(x)
    jax.block_until_ready(out)

    assert out.shape == (B, num_input_channels, 32, 32), out.shape
    assert out.dtype == F32
    assert bool(jnp.all(jnp.isfinite(out)))

    # End-to-end numerical check against a pure-JAX f32 reference (kernel uses bf16 MXU).
    ref = jax.jit(functools.partial(reference_forward, params))(x)
    err = float(jnp.max(jnp.abs(out - ref)))
    assert err < 0.1, f"max abs error vs reference too large: {err}"

    print("KERNEL_OK")
</pallas_src>

<mosaic_0001>
module attributes {stable_mosaic.version = 11 : i64} {
  func.func @_ae_kernel(%arg0: i32, %arg1: memref<128x96xbf16, #tpu.memory_space<vmem>>, %arg2: memref<96x128xbf16, #tpu.memory_space<vmem>>, %arg3: memref<1x128xf32, #tpu.memory_space<vmem>>, %arg4: memref<3x128x128xbf16, #tpu.memory_space<vmem>>, %arg5: memref<1x128xf32, #tpu.memory_space<vmem>>, %arg6: memref<3x128x128xbf16, #tpu.memory_space<vmem>>, %arg7: memref<1x128xf32, #tpu.memory_space<vmem>>, %arg8: memref<3x128x128xbf16, #tpu.memory_space<vmem>>, %arg9: memref<1x128xf32, #tpu.memory_space<vmem>>, %arg10: memref<3x128x64xbf16, #tpu.memory_space<vmem>>, %arg11: memref<1x64xf32, #tpu.memory_space<vmem>>, %arg12: memref<4x64x32xf32, #tpu.memory_space<vmem>>, %arg13: memref<1x32xf32, #tpu.memory_space<vmem>>, %arg14: memref<4x32x64xf32, #tpu.memory_space<vmem>>, %arg15: memref<4x1x64xf32, #tpu.memory_space<vmem>>, %arg16: memref<2x64x256xbf16, #tpu.memory_space<vmem>>, %arg17: memref<1x256xf32, #tpu.memory_space<vmem>>, %arg18: memref<3x128x128xbf16, #tpu.memory_space<vmem>>, %arg19: memref<1x128xf32, #tpu.memory_space<vmem>>, %arg20: memref<2x128x256xbf16, #tpu.memory_space<vmem>>, %arg21: memref<1x256xf32, #tpu.memory_space<vmem>>, %arg22: memref<3x128x128xbf16, #tpu.memory_space<vmem>>, %arg23: memref<1x128xf32, #tpu.memory_space<vmem>>, %arg24: memref<3x128x128xbf16, #tpu.memory_space<vmem>>, %arg25: memref<1x128xf32, #tpu.memory_space<vmem>>, %arg26: memref<64x128xf32, #tpu.memory_space<vmem>>, %arg27: memref<144x128xbf16, #tpu.memory_space<vmem>>, %arg28: memref<72x128xbf16, #tpu.memory_space<vmem>>, %arg29: memref<72x128xbf16, #tpu.memory_space<vmem>>, %arg30: memref<80x128xbf16, #tpu.memory_space<vmem>>, %arg31: memref<40x128xbf16, #tpu.memory_space<vmem>>, %arg32: memref<40x128xbf16, #tpu.memory_space<vmem>>, %arg33: memref<40x64xbf16, #tpu.memory_space<vmem>>, %arg34: memref<80x128xbf16, #tpu.memory_space<vmem>>, %arg35: memref<72x128xbf16, #tpu.memory_space<vmem>>, %arg36: memref<144x128xbf16, #tpu.memory_space<vmem>>, %arg37: memref<72x128xbf16, #tpu.memory_space<vmem>>, %arg38: memref<64x128xbf16, #tpu.memory_space<vmem>>) attributes {dimension_semantics = [#tpu.dimension_semantics<parallel>], iteration_bounds = array<i64: 2>, scalar_prefetch = 0 : i64, scratch_operands = 12 : i64, tpu.core_type = #tpu.core_type<tc>, window_params = [{transform_indices = @transform_0, window_bounds = array<i64: 128, 96>}, {pipeline_mode = #tpu.pipeline_mode<synchronous>, transform_indices = @transform_1, window_bounds = array<i64: 96, 128>}, {pipeline_mode = #tpu.pipeline_mode<synchronous>, transform_indices = @transform_2, window_bounds = array<i64: 1, 128>}, {pipeline_mode = #tpu.pipeline_mode<synchronous>, transform_indices = @transform_3, window_bounds = array<i64: 3, 128, 128>}, {pipeline_mode = #tpu.pipeline_mode<synchronous>, transform_indices = @transform_4, window_bounds = array<i64: 1, 128>}, {pipeline_mode = #tpu.pipeline_mode<synchronous>, transform_indices = @transform_5, window_bounds = array<i64: 3, 128, 128>}, {pipeline_mode = #tpu.pipeline_mode<synchronous>, transform_indices = @transform_6, window_bounds = array<i64: 1, 128>}, {pipeline_mode = #tpu.pipeline_mode<synchronous>, transform_indices = @transform_7, window_bounds = array<i64: 3, 128, 128>}, {pipeline_mode = #tpu.pipeline_mode<synchronous>, transform_indices = @transform_8, window_bounds = array<i64: 1, 128>}, {pipeline_mode = #tpu.pipeline_mode<synchronous>, transform_indices = @transform_9, window_bounds = array<i64: 3, 128, 64>}, {pipeline_mode = #tpu.pipeline_mode<synchronous>, transform_indices = @transform_10, window_bounds = array<i64: 1, 64>}, {pipeline_mode = #tpu.pipeline_mode<synchronous>, transform_indices = @transform_11, window_bounds = array<i64: 4, 64, 32>}, {pipeline_mode = #tpu.pipeline_mode<synchronous>, transform_indices = @transform_12, window_bounds = array<i64: 1, 32>}, {pipeline_mode = #tpu.pipeline_mode<synchronous>, transform_indices = @transform_13, window_bounds = array<i64: 4, 32, 64>}, {pipeline_mode = #tpu.pipeline_mode<synchronous>, transform_indices = @transform_14, window_bounds = array<i64: 4, 1, 64>}, {pipeline_mode = #tpu.pipeline_mode<synchronous>, transform_indices = @transform_15, window_bounds = array<i64: 2, 64, 256>}, {pipeline_mode = #tpu.pipeline_mode<synchronous>, transform_indices = @transform_16, window_bounds = array<i64: 1, 256>}, {pipeline_mode = #tpu.pipeline_mode<synchronous>, transform_indices = @transform_17, window_bounds = array<i64: 3, 128, 128>}, {pipeline_mode = #tpu.pipeline_mode<synchronous>, transform_indices = @transform_18, window_bounds = array<i64: 1, 128>}, {pipeline_mode = #tpu.pipeline_mode<synchronous>, transform_indices = @transform_19, window_bounds = array<i64: 2, 128, 256>}, {pipeline_mode = #tpu.pipeline_mode<synchronous>, transform_indices = @transform_20, window_bounds = array<i64: 1, 256>}, {pipeline_mode = #tpu.pipeline_mode<synchronous>, transform_indices = @transform_21, window_bounds = array<i64: 3, 128, 128>}, {pipeline_mode = #tpu.pipeline_mode<synchronous>, transform_indices = @transform_22, window_bounds = array<i64: 1, 128>}, {pipeline_mode = #tpu.pipeline_mode<synchronous>, transform_indices = @transform_23, window_bounds = array<i64: 3, 128, 128>}, {pipeline_mode = #tpu.pipeline_mode<synchronous>, transform_indices = @transform_24, window_bounds = array<i64: 1, 128>}, {transform_indices = @transform_25, window_bounds = array<i64: 64, 128>}]} {
    %c0 = arith.constant 0 : index
    %c0_0 = arith.constant 0 : index
    %0 = vector.load %arg1[%c0, %c0_0] : memref<128x96xbf16, #tpu.memory_space<vmem>>, vector<128x96xbf16>
    %c0_1 = arith.constant 0 : index
    %c0_2 = arith.constant 0 : index
    %1 = vector.load %arg2[%c0_1, %c0_2] : memref<96x128xbf16, #tpu.memory_space<vmem>>, vector<96x128xbf16>
    %cst = arith.constant dense<0.000000e+00> : vector<128x128xf32>
    %2 = tpu.matmul %0, %1, %cst {dimension_numbers = #tpu.dot_dimension_numbers<[1], [0], [0], [1], [0, 0, 1, 1], [], []>} : vector<128x96xbf16>, vector<96x128xbf16>, vector<128x128xf32> -> vector<128x128xf32>
    %c0_3 = arith.constant 0 : index
    %c0_4 = arith.constant 0 : index
    %3 = vector.load %arg3[%c0_3, %c0_4] : memref<1x128xf32, #tpu.memory_space<vmem>>, vector<1x128xf32>
    %4 = vector.broadcast %3 : vector<1x128xf32> to vector<128x128xf32>
    %5 = arith.addf %2, %4 : vector<128x128xf32>
    %cst_5 = arith.constant 0.000000e+00 : f32
    %6 = vector.broadcast %cst_5 : f32 to vector<128x128xf32>
    %7 = arith.maximumf %5, %6 : vector<128x128xf32>
    %cst_6 = arith.constant 0.000000e+00 : bf16
    %8 = vector.broadcast %cst_6 : bf16 to vector<8x128xbf16>
    %c0_7 = arith.constant 0 : index
    %c0_8 = arith.constant 0 : index
    %9 = vector.load %arg27[%c0_7, %c0_8] : memref<144x128xbf16, #tpu.memory_space<vmem>>, vector<8x128xbf16>
    tpu.vector_store %arg27[%c0_7, %c0_8], %8 {strides = array<i32>} : memref<144x128xbf16, #tpu.memory_space<vmem>>, vector<8x128xbf16>,
    %cst_9 = arith.constant 0.000000e+00 : bf16
    %10 = vector.broadcast %cst_9 : bf16 to vector<8x128xbf16>
    %c136 = arith.constant 136 : index
    %c0_10 = arith.constant 0 : index
    %11 = vector.load %arg27[%c136, %c0_10] : memref<144x128xbf16, #tpu.memory_space<vmem>>, vector<8x128xbf16>
    tpu.vector_store %arg27[%c136, %c0_10], %10 {strides = array<i32>} : memref<144x128xbf16, #tpu.memory_space<vmem>>, vector<8x128xbf16>,
    %12 = arith.truncf %7 : vector<128x128xf32> to vector<128x128xbf16>
    %c8 = arith.constant 8 : index
    %c0_11 = arith.constant 0 : index
    %13 = vector.load %arg27[%c8, %c0_11] : memref<144x128xbf16, #tpu.memory_space<vmem>>, vector<128x128xbf16>
    tpu.vector_store %arg27[%c8, %c0_11], %12 {strides = array<i32>} : memref<144x128xbf16, #tpu.memory_space<vmem>>, vector<128x128xbf16>,
    %c0_12 = arith.constant 0 : index
    %c0_13 = arith.constant 0 : index
    %14 = vector.load %arg27[%c0_12, %c0_13] : memref<144x128xbf16, #tpu.memory_space<vmem>>, vector<128x128xbf16>
    %c0_14 = arith.constant 0 : index
    %c0_15 = arith.constant 0 : index
    %c0_16 = arith.constant 0 : index
    %15 = vector.load %arg4[%c0_14, %c0_15, %c0_16] : memref<3x128x128xbf16, #tpu.memory_space<vmem>>, vector<1x128x128xbf16>
    %16 = vector.shape_cast %15 : vector<1x128x128xbf16> to vector<128x128xbf16>
    %cst_17 = arith.constant dense<0.000000e+00> : vector<128x128xf32>
    %17 = tpu.matmul %14, %16, %cst_17 {dimension_numbers = #tpu.dot_dimension_numbers<[1], [0], [0], [1], [0, 0, 1, 1], [], []>} : vector<128x128xbf16>, vector<128x128xbf16>, vector<128x128xf32> -> vector<128x128xf32>
    %c8_18 = arith.constant 8 : index
    %c0_19 = arith.constant 0 : index
    %18 = vector.load %arg27[%c8_18, %c0_19] : memref<144x128xbf16, #tpu.memory_space<vmem>>, vector<128x128xbf16>
    %c1 = arith.constant 1 : index
    %c0_20 = arith.constant 0 : index
    %c0_21 = arith.constant 0 : index
    %19 = vector.load %arg4[%c1, %c0_20, %c0_21] : memref<3x128x128xbf16, #tpu.memory_space<vmem>>, vector<1x128x128xbf16>
    %20 = vector.shape_cast %19 : vector<1x128x128xbf16> to vector<128x128xbf16>
    %cst_22 = arith.constant dense<0.000000e+00> : vector<128x128xf32>
    %21 = tpu.matmul %18, %20, %cst_22 {dimension_numbers = #tpu.dot_dimension_numbers<[1], [0], [0], [1], [0, 0, 1, 1], [], []>} : vector<128x128xbf16>, vector<128x128xbf16>, vector<128x128xf32> -> vector<128x128xf32>
    %22 = arith.addf %17, %21 : vector<128x128xf32>
    %c16 = arith.constant 16 : index
    %c0_23 = arith.constant 0 : index
    %23 = vector.load %arg27[%c16, %c0_23] : memref<144x128xbf16, #tpu.memory_space<vmem>>, vector<128x128xbf16>
    %c2 = arith.constant 2 : index
    %c0_24 = arith.constant 0 : index
    %c0_25 = arith.constant 0 : index
    %24 = vector.load %arg4[%c2, %c0_24, %c0_25] : memref<3x128x128xbf16, #tpu.memory_space<vmem>>, vector<1x128x128xbf16>
    %25 = vector.shape_cast %24 : vector<1x128x128xbf16> to vector<128x128xbf16>
    %cst_26 = arith.constant dense<0.000000e+00> : vector<128x128xf32>
    %26 = tpu.matmul %23, %25, %cst_26 {dimension_numbers = #tpu.dot_dimension_numbers<[1], [0], [0], [1], [0, 0, 1, 1], [], []>} : vector<128x128xbf16>, vector<128x128xbf16>, vector<128x128xf32> -> vector<128x128xf32>
    %27 = arith.addf %22, %26 : vector<128x128xf32>
    %c0_27 = arith.constant 0 : index
    %c0_28 = arith.constant 0 : index
    %28 = vector.load %arg5[%c0_27, %c0_28] : memref<1x128xf32, #tpu.memory_space<vmem>>, vector<1x128xf32>
    %29 = vector.broadcast %28 : vector<1x128xf32> to vector<128x128xf32>
    %30 = arith.addf %27, %29 : vector<128x128xf32>
    %cst_29 = arith.constant 0.000000e+00 : f32
    %31 = vector.broadcast %cst_29 : f32 to vector<128x128xf32>
    %32 = arith.maximumf %30, %31 : vector<128x128xf32>
    %cst_30 = arith.constant 0.000000e+00 : bf16
    %33 = vector.broadcast %cst_30 : bf16 to vector<8x128xbf16>
    %c0_31 = arith.constant 0 : index
    %c0_32 = arith.constant 0 : index
    %34 = vector.load %arg28[%c0_31, %c0_32] : memref<72x128xbf16, #tpu.memory_space<vmem>>, vector<8x128xbf16>
    tpu.vector_store %arg28[%c0_31, %c0_32], %33 {strides = array<i32>} : memref<72x128xbf16, #tpu.memory_space<vmem>>, vector<8x128xbf16>,
    %cst_33 = arith.constant 0.000000e+00 : bf16
    %35 = vector.broadcast %cst_33 : bf16 to vector<8x128xbf16>
    %c64 = arith.constant 64 : index
    %c0_34 = arith.constant 0 : index
    %36 = vector.load %arg29[%c64, %c0_34] : memref<72x128xbf16, #tpu.memory_space<vmem>>, vector<8x128xbf16>
    tpu.vector_store %arg29[%c64, %c0_34], %35 {strides = array<i32>} : memref<72x128xbf16, #tpu.memory_space<vmem>>, vector<8x128xbf16>,
    %37 = vector.extract_strided_slice %32 {offsets = [0, 0], sizes = [8, 128], strides = [1, 1]} : vector<128x128xf32> to vector<8x128xf32>
    %38 = arith.truncf %37 : vector<8x128xf32> to vector<8x128xbf16>
    %c0_35 = arith.constant 0 : index
    %c0_36 = arith.constant 0 : index
    %39 = vector.load %arg29[%c0_35, %c0_36] : memref<72x128xbf16, #tpu.memory_space<vmem>>, vector<8x128xbf16>
    tpu.vector_store %arg29[%c0_35, %c0_36], %38 {strides = array<i32>} : memref<72x128xbf16, #tpu.memory_space<vmem>>, vector<8x128xbf16>,
    %40 = vector.extract_strided_slice %32 {offsets = [8, 0], sizes = [8, 128], strides = [1, 1]} : vector<128x128xf32> to vector<8x128xf32>
    %41 = arith.truncf %40 : vector<8x128xf32> to vector<8x128xbf16>
    %c8_37 = arith.constant 8 : index
    %c0_38 = arith.constant 0 : index
    %42 = vector.load %arg28[%c8_37, %c0_38] : memref<72x128xbf16, #tpu.memory_space<vmem>>, vector<8x128xbf16>
    tpu.vector_store %arg28[%c8_37, %c0_38], %41 {strides = array<i32>} : memref<72x128xbf16, #tpu.memory_space<vmem>>, vector<8x128xbf16>,
    %43 = vector.extract_strided_slice %32 {offsets = [16, 0], sizes = [8, 128], strides = [1, 1]} : vector<128x128xf32> to vector<8x128xf32>
    %44 = arith.truncf %43 : vector<8x128xf32> to vector<8x128xbf16>
    %c8_39 = arith.constant 8 : index
    %c0_40 = arith.constant 0 : index
    %45 = vector.load %arg29[%c8_39, %c0_40] : memref<72x128xbf16, #tpu.memory_space<vmem>>, vector<8x128xbf16>
    tpu.vector_store %arg29[%c8_39, %c0_40], %44 {strides = array<i32>} : memref<72x128xbf16, #tpu.memory_space<vmem>>, vector<8x128xbf16>,
    %46 = vector.extract_strided_slice %32 {offsets = [24, 0], sizes = [8, 128], strides = [1, 1]} : vector<128x128xf32> to vector<8x128xf32>
    %47 = arith.truncf %46 : vector<8x128xf32> to vector<8x128xbf16>
    %c16_41 = arith.constant 16 : index
    %c0_42 = arith.constant 0 : index
    %48 = vector.load %arg28[%c16_41, %c0_42] : memref<72x128xbf16, #tpu.memory_space<vmem>>, vector<8x128xbf16>
    tpu.vector_store %arg28[%c16_41, %c0_42], %47 {strides = array<i32>} : memref<72x128xbf16, #tpu.memory_space<vmem>>, vector<8x128xbf16>,
    %49 = vector.extract_strided_slice %32 {offsets = [32, 0], sizes = [8, 128], strides = [1, 1]} : vector<128x128xf32> to vector<8x128xf32>
    %50 = arith.truncf %49 : vector<8x128xf32> to vector<8x128xbf16>
    %c16_43 = arith.constant 16 : index
    %c0_44 = arith.constant 0 : index
    %51 = vector.load %arg29[%c16_43, %c0_44] : memref<72x128xbf16, #tpu.memory_space<vmem>>, vector<8x128xbf16>
    tpu.vector_store %arg29[%c16_43, %c0_44], %50 {strides = array<i32>} : memref<72x128xbf16, #tpu.memory_space<vmem>>, vector<8x128xbf16>,
    %52 = vector.extract_strided_slice %32 {offsets = [40, 0], sizes = [8, 128], strides = [1, 1]} : vector<128x128xf32> to vector<8x128xf32>
    %53 = arith.truncf %52 : vector<8x128xf32> to vector<8x128xbf16>
    %c24 = arith.constant 24 : index
    %c0_45 = arith.constant 0 : index
    %54 = vector.load %arg28[%c24, %c0_45] : memref<72x128xbf16, #tpu.memory_space<vmem>>, vector<8x128xbf16>
    tpu.vector_store %arg28[%c24, %c0_45], %53 {strides = array<i32>} : memref<72x128xbf16, #tpu.memory_space<vmem>>, vector<8x128xbf16>,
    %55 = vector.extract_strided_slice %32 {offsets = [48, 0], sizes = [8, 128], strides = [1, 1]} : vector<128x128xf32> to vector<8x128xf32>
    %56 = arith.truncf %55 : vector<8x128xf32> to vector<8x128xbf16>
    %c24_46 = arith.constant 24 : index
    %c0_47 = arith.constant 0 : index
    %57 = vector.load %arg29[%c24_46, %c0_47] : memref<72x128xbf16, #tpu.memory_space<vmem>>, vector<8x128xbf16>
    tpu.vector_store %arg29[%c24_46, %c0_47], %56 {strides = array<i32>} : memref<72x128xbf16, #tpu.memory_space<vmem>>, vector<8x128xbf16>,
    %58 = vector.extract_strided_slice %32 {offsets = [56, 0], sizes = [8, 128], strides = [1, 1]} : vector<128x128xf32> to vector<8x128xf32>
    %59 = arith.truncf %58 : vector<8x128xf32> to vector<8x128xbf16>
    %c32 = arith.constant 32 : index
    %c0_48 = arith.constant 0 : index
    %60 = vector.load %arg28[%c32, %c0_48] : memref<72x128xbf16, #tpu.memory_space<vmem>>, vector<8x128xbf16>
    tpu.vector_store %arg28[%c32, %c0_48], %59 {strides = array<i32>} : memref<72x128xbf16, #tpu.memory_space<vmem>>, vector<8x128xbf16>,
    %61 = vector.extract_strided_slice %32 {offsets = [64, 0], sizes = [8, 128], strides = [1, 1]} : vector<128x128xf32> to vector<8x128xf32>
    %62 = arith.truncf %61 : vector<8x128xf32> to vector<8x128xbf16>
    %c32_49 = arith.constant 32 : index
    %c0_50 = arith.constant 0 : index
    %63 = vector.load %arg29[%c32_49, %c0_50] : memref<72x128xbf16, #tpu.memory_space<vmem>>, vector<8x128xbf16>
    tpu.vector_store %arg29[%c32_49, %c0_50], %62 {strides = array<i32>} : memref<72x128xbf16, #tpu.memory_space<vmem>>, vector<8x128xbf16>,
    %64 = vector.extract_strided_slice %32 {offsets = [72, 0], sizes = [8, 128], strides = [1, 1]} : vector<128x128xf32> to vector<8x128xf32>
    %65 = arith.truncf %64 : vector<8x128xf32> to vector<8x128xbf16>
    %c40 = arith.constant 40 : index
    %c0_51 = arith.constant 0 : index
    %66 = vector.load %arg28[%c40, %c0_51] : memref<72x128xbf16, #tpu.memory_space<vmem>>, vector<8x128xbf16>
    tpu.vector_store %arg28[%c40, %c0_51], %65 {strides = array<i32>} : memref<72x128xbf16, #tpu.memory_space<vmem>>, vector<8x128xbf16>,
    %67 = vector.extract_strided_slice %32 {offsets = [80, 0], sizes = [8, 128], strides = [1, 1]} : vector<128x128xf32> to vector<8x128xf32>
    %68 = arith.truncf %67 : vector<8x128xf32> to vector<8x128xbf16>
    %c40_52 = arith.constant 40 : index
    %c0_53 = arith.constant 0 : index
    %69 = vector.load %arg29[%c40_52, %c0_53] : memref<72x128xbf16, #tpu.memory_space<vmem>>, vector<8x128xbf16>
    tpu.vector_store %arg29[%c40_52, %c0_53], %68 {strides = array<i32>} : memref<72x128xbf16, #tpu.memory_space<vmem>>, vector<8x128xbf16>,
    %70 = vector.extract_strided_slice %32 {offsets = [88, 0], sizes = [8, 128], strides = [1, 1]} : vector<128x128xf32> to vector<8x128xf32>
    %71 = arith.truncf %70 : vector<8x128xf32> to vector<8x128xbf16>
    %c48 = arith.constant 48 : index
    %c0_54 = arith.constant 0 : index
    %72 = vector.load %arg28[%c48, %c0_54] : memref<72x128xbf16, #tpu.memory_space<vmem>>, vector<8x128xbf16>
    tpu.vector_store %arg28[%c48, %c0_54], %71 {strides = array<i32>} : memref<72x128xbf16, #tpu.memory_space<vmem>>, vector<8x128xbf16>,
    %73 = vector.extract_strided_slice %32 {offsets = [96, 0], sizes = [8, 128], strides = [1, 1]} : vector<128x128xf32> to vector<8x128xf32>
    %74 = arith.truncf %73 : vector<8x128xf32> to vector<8x128xbf16>
    %c48_55 = arith.constant 48 : index
    %c0_56 = arith.constant 0 : index
    %75 = vector.load %arg29[%c48_55, %c0_56] : memref<72x128xbf16, #tpu.memory_space<vmem>>, vector<8x128xbf16>
    tpu.vector_store %arg29[%c48_55, %c0_56], %74 {strides = array<i32>} : memref<72x128xbf16, #tpu.memory_space<vmem>>, vector<8x128xbf16>,
    %76 = vector.extract_strided_slice %32 {offsets = [104, 0], sizes = [8, 128], strides = [1, 1]} : vector<128x128xf32> to vector<8x128xf32>
    %77 = arith.truncf %76 : vector<8x128xf32> to vector<8x128xbf16>
    %c56 = arith.constant 56 : index
    %c0_57 = arith.constant 0 : index
    %78 = vector.load %arg28[%c56, %c0_57] : memref<72x128xbf16, #tpu.memory_space<vmem>>, vector<8x128xbf16>
    tpu.vector_store %arg28[%c56, %c0_57], %77 {strides = array<i32>} : memref<72x128xbf16, #tpu.memory_space<vmem>>, vector<8x128xbf16>,
    %79 = vector.extract_strided_slice %32 {offsets = [112, 0], sizes = [8, 128], strides = [1, 1]} : vector<128x128xf32> to vector<8x128xf32>
    %80 = arith.truncf %79 : vector<8x128xf32> to vector<8x128xbf16>
    %c56_58 = arith.constant 56 : index
    %c0_59 = arith.constant 0 : index
    %81 = vector.load %arg29[%c56_58, %c0_59] : memref<72x128xbf16, #tpu.memory_space<vmem>>, vector<8x128xbf16>
    tpu.vector_store %arg29[%c56_58, %c0_59], %80 {strides = array<i32>} : memref<72x128xbf16, #tpu.memory_space<vmem>>, vector<8x128xbf16>,
    %82 = vector.extract_strided_slice %32 {offsets = [120, 0], sizes = [8, 128], strides = [1, 1]} : vector<128x128xf32> to vector<8x128xf32>
    %83 = arith.truncf %82 : vector<8x128xf32> to vector<8x128xbf16>
    %c64_60 = arith.constant 64 : index
    %c0_61 = arith.constant 0 : index
    %84 = vector.load %arg28[%c64_60, %c0_61] : memref<72x128xbf16, #tpu.memory_space<vmem>>, vector<8x128xbf16>
    tpu.vector_store %arg28[%c64_60, %c0_61], %83 {strides = array<i32>} : memref<72x128xbf16, #tpu.memory_space<vmem>>, vector<8x128xbf16>,
    %c0_62 = arith.constant 0 : index
    %c0_63 = arith.constant 0 : index
    %85 = vector.load %arg28[%c0_62, %c0_63] : memref<72x128xbf16, #tpu.memory_space<vmem>>, vector<64x128xbf16>
    %c0_64 = arith.constant 0 : index
    %c0_65 = arith.constant 0 : index
    %c0_66 = arith.constant 0 : index
    %86 = vector.load %arg6[%c0_64, %c0_65, %c0_66] : memref<3x128x128xbf16, #tpu.memory_space<vmem>>, vector<1x128x128xbf16>
    %87 = vector.shape_cast %86 : vector<1x128x128xbf16> to vector<128x128xbf16>
    %cst_67 = arith.constant dense<0.000000e+00> : vector<64x128xf32>
    %88 = tpu.matmul %85, %87, %cst_67 {dimension_numbers = #tpu.dot_dimension_numbers<[1], [0], [0], [1], [0, 0, 1, 1], [], []>} : vector<64x128xbf16>, vector<128x128xbf16>, vector<64x128xf32> -> vector<64x128xf32>
    %c0_68 = arith.constant 0 : index
    %c0_69 = arith.constant 0 : index
    %89 = vector.load %arg29[%c0_68, %c0_69] : memref<72x128xbf16, #tpu.memory_space<vmem>>, vector<64x128xbf16>
    %c1_70 = arith.constant 1 : index
    %c0_71 = arith.constant 0 : index
    %c0_72 = arith.constant 0 : index
    %90 = vector.load %arg6[%c1_70, %c0_71, %c0_72] : memref<3x128x128xbf16, #tpu.memory_space<vmem>>, vector<1x128x128xbf16>
    %91 = vector.shape_cast %90 : vector<1x128x128xbf16> to vector<128x128xbf16>
    %cst_73 = arith.constant dense<0.000000e+00> : vector<64x128xf32>
    %92 = tpu.matmul %89, %91, %cst_73 {dimension_numbers = #tpu.dot_dimension_numbers<[1], [0], [0], [1], [0, 0, 1, 1], [], []>} : vector<64x128xbf16>, vector<128x128xbf16>, vector<64x128xf32> -> vector<64x128xf32>
    %93 = arith.addf %88, %92 : vector<64x128xf32>
    %c8_74 = arith.constant 8 : index
    %c0_75 = arith.constant 0 : index
    %94 = vector.load %arg28[%c8_74, %c0_75] : memref<72x128xbf16, #tpu.memory_space<vmem>>, vector<64x128xbf16>
    %c2_76 = arith.constant 2 : index
    %c0_77 = arith.constant 0 : index
    %c0_78 = arith.constant 0 : index
    %95 = vector.load %arg6[%c2_76, %c0_77, %c0_78] : memref<3x128x128xbf16, #tpu.memory_space<vmem>>, vector<1x128x128xbf16>
    %96 = vector.shape_cast %95 : vector<1x128x128xbf16> to vector<128x128xbf16>
    %cst_79 = arith.constant dense<0.000000e+00> : vector<64x128xf32>
    %97 = tpu.matmul %94, %96, %cst_79 {dimension_numbers = #tpu.dot_dimension_numbers<[1], [0], [0], [1], [0, 0, 1, 1], [], []>} : vector<64x128xbf16>, vector<128x128xbf16>, vector<64x128xf32> -> vector<64x128xf32>
    %98 = arith.addf %93, %97 : vector<64x128xf32>
    %c0_80 = arith.constant 0 : index
    %c0_81 = arith.constant 0 : index
    %99 = vector.load %arg7[%c0_80, %c0_81] : memref<1x128xf32, #tpu.memory_space<vmem>>, vector<1x128xf32>
    %100 = vector.broadcast %99 : vector<1x128xf32> to vector<64x128xf32>
    %101 = arith.addf %98, %100 : vector<64x128xf32>
    %cst_82 = arith.constant 0.000000e+00 : f32
    %102 = vector.broadcast %cst_82 : f32 to vector<64x128xf32>
    %103 = arith.maximumf %101, %102 : vector<64x128xf32>
    %cst_83 = arith.constant 0.000000e+00 : bf16
    %104 = vector.broadcast %cst_83 : bf16 to vector<8x128xbf16>
    %c0_84 = arith.constant 0 : index
    %c0_85 = arith.constant 0 : index
    %105 = vector.load %arg30[%c0_84, %c0_85] : memref<80x128xbf16, #tpu.memory_space<vmem>>, vector<8x128xbf16>
    tpu.vector_store %arg30[%c0_84, %c0_85], %104 {strides = array<i32>} : memref<80x128xbf16, #tpu.memory_space<vmem>>, vector<8x128xbf16>,
    %cst_86 = arith.constant 0.000000e+00 : bf16
    %106 = vector.broadcast %cst_86 : bf16 to vector<8x128xbf16>
    %c72 = arith.constant 72 : index
    %c0_87 = arith.constant 0 : index
    %107 = vector.load %arg30[%c72, %c0_87] : memref<80x128xbf16, #tpu.memory_space<vmem>>, vector<8x128xbf16>
    tpu.vector_store %arg30[%c72, %c0_87], %106 {strides = array<i32>} : memref<80x128xbf16, #tpu.memory_space<vmem>>, vector<8x128xbf16>,
    %108 = arith.truncf %103 : vector<64x128xf32> to vector<64x128xbf16>
    %c8_88 = arith.constant 8 : index
    %c0_89 = arith.constant 0 : index
    %109 = vector.load %arg30[%c8_88, %c0_89] : memref<80x128xbf16, #tpu.memory_space<vmem>>, vector<64x128xbf16>
    tpu.vector_store %arg30[%c8_88, %c0_89], %108 {strides = array<i32>} : memref<80x128xbf16, #tpu.memory_space<vmem>>, vector<64x128xbf16>,
    %c0_90 = arith.constant 0 : index
    %c0_91 = arith.constant 0 : index
    %110 = vector.load %arg30[%c0_90, %c0_91] : memref<80x128xbf16, #tpu.memory_space<vmem>>, vector<64x128xbf16>
    %c0_92 = arith.constant 0 : index
    %c0_93 = arith.constant 0 : index
    %c0_94 = arith.constant 0 : index
    %111 = vector.load %arg8[%c0_92, %c0_93, %c0_94] : memref<3x128x128xbf16, #tpu.memory_space<vmem>>, vector<1x128x128xbf16>
    %112 = vector.shape_cast %111 : vector<1x128x128xbf16> to vector<128x128xbf16>
    %cst_95 = arith.constant dense<0.000000e+00> : vector<64x128xf32>
    %113 = tpu.matmul %110, %112, %cst_95 {dimension_numbers = #tpu.dot_dimension_numbers<[1], [0], [0], [1], [0, 0, 1, 1], [], []>} : vector<64x128xbf16>, vector<128x128xbf16>, vector<64x128xf32> -> vector<64x128xf32>
    %c8_96 = arith.constant 8 : index
    %c0_97 = arith.constant 0 : index
    %114 = vector.load %arg30[%c8_96, %c0_97] : memref<80x128xbf16, #tpu.memory_space<vmem>>, vector<64x128xbf16>
    %c1_98 = arith.constant 1 : index
    %c0_99 = arith.constant 0 : index
    %c0_100 = arith.constant 0 : index
    %115 = vector.load %arg8[%c1_98, %c0_99, %c0_100] : memref<3x128x128xbf16, #tpu.memory_space<vmem>>, vector<1x128x128xbf16>
    %116 = vector.shape_cast %115 : vector<1x128x128xbf16> to vector<128x128xbf16>
    %cst_101 = arith.constant dense<0.000000e+00> : vector<64x128xf32>
    %117 = tpu.matmul %114, %116, %cst_101 {dimension_numbers = #tpu.dot_dimension_numbers<[1], [0], [0], [1], [0, 0, 1, 1], [], []>} : vector<64x128xbf16>, vector<128x128xbf16>, vector<64x128xf32> -> vector<64x128xf32>
    %118 = arith.addf %113, %117 : vector<64x128xf32>
    %c16_102 = arith.constant 16 : index
    %c0_103 = arith.constant 0 : index
    %119 = vector.load %arg30[%c16_102, %c0_103] : memref<80x128xbf16, #tpu.memory_space<vmem>>, vector<64x128xbf16>
    %c2_104 = arith.constant 2 : index
    %c0_105 = arith.constant 0 : index
    %c0_106 = arith.constant 0 : index
    %120 = vector.load %arg8[%c2_104, %c0_105, %c0_106] : memref<3x128x128xbf16, #tpu.memory_space<vmem>>, vector<1x128x128xbf16>
    %121 = vector.shape_cast %120 : vector<1x128x128xbf16> to vector<128x128xbf16>
    %cst_107 = arith.constant dense<0.000000e+00> : vector<64x128xf32>
    %122 = tpu.matmul %119, %121, %cst_107 {dimension_numbers = #tpu.dot_dimension_numbers<[1], [0], [0], [1], [0, 0, 1, 1], [], []>} : vector<64x128xbf16>, vector<128x128xbf16>, vector<64x128xf32> -> vector<64x128xf32>
    %123 = arith.addf %118, %122 : vector<64x128xf32>
    %c0_108 = arith.constant 0 : index
    %c0_109 = arith.constant 0 : index
    %124 = vector.load %arg9[%c0_108, %c0_109] : memref<1x128xf32, #tpu.memory_space<vmem>>, vector<1x128xf32>
    %125 = vector.broadcast %124 : vector<1x128xf32> to vector<64x128xf32>
    %126 = arith.addf %123, %125 : vector<64x128xf32>
    %cst_110 = arith.constant 0.000000e+00 : f32
    %127 = vector.broadcast %cst_110 : f32 to vector<64x128xf32>
    %128 = arith.maximumf %126, %127 : vector<64x128xf32>
    %cst_111 = arith.constant 0.000000e+00 : bf16
    %129 = vector.broadcast %cst_111 : bf16 to vector<8x128xbf16>
    %c0_112 = arith.constant 0 : index
    %c0_113 = arith.constant 0 : index
    %130 = vector.load %arg31[%c0_112, %c0_113] : memref<40x128xbf16, #tpu.memory_space<vmem>>, vector<8x128xbf16>
    tpu.vector_store %arg31[%c0_112, %c0_113], %129 {strides = array<i32>} : memref<40x128xbf16, #tpu.memory_space<vmem>>, vector<8x128xbf16>,
    %cst_114 = arith.constant 0.000000e+00 : bf16
    %131 = vector.broadcast %cst_114 : bf16 to vector<8x128xbf16>
    %c32_115 = arith.constant 32 : index
    %c0_116 = arith.constant 0 : index
    %132 = vector.load %arg32[%c32_115, %c0_116] : memref<40x128xbf16, #tpu.memory_space<vmem>>, vector<8x128xbf16>
    tpu.vector_store %arg32[%c32_115, %c0_116], %131 {strides = array<i32>} : memref<40x128xbf16, #tpu.memory_space<vmem>>, vector<8x128xbf16>,
    %133 = vector.extract_strided_slice %128 {offsets = [0, 0], sizes = [8, 128], strides = [1, 1]} : vector<64x128xf32> to vector<8x128xf32>
    %134 = arith.truncf %133 : vector<8x128xf32> to vector<8x128xbf16>
    %c0_117 = arith.constant 0 : index
    %c0_118 = arith.constant 0 : index
    %135 = vector.load %arg32[%c0_117, %c0_118] : memref<40x128xbf16, #tpu.memory_space<vmem>>, vector<8x128xbf16>
    tpu.vector_store %arg32[%c0_117, %c0_118], %134 {strides = array<i32>} : memref<40x128xbf16, #tpu.memory_space<vmem>>, vector<8x128xbf16>,
    %136 = vector.extract_strided_slice %128 {offsets = [8, 0], sizes = [8, 128], strides = [1, 1]} : vector<64x128xf32> to vector<8x128xf32>
    %137 = arith.truncf %136 : vector<8x128xf32> to vector<8x128xbf16>
    %c8_119 = arith.constant 8 : index
    %c0_120 = arith.constant 0 : index
    %138 = vector.load %arg31[%c8_119, %c0_120] : memref<40x128xbf16, #tpu.memory_space<vmem>>, vector<8x128xbf16>
    tpu.vector_store %arg31[%c8_119, %c0_120], %137 {strides = array<i32>} : memref<40x128xbf16, #tpu.memory_space<vmem>>, vector<8x128xbf16>,
    %139 = vector.extract_strided_slice %128 {offsets = [16, 0], sizes = [8, 128], strides = [1, 1]} : vector<64x128xf32> to vector<8x128xf32>
    %140 = arith.truncf %139 : vector<8x128xf32> to vector<8x128xbf16>
    %c8_121 = arith.constant 8 : index
    %c0_122 = arith.constant 0 : index
    %141 = vector.load %arg32[%c8_121, %c0_122] : memref<40x128xbf16, #tpu.memory_space<vmem>>, vector<8x128xbf16>
    tpu.vector_store %arg32[%c8_121, %c0_122], %140 {strides = array<i32>} : memref<40x128xbf16, #tpu.memory_space<vmem>>, vector<8x128xbf16>,
    %142 = vector.extract_strided_slice %128 {offsets = [24, 0], sizes = [8, 128], strides = [1, 1]} : vector<64x128xf32> to vector<8x128xf32>
    %143 = arith.truncf %142 : vector<8x128xf32> to vector<8x128xbf16>
    %c16_123 = arith.constant 16 : index
    %c0_124 = arith.constant 0 : index
    %144 = vector.load %arg31[%c16_123, %c0_124] : memref<40x128xbf16, #tpu.memory_space<vmem>>, vector<8x128xbf16>
    tpu.vector_store %arg31[%c16_123, %c0_124], %143 {strides = array<i32>} : memref<40x128xbf16, #tpu.memory_space<vmem>>, vector<8x128xbf16>,
    %145 = vector.extract_strided_slice %128 {offsets = [32, 0], sizes = [8, 128], strides = [1, 1]} : vector<64x128xf32> to vector<8x128xf32>
    %146 = arith.truncf %145 : vector<8x128xf32> to vector<8x128xbf16>
    %c16_125 = arith.constant 16 : index
    %c0_126 = arith.constant 0 : index
    %147 = vector.load %arg32[%c16_125, %c0_126] : memref<40x128xbf16, #tpu.memory_space<vmem>>, vector<8x128xbf16>
    tpu.vector_store %arg32[%c16_125, %c0_126], %146 {strides = array<i32>} : memref<40x128xbf16, #tpu.memory_space<vmem>>, vector<8x128xbf16>,
    %148 = vector.extract_strided_slice %128 {offsets = [40, 0], sizes = [8, 128], strides = [1, 1]} : vector<64x128xf32> to vector<8x128xf32>
    %149 = arith.truncf %148 : vector<8x128xf32> to vector<8x128xbf16>
    %c24_127 = arith.constant 24 : index
    %c0_128 = arith.constant 0 : index
    %150 = vector.load %arg31[%c24_127, %c0_128] : memref<40x128xbf16, #tpu.memory_space<vmem>>, vector<8x128xbf16>
    tpu.vector_store %arg31[%c24_127, %c0_128], %149 {strides = array<i32>} : memref<40x128xbf16, #tpu.memory_space<vmem>>, vector<8x128xbf16>,
    %151 = vector.extract_strided_slice %128 {offsets = [48, 0], sizes = [8, 128], strides = [1, 1]} : vector<64x128xf32> to vector<8x128xf32>
    %152 = arith.truncf %151 : vector<8x128xf32> to vector<8x128xbf16>
    %c24_129 = arith.constant 24 : index
    %c0_130 = arith.constant 0 : index
    %153 = vector.load %arg32[%c24_129, %c0_130] : memref<40x128xbf16, #tpu.memory_space<vmem>>, vector<8x128xbf16>
    tpu.vector_store %arg32[%c24_129, %c0_130], %152 {strides = array<i32>} : memref<40x128xbf16, #tpu.memory_space<vmem>>, vector<8x128xbf16>,
    %154 = vector.extract_strided_slice %128 {offsets = [56, 0], sizes = [8, 128], strides = [1, 1]} : vector<64x128xf32> to vector<8x128xf32>
    %155 = arith.truncf %154 : vector<8x128xf32> to vector<8x128xbf16>
    %c32_131 = arith.constant 32 : index
    %c0_132 = arith.constant 0 : index
    %156 = vector.load %arg31[%c32_131, %c0_132] : memref<40x128xbf16, #tpu.memory_space<vmem>>, vector<8x128xbf16>
    tpu.vector_store %arg31[%c32_131, %c0_132], %155 {strides = array<i32>} : memref<40x128xbf16, #tpu.memory_space<vmem>>, vector<8x128xbf16>,
    %c0_133 = arith.constant 0 : index
    %c0_134 = arith.constant 0 : index
    %157 = vector.load %arg31[%c0_133, %c0_134] : memref<40x128xbf16, #tpu.memory_space<vmem>>, vector<32x128xbf16>
    %c0_135 = arith.constant 0 : index
    %c0_136 = arith.constant 0 : index
    %c0_137 = arith.constant 0 : index
    %158 = vector.load %arg10[%c0_135, %c0_136, %c0_137] : memref<3x128x64xbf16, #tpu.memory_space<vmem>>, vector<1x128x64xbf16>
    %159 = vector.shape_cast %158 : vector<1x128x64xbf16> to vector<128x64xbf16>
    %cst_138 = arith.constant dense<0.000000e+00> : vector<32x64xf32>
    %160 = tpu.matmul %157, %159, %cst_138 {dimension_numbers = #tpu.dot_dimension_numbers<[1], [0], [0], [1], [0, 0, 1, 1], [], []>} : vector<32x128xbf16>, vector<128x64xbf16>, vector<32x64xf32> -> vector<32x64xf32>
    %c0_139 = arith.constant 0 : index
    %c0_140 = arith.constant 0 : index
    %161 = vector.load %arg32[%c0_139, %c0_140] : memref<40x128xbf16, #tpu.memory_space<vmem>>, vector<32x128xbf16>
    %c1_141 = arith.constant 1 : index
    %c0_142 = arith.constant 0 : index
    %c0_143 = arith.constant 0 : index
    %162 = vector.load %arg10[%c1_141, %c0_142, %c0_143] : memref<3x128x64xbf16, #tpu.memory_space<vmem>>, vector<1x128x64xbf16>
    %163 = vector.shape_cast %162 : vector<1x128x64xbf16> to vector<128x64xbf16>
    %cst_144 = arith.constant dense<0.000000e+00> : vector<32x64xf32>
    %164 = tpu.matmul %161, %163, %cst_144 {dimension_numbers = #tpu.dot_dimension_numbers<[1], [0], [0], [1], [0, 0, 1, 1], [], []>} : vector<32x128xbf16>, vector<128x64xbf16>, vector<32x64xf32> -> vector<32x64xf32>
    %165 = arith.addf %160, %164 : vector<32x64xf32>
    %c8_145 = arith.constant 8 : index
    %c0_146 = arith.constant 0 : index
    %166 = vector.load %arg31[%c8_145, %c0_146] : memref<40x128xbf16, #tpu.memory_space<vmem>>, vector<32x128xbf16>
    %c2_147 = arith.constant 2 : index
    %c0_148 = arith.constant 0 : index
    %c0_149 = arith.constant 0 : index
    %167 = vector.load %arg10[%c2_147, %c0_148, %c0_149] : memref<3x128x64xbf16, #tpu.memory_space<vmem>>, vector<1x128x64xbf16>
    %168 = vector.shape_cast %167 : vector<1x128x64xbf16> to vector<128x64xbf16>
    %cst_150 = arith.constant dense<0.000000e+00> : vector<32x64xf32>
    %169 = tpu.matmul %166, %168, %cst_150 {dimension_numbers = #tpu.dot_dimension_numbers<[1], [0], [0], [1], [0, 0, 1, 1], [], []>} : vector<32x128xbf16>, vector<128x64xbf16>, vector<32x64xf32> -> vector<32x64xf32>
    %170 = arith.addf %165, %169 : vector<32x64xf32>
    %c0_151 = arith.constant 0 : index
    %c0_152 = arith.constant 0 : index
    %171 = vector.load %arg11[%c0_151, %c0_152] : memref<1x64xf32, #tpu.memory_space<vmem>>, vector<1x64xf32>
    %172 = vector.broadcast %171 : vector<1x64xf32> to vector<32x64xf32>
    %173 = arith.addf %170, %172 : vector<32x64xf32>
    %cst_153 = arith.constant 0.000000e+00 : f32
    %174 = vector.broadcast %cst_153 : f32 to vector<32x64xf32>
    %175 = arith.maximumf %173, %174 : vector<32x64xf32>
    %176 = vector.extract_strided_slice %175 {offsets = [0, 0], sizes = [8, 64], strides = [1, 1]} : vector<32x64xf32> to vector<8x64xf32>
    %c0_154 = arith.constant 0 : index
    %c0_155 = arith.constant 0 : index
    %c0_156 = arith.constant 0 : index
    %177 = vector.load %arg12[%c0_154, %c0_155, %c0_156] : memref<4x64x32xf32, #tpu.memory_space<vmem>>, vector<1x64x32xf32>
    %178 = vector.shape_cast %177 : vector<1x64x32xf32> to vector<64x32xf32>
    %cst_157 = arith.constant dense<0.000000e+00> : vector<8x32xf32>
    %179 = tpu.matmul %176, %178, %cst_157 {dimension_numbers = #tpu.dot_dimension_numbers<[1], [0], [0], [1], [0, 0, 1, 1], [], []>} : vector<8x64xf32>, vector<64x32xf32>, vector<8x32xf32> -> vector<8x32xf32>
    %180 = vector.extract_strided_slice %175 {offsets = [8, 0], sizes = [8, 64], strides = [1, 1]} : vector<32x64xf32> to vector<8x64xf32>
    %c1_158 = arith.constant 1 : index
    %c0_159 = arith.constant 0 : index
    %c0_160 = arith.constant 0 : index
    %181 = vector.load %arg12[%c1_158, %c0_159, %c0_160] : memref<4x64x32xf32, #tpu.memory_space<vmem>>, vector<1x64x32xf32>
    %182 = vector.shape_cast %181 : vector<1x64x32xf32> to vector<64x32xf32>
    %cst_161 = arith.constant dense<0.000000e+00> : vector<8x32xf32>
    %183 = tpu.matmul %180, %182, %cst_161 {dimension_numbers = #tpu.dot_dimension_numbers<[1], [0], [0], [1], [0, 0, 1, 1], [], []>} : vector<8x64xf32>, vector<64x32xf32>, vector<8x32xf32> -> vector<8x32xf32>
    %184 = arith.addf %179, %183 : vector<8x32xf32>
    %185 = vector.extract_strided_slice %175 {offsets = [16, 0], sizes = [8, 64], strides = [1, 1]} : vector<32x64xf32> to vector<8x64xf32>
    %c2_162 = arith.constant 2 : index
    %c0_163 = arith.constant 0 : index
    %c0_164 = arith.constant 0 : index
    %186 = vector.load %arg12[%c2_162, %c0_163, %c0_164] : memref<4x64x32xf32, #tpu.memory_space<vmem>>, vector<1x64x32xf32>
    %187 = vector.shape_cast %186 : vector<1x64x32xf32> to vector<64x32xf32>
    %cst_165 = arith.constant dense<0.000000e+00> : vector<8x32xf32>
    %188 = tpu.matmul %185, %187, %cst_165 {dimension_numbers = #tpu.dot_dimension_numbers<[1], [0], [0], [1], [0, 0, 1, 1], [], []>} : vector<8x64xf32>, vector<64x32xf32>, vector<8x32xf32> -> vector<8x32xf32>
    %189 = arith.addf %184, %188 : vector<8x32xf32>
    %190 = vector.extract_strided_slice %175 {offsets = [24, 0], sizes = [8, 64], strides = [1, 1]} : vector<32x64xf32> to vector<8x64xf32>
    %c3 = arith.constant 3 : index
    %c0_166 = arith.constant 0 : index
    %c0_167 = arith.constant 0 : index
    %191 = vector.load %arg12[%c3, %c0_166, %c0_167] : memref<4x64x32xf32, #tpu.memory_space<vmem>>, vector<1x64x32xf32>
    %192 = vector.shape_cast %191 : vector<1x64x32xf32> to vector<64x32xf32>
    %cst_168 = arith.constant dense<0.000000e+00> : vector<8x32xf32>
    %193 = tpu.matmul %190, %192, %cst_168 {dimension_numbers = #tpu.dot_dimension_numbers<[1], [0], [0], [1], [0, 0, 1, 1], [], []>} : vector<8x64xf32>, vector<64x32xf32>, vector<8x32xf32> -> vector<8x32xf32>
    %194 = arith.addf %189, %193 : vector<8x32xf32>
    %c0_169 = arith.constant 0 : index
    %c0_170 = arith.constant 0 : index
    %195 = vector.load %arg13[%c0_169, %c0_170] : memref<1x32xf32, #tpu.memory_space<vmem>>, vector<1x32xf32>
    %196 = vector.broadcast %195 : vector<1x32xf32> to vector<8x32xf32>
    %197 = arith.addf %194, %196 : vector<8x32xf32>
    %cst_171 = arith.constant 0.000000e+00 : bf16
    %198 = vector.broadcast %cst_171 : bf16 to vector<8x64xbf16>
    %c32_172 = arith.constant 32 : index
    %c0_173 = arith.constant 0 : index
    %199 = vector.load %arg33[%c32_172, %c0_173] : memref<40x64xbf16, #tpu.memory_space<vmem>>, vector<8x64xbf16>
    tpu.vector_store %arg33[%c32_172, %c0_173], %198 {strides = array<i32>} : memref<40x64xbf16, #tpu.memory_space<vmem>>, vector<8x64xbf16>,
    %c0_174 = arith.constant 0 : index
    %c0_175 = arith.constant 0 : index
    %c0_176 = arith.constant 0 : index
    %200 = vector.load %arg14[%c0_174, %c0_175, %c0_176] : memref<4x32x64xf32, #tpu.memory_space<vmem>>, vector<1x32x64xf32>
    %201 = vector.shape_cast %200 : vector<1x32x64xf32> to vector<32x64xf32>
    %cst_177 = arith.constant dense<0.000000e+00> : vector<8x64xf32>
    %202 = tpu.matmul %197, %201, %cst_177 {dimension_numbers = #tpu.dot_dimension_numbers<[1], [0], [0], [1], [0, 0, 1, 1], [], []>} : vector<8x32xf32>, vector<32x64xf32>, vector<8x64xf32> -> vector<8x64xf32>
    %c0_178 = arith.constant 0 : index
    %c0_179 = arith.constant 0 : index
    %c0_180 = arith.constant 0 : index
    %203 = vector.load %arg15[%c0_178, %c0_179, %c0_180] : memref<4x1x64xf32, #tpu.memory_space<vmem>>, vector<1x1x64xf32>
    %204 = vector.shape_cast %203 : vector<1x1x64xf32> to vector<1x64xf32>
    %205 = vector.broadcast %204 : vector<1x64xf32> to vector<8x64xf32>
    %206 = arith.addf %202, %205 : vector<8x64xf32>
    %cst_181 = arith.constant 0.000000e+00 : f32
    %207 = vector.broadcast %cst_181 : f32 to vector<8x64xf32>
    %208 = arith.maximumf %206, %207 : vector<8x64xf32>
    %209 = arith.truncf %208 : vector<8x64xf32> to vector<8x64xbf16>
    %c0_182 = arith.constant 0 : index
    %c0_183 = arith.constant 0 : index
    %210 = vector.load %arg33[%c0_182, %c0_183] : memref<40x64xbf16, #tpu.memory_space<vmem>>, vector<8x64xbf16>
    tpu.vector_store %arg33[%c0_182, %c0_183], %209 {strides = array<i32>} : memref<40x64xbf16, #tpu.memory_space<vmem>>, vector<8x64xbf16>,
    %c1_184 = arith.constant 1 : index
    %c0_185 = arith.constant 0 : index
    %c0_186 = arith.constant 0 : index
    %211 = vector.load %arg14[%c1_184, %c0_185, %c0_186] : memref<4x32x64xf32, #tpu.memory_space<vmem>>, vector<1x32x64xf32>
    %212 = vector.shape_cast %211 : vector<1x32x64xf32> to vector<32x64xf32>
    %cst_187 = arith.constant dense<0.000000e+00> : vector<8x64xf32>
    %213 = tpu.matmul %197, %212, %cst_187 {dimension_numbers = #tpu.dot_dimension_numbers<[1], [0], [0], [1], [0, 0, 1, 1], [], []>} : vector<8x32xf32>, vector<32x64xf32>, vector<8x64xf32> -> vector<8x64xf32>
    %c1_188 = arith.constant 1 : index
    %c0_189 = arith.constant 0 : index
    %c0_190 = arith.constant 0 : index
    %214 = vector.load %arg15[%c1_188, %c0_189, %c0_190] : memref<4x1x64xf32, #tpu.memory_space<vmem>>, vector<1x1x64xf32>
    %215 = vector.shape_cast %214 : vector<1x1x64xf32> to vector<1x64xf32>
    %216 = vector.broadcast %215 : vector<1x64xf32> to vector<8x64xf32>
    %217 = arith.addf %213, %216 : vector<8x64xf32>
    %cst_191 = arith.constant 0.000000e+00 : f32
    %218 = vector.broadcast %cst_191 : f32 to vector<8x64xf32>
    %219 = arith.maximumf %217, %218 : vector<8x64xf32>
    %220 = arith.truncf %219 : vector<8x64xf32> to vector<8x64xbf16>
    %c8_192 = arith.constant 8 : index
    %c0_193 = arith.constant 0 : index
    %221 = vector.load %arg33[%c8_192, %c0_193] : memref<40x64xbf16, #tpu.memory_space<vmem>>, vector<8x64xbf16>
    tpu.vector_store %arg33[%c8_192, %c0_193], %220 {strides = array<i32>} : memref<40x64xbf16, #tpu.memory_space<vmem>>, vector<8x64xbf16>,
    %c2_194 = arith.constant 2 : index
    %c0_195 = arith.constant 0 : index
    %c0_196 = arith.constant 0 : index
    %222 = vector.load %arg14[%c2_194, %c0_195, %c0_196] : memref<4x32x64xf32, #tpu.memory_space<vmem>>, vector<1x32x64xf32>
    %223 = vector.shape_cast %222 : vector<1x32x64xf32> to vector<32x64xf32>
    %cst_197 = arith.constant dense<0.000000e+00> : vector<8x64xf32>
    %224 = tpu.matmul %197, %223, %cst_197 {dimension_numbers = #tpu.dot_dimension_numbers<[1], [0], [0], [1], [0, 0, 1, 1], [], []>} : vector<8x32xf32>, vector<32x64xf32>, vector<8x64xf32> -> vector<8x64xf32>
    %c2_198 = arith.constant 2 : index
    %c0_199 = arith.constant 0 : index
    %c0_200 = arith.constant 0 : index
    %225 = vector.load %arg15[%c2_198, %c0_199, %c0_200] : memref<4x1x64xf32, #tpu.memory_space<vmem>>, vector<1x1x64xf32>
    %226 = vector.shape_cast %225 : vector<1x1x64xf32> to vector<1x64xf32>
    %227 = vector.broadcast %226 : vector<1x64xf32> to vector<8x64xf32>
    %228 = arith.addf %224, %227 : vector<8x64xf32>
    %cst_201 = arith.constant 0.000000e+00 : f32
    %229 = vector.broadcast %cst_201 : f32 to vector<8x64xf32>
    %230 = arith.maximumf %228, %229 : vector<8x64xf32>
    %231 = arith.truncf %230 : vector<8x64xf32> to vector<8x64xbf16>
    %c16_202 = arith.constant 16 : index
    %c0_203 = arith.constant 0 : index
    %232 = vector.load %arg33[%c16_202, %c0_203] : memref<40x64xbf16, #tpu.memory_space<vmem>>, vector<8x64xbf16>
    tpu.vector_store %arg33[%c16_202, %c0_203], %231 {strides = array<i32>} : memref<40x64xbf16, #tpu.memory_space<vmem>>, vector<8x64xbf16>,
    %c3_204 = arith.constant 3 : index
    %c0_205 = arith.constant 0 : index
    %c0_206 = arith.constant 0 : index
    %233 = vector.load %arg14[%c3_204, %c0_205, %c0_206] : memref<4x32x64xf32, #tpu.memory_space<vmem>>, vector<1x32x64xf32>
    %234 = vector.shape_cast %233 : vector<1x32x64xf32> to vector<32x64xf32>
    %cst_207 = arith.constant dense<0.000000e+00> : vector<8x64xf32>
    %235 = tpu.matmul %197, %234, %cst_207 {dimension_numbers = #tpu.dot_dimension_numbers<[1], [0], [0], [1], [0, 0, 1, 1], [], []>} : vector<8x32xf32>, vector<32x64xf32>, vector<8x64xf32> -> vector<8x64xf32>
    %c3_208 = arith.constant 3 : index
    %c0_209 = arith.constant 0 : index
    %c0_210 = arith.constant 0 : index
    %236 = vector.load %arg15[%c3_208, %c0_209, %c0_210] : memref<4x1x64xf32, #tpu.memory_space<vmem>>, vector<1x1x64xf32>
    %237 = vector.shape_cast %236 : vector<1x1x64xf32> to vector<1x64xf32>
    %238 = vector.broadcast %237 : vector<1x64xf32> to vector<8x64xf32>
    %239 = arith.addf %235, %238 : vector<8x64xf32>
    %cst_211 = arith.constant 0.000000e+00 : f32
    %240 = vector.broadcast %cst_211 : f32 to vector<8x64xf32>
    %241 = arith.maximumf %239, %240 : vector<8x64xf32>
    %242 = arith.truncf %241 : vector<8x64xf32> to vector<8x64xbf16>
    %c24_212 = arith.constant 24 : index
    %c0_213 = arith.constant 0 : index
    %243 = vector.load %arg33[%c24_212, %c0_213] : memref<40x64xbf16, #tpu.memory_space<vmem>>, vector<8x64xbf16>
    tpu.vector_store %arg33[%c24_212, %c0_213], %242 {strides = array<i32>} : memref<40x64xbf16, #tpu.memory_space<vmem>>, vector<8x64xbf16>,
    %c0_214 = arith.constant 0 : index
    %c0_215 = arith.constant 0 : index
    %244 = vector.load %arg33[%c0_214, %c0_215] : memref<40x64xbf16, #tpu.memory_space<vmem>>, vector<32x64xbf16>
    %c0_216 = arith.constant 0 : index
    %c0_217 = arith.constant 0 : index
    %c0_218 = arith.constant 0 : index
    %245 = vector.load %arg16[%c0_216, %c0_217, %c0_218] : memref<2x64x256xbf16, #tpu.memory_space<vmem>>, vector<1x64x256xbf16>
    %246 = vector.shape_cast %245 : vector<1x64x256xbf16> to vector<64x256xbf16>
    %cst_219 = arith.constant dense<0.000000e+00> : vector<32x256xf32>
    %247 = tpu.matmul %244, %246, %cst_219 {dimension_numbers = #tpu.dot_dimension_numbers<[1], [0], [0], [1], [0, 0, 1, 1], [], []>} : vector<32x64xbf16>, vector<64x256xbf16>, vector<32x256xf32> -> vector<32x256xf32>
    %c8_220 = arith.constant 8 : index
    %c0_221 = arith.constant 0 : index
    %248 = vector.load %arg33[%c8_220, %c0_221] : memref<40x64xbf16, #tpu.memory_space<vmem>>, vector<32x64xbf16>
    %c1_222 = arith.constant 1 : index
    %c0_223 = arith.constant 0 : index
    %c0_224 = arith.constant 0 : index
    %249 = vector.load %arg16[%c1_222, %c0_223, %c0_224] : memref<2x64x256xbf16, #tpu.memory_space<vmem>>, vector<1x64x256xbf16>
    %250 = vector.shape_cast %249 : vector<1x64x256xbf16> to vector<64x256xbf16>
    %cst_225 = arith.constant dense<0.000000e+00> : vector<32x256xf32>
    %251 = tpu.matmul %248, %250, %cst_225 {dimension_numbers = #tpu.dot_dimension_numbers<[1], [0], [0], [1], [0, 0, 1, 1], [], []>} : vector<32x64xbf16>, vector<64x256xbf16>, vector<32x256xf32> -> vector<32x256xf32>
    %252 = arith.addf %247, %251 : vector<32x256xf32>
    %c0_226 = arith.constant 0 : index
    %c0_227 = arith.constant 0 : index
    %253 = vector.load %arg17[%c0_226, %c0_227] : memref<1x256xf32, #tpu.memory_space<vmem>>, vector<1x256xf32>
    %254 = vector.broadcast %253 : vector<1x256xf32> to vector<32x256xf32>
    %255 = arith.addf %252, %254 : vector<32x256xf32>
    %cst_228 = arith.constant 0.000000e+00 : f32
    %256 = vector.broadcast %cst_228 : f32 to vector<32x256xf32>
    %257 = arith.maximumf %255, %256 : vector<32x256xf32>
    %cst_229 = arith.constant 0.000000e+00 : bf16
    %258 = vector.broadcast %cst_229 : bf16 to vector<8x128xbf16>
    %c0_230 = arith.constant 0 : index
    %c0_231 = arith.constant 0 : index
    %259 = vector.load %arg34[%c0_230, %c0_231] : memref<80x128xbf16, #tpu.memory_space<vmem>>, vector<8x128xbf16>
    tpu.vector_store %arg34[%c0_230, %c0_231], %258 {strides = array<i32>} : memref<80x128xbf16, #tpu.memory_space<vmem>>, vector<8x128xbf16>,
    %cst_232 = arith.constant 0.000000e+00 : bf16
    %260 = vector.broadcast %cst_232 : bf16 to vector<8x128xbf16>
    %c72_233 = arith.constant 72 : index
    %c0_234 = arith.constant 0 : index
    %261 = vector.load %arg34[%c72_233, %c0_234] : memref<80x128xbf16, #tpu.memory_space<vmem>>, vector<8x128xbf16>
    tpu.vector_store %arg34[%c72_233, %c0_234], %260 {strides = array<i32>} : memref<80x128xbf16, #tpu.memory_space<vmem>>, vector<8x128xbf16>,
    %262 = vector.extract_strided_slice %257 {offsets = [0, 0], sizes = [8, 128], strides = [1, 1]} : vector<32x256xf32> to vector<8x128xf32>
    %263 = arith.truncf %262 : vector<8x128xf32> to vector<8x128xbf16>
    %c8_235 = arith.constant 8 : index
    %c0_236 = arith.constant 0 : index
    %264 = vector.load %arg34[%c8_235, %c0_236] : memref<80x128xbf16, #tpu.memory_space<vmem>>, vector<8x128xbf16>
    tpu.vector_store %arg34[%c8_235, %c0_236], %263 {strides = array<i32>} : memref<80x128xbf16, #tpu.memory_space<vmem>>, vector<8x128xbf16>,
    %265 = vector.extract_strided_slice %257 {offsets = [0, 128], sizes = [8, 128], strides = [1, 1]} : vector<32x256xf32> to vector<8x128xf32>
    %266 = arith.truncf %265 : vector<8x128xf32> to vector<8x128xbf16>
    %c16_237 = arith.constant 16 : index
    %c0_238 = arith.constant 0 : index
    %267 = vector.load %arg34[%c16_237, %c0_238] : memref<80x128xbf16, #tpu.memory_space<vmem>>, vector<8x128xbf16>
    tpu.vector_store %arg34[%c16_237, %c0_238], %266 {strides = array<i32>} : memref<80x128xbf16, #tpu.memory_space<vmem>>, vector<8x128xbf16>,
    %268 = vector.extract_strided_slice %257 {offsets = [8, 0], sizes = [8, 128], strides = [1, 1]} : vector<32x256xf32> to vector<8x128xf32>
    %269 = arith.truncf %268 : vector<8x128xf32> to vector<8x128xbf16>
    %c24_239 = arith.constant 24 : index
    %c0_240 = arith.constant 0 : index
    %270 = vector.load %arg34[%c24_239, %c0_240] : memref<80x128xbf16, #tpu.memory_space<vmem>>, vector<8x128xbf16>
    tpu.vector_store %arg34[%c24_239, %c0_240], %269 {strides = array<i32>} : memref<80x128xbf16, #tpu.memory_space<vmem>>, vector<8x128xbf16>,
    %271 = vector.extract_strided_slice %257 {offsets = [8, 128], sizes = [8, 128], strides = [1, 1]} : vector<32x256xf32> to vector<8x128xf32>
    %272 = arith.truncf %271 : vector<8x128xf32> to vector<8x128xbf16>
    %c32_241 = arith.constant 32 : index
    %c0_242 = arith.constant 0 : index
    %273 = vector.load %arg34[%c32_241, %c0_242] : memref<80x128xbf16, #tpu.memory_space<vmem>>, vector<8x128xbf16>
    tpu.vector_store %arg34[%c32_241, %c0_242], %272 {strides = array<i32>} : memref<80x128xbf16, #tpu.memory_space<vmem>>, vector<8x128xbf16>,
    %274 = vector.extract_strided_slice %257 {offsets = [16, 0], sizes = [8, 128], strides = [1, 1]} : vector<32x256xf32> to vector<8x128xf32>
    %275 = arith.truncf %274 : vector<8x128xf32> to vector<8x128xbf16>
    %c40_243 = arith.constant 40 : index
    %c0_244 = arith.constant 0 : index
    %276 = vector.load %arg34[%c40_243, %c0_244] : memref<80x128xbf16, #tpu.memory_space<vmem>>, vector<8x128xbf16>
    tpu.vector_store %arg34[%c40_243, %c0_244], %275 {strides = array<i32>} : memref<80x128xbf16, #tpu.memory_space<vmem>>, vector<8x128xbf16>,
    %277 = vector.extract_strided_slice %257 {offsets = [16, 128], sizes = [8, 128], strides = [1, 1]} : vector<32x256xf32> to vector<8x128xf32>
    %278 = arith.truncf %277 : vector<8x128xf32> to vector<8x128xbf16>
    %c48_245 = arith.constant 48 : index
    %c0_246 = arith.constant 0 : index
    %279 = vector.load %arg34[%c48_245, %c0_246] : memref<80x128xbf16, #tpu.memory_space<vmem>>, vector<8x128xbf16>
    tpu.vector_store %arg34[%c48_245, %c0_246], %278 {strides = array<i32>} : memref<80x128xbf16, #tpu.memory_space<vmem>>, vector<8x128xbf16>,
    %280 = vector.extract_strided_slice %257 {offsets = [24, 0], sizes = [8, 128], strides = [1, 1]} : vector<32x256xf32> to vector<8x128xf32>
    %281 = arith.truncf %280 : vector<8x128xf32> to vector<8x128xbf16>
    %c56_247 = arith.constant 56 : index
    %c0_248 = arith.constant 0 : index
    %282 = vector.load %arg34[%c56_247, %c0_248] : memref<80x128xbf16, #tpu.memory_space<vmem>>, vector<8x128xbf16>
    tpu.vector_store %arg34[%c56_247, %c0_248], %281 {strides = array<i32>} : memref<80x128xbf16, #tpu.memory_space<vmem>>, vector<8x128xbf16>,
    %283 = vector.extract_strided_slice %257 {offsets = [24, 128], sizes = [8, 128], strides = [1, 1]} : vector<32x256xf32> to vector<8x128xf32>
    %284 = arith.truncf %283 : vector<8x128xf32> to vector<8x128xbf16>
    %c64_249 = arith.constant 64 : index
    %c0_250 = arith.constant 0 : index
    %285 = vector.load %arg34[%c64_249, %c0_250] : memref<80x128xbf16, #tpu.memory_space<vmem>>, vector<8x128xbf16>
    tpu.vector_store %arg34[%c64_249, %c0_250], %284 {strides = array<i32>} : memref<80x128xbf16, #tpu.memory_space<vmem>>, vector<8x128xbf16>,
    %c0_251 = arith.constant 0 : index
    %c0_252 = arith.constant 0 : index
    %286 = vector.load %arg34[%c0_251, %c0_252] : memref<80x128xbf16, #tpu.memory_space<vmem>>, vector<64x128xbf16>
    %c0_253 = arith.constant 0 : index
    %c0_254 = arith.constant 0 : index
    %c0_255 = arith.constant 0 : index
    %287 = vector.load %arg18[%c0_253, %c0_254, %c0_255] : memref<3x128x128xbf16, #tpu.memory_space<vmem>>, vector<1x128x128xbf16>
    %288 = vector.shape_cast %287 : vector<1x128x128xbf16> to vector<128x128xbf16>
    %cst_256 = arith.constant dense<0.000000e+00> : vector<64x128xf32>
    %289 = tpu.matmul %286, %288, %cst_256 {dimension_numbers = #tpu.dot_dimension_numbers<[1], [0], [0], [1], [0, 0, 1, 1], [], []>} : vector<64x128xbf16>, vector<128x128xbf16>, vector<64x128xf32> -> vector<64x128xf32>
    %c8_257 = arith.constant 8 : index
    %c0_258 = arith.constant 0 : index
    %290 = vector.load %arg34[%c8_257, %c0_258] : memref<80x128xbf16, #tpu.memory_space<vmem>>, vector<64x128xbf16>
    %c1_259 = arith.constant 1 : index
    %c0_260 = arith.constant 0 : index
    %c0_261 = arith.constant 0 : index
    %291 = vector.load %arg18[%c1_259, %c0_260, %c0_261] : memref<3x128x128xbf16, #tpu.memory_space<vmem>>, vector<1x128x128xbf16>
    %292 = vector.shape_cast %291 : vector<1x128x128xbf16> to vector<128x128xbf16>
    %cst_262 = arith.constant dense<0.000000e+00> : vector<64x128xf32>
    %293 = tpu.matmul %290, %292, %cst_262 {dimension_numbers = #tpu.dot_dimension_numbers<[1], [0], [0], [1], [0, 0, 1, 1], [], []>} : vector<64x128xbf16>, vector<128x128xbf16>, vector<64x128xf32> -> vector<64x128xf32>
    %294 = arith.addf %289, %293 : vector<64x128xf32>
    %c16_263 = arith.constant 16 : index
    %c0_264 = arith.constant 0 : index
    %295 = vector.load %arg34[%c16_263, %c0_264] : memref<80x128xbf16, #tpu.memory_space<vmem>>, vector<64x128xbf16>
    %c2_265 = arith.constant 2 : index
    %c0_266 = arith.constant 0 : index
    %c0_267 = arith.constant 0 : index
    %296 = vector.load %arg18[%c2_265, %c0_266, %c0_267] : memref<3x128x128xbf16, #tpu.memory_space<vmem>>, vector<1x128x128xbf16>
    %297 = vector.shape_cast %296 : vector<1x128x128xbf16> to vector<128x128xbf16>
    %cst_268 = arith.constant dense<0.000000e+00> : vector<64x128xf32>
    %298 = tpu.matmul %295, %297, %cst_268 {dimension_numbers = #tpu.dot_dimension_numbers<[1], [0], [0], [1], [0, 0, 1, 1], [], []>} : vector<64x128xbf16>, vector<128x128xbf16>, vector<64x128xf32> -> vector<64x128xf32>
    %299 = arith.addf %294, %298 : vector<64x128xf32>
    %c0_269 = arith.constant 0 : index
    %c0_270 = arith.constant 0 : index
    %300 = vector.load %arg19[%c0_269, %c0_270] : memref<1x128xf32, #tpu.memory_space<vmem>>, vector<1x128xf32>
    %301 = vector.broadcast %300 : vector<1x128xf32> to vector<64x128xf32>
    %302 = arith.addf %299, %301 : vector<64x128xf32>
    %cst_271 = arith.constant 0.000000e+00 : f32
    %303 = vector.broadcast %cst_271 : f32 to vector<64x128xf32>
    %304 = arith.maximumf %302, %303 : vector<64x128xf32>
    %cst_272 = arith.constant 0.000000e+00 : bf16
    %305 = vector.broadcast %cst_272 : bf16 to vector<8x128xbf16>
    %c64_273 = arith.constant 64 : index
    %c0_274 = arith.constant 0 : index
    %306 = vector.load %arg35[%c64_273, %c0_274] : memref<72x128xbf16, #tpu.memory_space<vmem>>, vector<8x128xbf16>
    tpu.vector_store %arg35[%c64_273, %c0_274], %305 {strides = array<i32>} : memref<72x128xbf16, #tpu.memory_space<vmem>>, vector<8x128xbf16>,
    %307 = arith.truncf %304 : vector<64x128xf32> to vector<64x128xbf16>
    %c0_275 = arith.constant 0 : index
    %c0_276 = arith.constant 0 : index
    %308 = vector.load %arg35[%c0_275, %c0_276] : memref<72x128xbf16, #tpu.memory_space<vmem>>, vector<64x128xbf16>
    tpu.vector_store %arg35[%c0_275, %c0_276], %307 {strides = array<i32>} : memref<72x128xbf16, #tpu.memory_space<vmem>>, vector<64x128xbf16>,
    %c0_277 = arith.constant 0 : index
    %c0_278 = arith.constant 0 : index
    %309 = vector.load %arg35[%c0_277, %c0_278] : memref<72x128xbf16, #tpu.memory_space<vmem>>, vector<64x128xbf16>
    %c0_279 = arith.constant 0 : index
    %c0_280 = arith.constant 0 : index
    %c0_281 = arith.constant 0 : index
    %310 = vector.load %arg20[%c0_279, %c0_280, %c0_281] : memref<2x128x256xbf16, #tpu.memory_space<vmem>>, vector<1x128x256xbf16>
    %311 = vector.shape_cast %310 : vector<1x128x256xbf16> to vector<128x256xbf16>
    %cst_282 = arith.constant dense<0.000000e+00> : vector<64x256xf32>
    %312 = tpu.matmul %309, %311, %cst_282 {dimension_numbers = #tpu.dot_dimension_numbers<[1], [0], [0], [1], [0, 0, 1, 1], [], []>} : vector<64x128xbf16>, vector<128x256xbf16>, vector<64x256xf32> -> vector<64x256xf32>
    %c8_283 = arith.constant 8 : index
    %c0_284 = arith.constant 0 : index
    %313 = vector.load %arg35[%c8_283, %c0_284] : memref<72x128xbf16, #tpu.memory_space<vmem>>, vector<64x128xbf16>
    %c1_285 = arith.constant 1 : index
    %c0_286 = arith.constant 0 : index
    %c0_287 = arith.constant 0 : index
    %314 = vector.load %arg20[%c1_285, %c0_286, %c0_287] : memref<2x128x256xbf16, #tpu.memory_space<vmem>>, vector<1x128x256xbf16>
    %315 = vector.shape_cast %314 : vector<1x128x256xbf16> to vector<128x256xbf16>
    %cst_288 = arith.constant dense<0.000000e+00> : vector<64x256xf32>
    %316 = tpu.matmul %313, %315, %cst_288 {dimension_numbers = #tpu.dot_dimension_numbers<[1], [0], [0], [1], [0, 0, 1, 1], [], []>} : vector<64x128xbf16>, vector<128x256xbf16>, vector<64x256xf32> -> vector<64x256xf32>
    %317 = arith.addf %312, %316 : vector<64x256xf32>
    %c0_289 = arith.constant 0 : index
    %c0_290 = arith.constant 0 : index
    %318 = vector.load %arg21[%c0_289, %c0_290] : memref<1x256xf32, #tpu.memory_space<vmem>>, vector<1x256xf32>
    %319 = vector.broadcast %318 : vector<1x256xf32> to vector<64x256xf32>
    %320 = arith.addf %317, %319 : vector<64x256xf32>
    %cst_291 = arith.constant 0.000000e+00 : f32
    %321 = vector.broadcast %cst_291 : f32 to vector<64x256xf32>
    %322 = arith.maximumf %320, %321 : vector<64x256xf32>
    %cst_292 = arith.constant 0.000000e+00 : bf16
    %323 = vector.broadcast %cst_292 : bf16 to vector<8x128xbf16>
    %c0_293 = arith.constant 0 : index
    %c0_294 = arith.constant 0 : index
    %324 = vector.load %arg36[%c0_293, %c0_294] : memref<144x128xbf16, #tpu.memory_space<vmem>>, vector<8x128xbf16>
    tpu.vector_store %arg36[%c0_293, %c0_294], %323 {strides = array<i32>} : memref<144x128xbf16, #tpu.memory_space<vmem>>, vector<8x128xbf16>,
    %cst_295 = arith.constant 0.000000e+00 : bf16
    %325 = vector.broadcast %cst_295 : bf16 to vector<8x128xbf16>
    %c136_296 = arith.constant 136 : index
    %c0_297 = arith.constant 0 : index
    %326 = vector.load %arg36[%c136_296, %c0_297] : memref<144x128xbf16, #tpu.memory_space<vmem>>, vector<8x128xbf16>
    tpu.vector_store %arg36[%c136_296, %c0_297], %325 {strides = array<i32>} : memref<144x128xbf16, #tpu.memory_space<vmem>>, vector<8x128xbf16>,
    %327 = vector.extract_strided_slice %322 {offsets = [0, 0], sizes = [8, 128], strides = [1, 1]} : vector<64x256xf32> to vector<8x128xf32>
    %328 = arith.truncf %327 : vector<8x128xf32> to vector<8x128xbf16>
    %c8_298 = arith.constant 8 : index
    %c0_299 = arith.constant 0 : index
    %329 = vector.load %arg36[%c8_298, %c0_299] : memref<144x128xbf16, #tpu.memory_space<vmem>>, vector<8x128xbf16>
    tpu.vector_store %arg36[%c8_298, %c0_299], %328 {strides = array<i32>} : memref<144x128xbf16, #tpu.memory_space<vmem>>, vector<8x128xbf16>,
    %330 = vector.extract_strided_slice %322 {offsets = [0, 128], sizes = [8, 128], strides = [1, 1]} : vector<64x256xf32> to vector<8x128xf32>
    %331 = arith.truncf %330 : vector<8x128xf32> to vector<8x128xbf16>
    %c16_300 = arith.constant 16 : index
    %c0_301 = arith.constant 0 : index
    %332 = vector.load %arg36[%c16_300, %c0_301] : memref<144x128xbf16, #tpu.memory_space<vmem>>, vector<8x128xbf16>
    tpu.vector_store %arg36[%c16_300, %c0_301], %331 {strides = array<i32>} : memref<144x128xbf16, #tpu.memory_space<vmem>>, vector<8x128xbf16>,
    %333 = vector.extract_strided_slice %322 {offsets = [8, 0], sizes = [8, 128], strides = [1, 1]} : vector<64x256xf32> to vector<8x128xf32>
    %334 = arith.truncf %333 : vector<8x128xf32> to vector<8x128xbf16>
    %c24_302 = arith.constant 24 : index
    %c0_303 = arith.constant 0 : index
    %335 = vector.load %arg36[%c24_302, %c0_303] : memref<144x128xbf16, #tpu.memory_space<vmem>>, vector<8x128xbf16>
    tpu.vector_store %arg36[%c24_302, %c0_303], %334 {strides = array<i32>} : memref<144x128xbf16, #tpu.memory_space<vmem>>, vector<8x128xbf16>,
    %336 = vector.extract_strided_slice %322 {offsets = [8, 128], sizes = [8, 128], strides = [1, 1]} : vector<64x256xf32> to vector<8x128xf32>
    %337 = arith.truncf %336 : vector<8x128xf32> to vector<8x128xbf16>
    %c32_304 = arith.constant 32 : index
    %c0_305 = arith.constant 0 : index
    %338 = vector.load %arg36[%c32_304, %c0_305] : memref<144x128xbf16, #tpu.memory_space<vmem>>, vector<8x128xbf16>
    tpu.vector_store %arg36[%c32_304, %c0_305], %337 {strides = array<i32>} : memref<144x128xbf16, #tpu.memory_space<vmem>>, vector<8x128xbf16>,
    %339 = vector.extract_strided_slice %322 {offsets = [16, 0], sizes = [8, 128], strides = [1, 1]} : vector<64x256xf32> to vector<8x128xf32>
    %340 = arith.truncf %339 : vector<8x128xf32> to vector<8x128xbf16>
    %c40_306 = arith.constant 40 : index
    %c0_307 = arith.constant 0 : index
    %341 = vector.load %arg36[%c40_306, %c0_307] : memref<144x128xbf16, #tpu.memory_space<vmem>>, vector<8x128xbf16>
    tpu.vector_store %arg36[%c40_306, %c0_307], %340 {strides = array<i32>} : memref<144x128xbf16, #tpu.memory_space<vmem>>, vector<8x128xbf16>,
    %342 = vector.extract_strided_slice %322 {offsets = [16, 128], sizes = [8, 128], strides = [1, 1]} : vector<64x256xf32> to vector<8x128xf32>
    %343 = arith.truncf %342 : vector<8x128xf32> to vector<8x128xbf16>
    %c48_308 = arith.constant 48 : index
    %c0_309 = arith.constant 0 : index
    %344 = vector.load %arg36[%c48_308, %c0_309] : memref<144x128xbf16, #tpu.memory_space<vmem>>, vector<8x128xbf16>
    tpu.vector_store %arg36[%c48_308, %c0_309], %343 {strides = array<i32>} : memref<144x128xbf16, #tpu.memory_space<vmem>>, vector<8x128xbf16>,
    %345 = vector.extract_strided_slice %322 {offsets = [24, 0], sizes = [8, 128], strides = [1, 1]} : vector<64x256xf32> to vector<8x128xf32>
    %346 = arith.truncf %345 : vector<8x128xf32> to vector<8x128xbf16>
    %c56_310 = arith.constant 56 : index
    %c0_311 = arith.constant 0 : index
    %347 = vector.load %arg36[%c56_310, %c0_311] : memref<144x128xbf16, #tpu.memory_space<vmem>>, vector<8x128xbf16>
    tpu.vector_store %arg36[%c56_310, %c0_311], %346 {strides = array<i32>} : memref<144x128xbf16, #tpu.memory_space<vmem>>, vector<8x128xbf16>,
    %348 = vector.extract_strided_slice %322 {offsets = [24, 128], sizes = [8, 128], strides = [1, 1]} : vector<64x256xf32> to vector<8x128xf32>
    %349 = arith.truncf %348 : vector<8x128xf32> to vector<8x128xbf16>
    %c64_312 = arith.constant 64 : index
    %c0_313 = arith.constant 0 : index
    %350 = vector.load %arg36[%c64_312, %c0_313] : memref<144x128xbf16, #tpu.memory_space<vmem>>, vector<8x128xbf16>
    tpu.vector_store %arg36[%c64_312, %c0_313], %349 {strides = array<i32>} : memref<144x128xbf16, #tpu.memory_space<vmem>>, vector<8x128xbf16>,
    %351 = vector.extract_strided_slice %322 {offsets = [32, 0], sizes = [8, 128], strides = [1, 1]} : vector<64x256xf32> to vector<8x128xf32>
    %352 = arith.truncf %351 : vector<8x128xf32> to vector<8x128xbf16>
    %c72_314 = arith.constant 72 : index
    %c0_315 = arith.constant 0 : index
    %353 = vector.load %arg36[%c72_314, %c0_315] : memref<144x128xbf16, #tpu.memory_space<vmem>>, vector<8x128xbf16>
    tpu.vector_store %arg36[%c72_314, %c0_315], %352 {strides = array<i32>} : memref<144x128xbf16, #tpu.memory_space<vmem>>, vector<8x128xbf16>,
    %354 = vector.extract_strided_slice %322 {offsets = [32, 128], sizes = [8, 128], strides = [1, 1]} : vector<64x256xf32> to vector<8x128xf32>
    %355 = arith.truncf %354 : vector<8x128xf32> to vector<8x128xbf16>
    %c80 = arith.constant 80 : index
    %c0_316 = arith.constant 0 : index
    %356 = vector.load %arg36[%c80, %c0_316] : memref<144x128xbf16, #tpu.memory_space<vmem>>, vector<8x128xbf16>
    tpu.vector_store %arg36[%c80, %c0_316], %355 {strides = array<i32>} : memref<144x128xbf16, #tpu.memory_space<vmem>>, vector<8x128xbf16>,
    %357 = vector.extract_strided_slice %322 {offsets = [40, 0], sizes = [8, 128], strides = [1, 1]} : vector<64x256xf32> to vector<8x128xf32>
    %358 = arith.truncf %357 : vector<8x128xf32> to vector<8x128xbf16>
    %c88 = arith.constant 88 : index
    %c0_317 = arith.constant 0 : index
    %359 = vector.load %arg36[%c88, %c0_317] : memref<144x128xbf16, #tpu.memory_space<vmem>>, vector<8x128xbf16>
    tpu.vector_store %arg36[%c88, %c0_317], %358 {strides = array<i32>} : memref<144x128xbf16, #tpu.memory_space<vmem>>, vector<8x128xbf16>,
    %360 = vector.extract_strided_slice %322 {offsets = [40, 128], sizes = [8, 128], strides = [1, 1]} : vector<64x256xf32> to vector<8x128xf32>
    %361 = arith.truncf %360 : vector<8x128xf32> to vector<8x128xbf16>
    %c96 = arith.constant 96 : index
    %c0_318 = arith.constant 0 : index
    %362 = vector.load %arg36[%c96, %c0_318] : memref<144x128xbf16, #tpu.memory_space<vmem>>, vector<8x128xbf16>
    tpu.vector_store %arg36[%c96, %c0_318], %361 {strides = array<i32>} : memref<144x128xbf16, #tpu.memory_space<vmem>>, vector<8x128xbf16>,
    %363 = vector.extract_strided_slice %322 {offsets = [48, 0], sizes = [8, 128], strides = [1, 1]} : vector<64x256xf32> to vector<8x128xf32>
    %364 = arith.truncf %363 : vector<8x128xf32> to vector<8x128xbf16>
    %c104 = arith.constant 104 : index
    %c0_319 = arith.constant 0 : index
    %365 = vector.load %arg36[%c104, %c0_319] : memref<144x128xbf16, #tpu.memory_space<vmem>>, vector<8x128xbf16>
    tpu.vector_store %arg36[%c104, %c0_319], %364 {strides = array<i32>} : memref<144x128xbf16, #tpu.memory_space<vmem>>, vector<8x128xbf16>,
    %366 = vector.extract_strided_slice %322 {offsets = [48, 128], sizes = [8, 128], strides = [1, 1]} : vector<64x256xf32> to vector<8x128xf32>
    %367 = arith.truncf %366 : vector<8x128xf32> to vector<8x128xbf16>
    %c112 = arith.constant 112 : index
    %c0_320 = arith.constant 0 : index
    %368 = vector.load %arg36[%c112, %c0_320] : memref<144x128xbf16, #tpu.memory_space<vmem>>, vector<8x128xbf16>
    tpu.vector_store %arg36[%c112, %c0_320], %367 {strides = array<i32>} : memref<144x128xbf16, #tpu.memory_space<vmem>>, vector<8x128xbf16>,
    %369 = vector.extract_strided_slice %322 {offsets = [56, 0], sizes = [8, 128], strides = [1, 1]} : vector<64x256xf32> to vector<8x128xf32>
    %370 = arith.truncf %369 : vector<8x128xf32> to vector<8x128xbf16>
    %c120 = arith.constant 120 : index
    %c0_321 = arith.constant 0 : index
    %371 = vector.load %arg36[%c120, %c0_321] : memref<144x128xbf16, #tpu.memory_space<vmem>>, vector<8x128xbf16>
    tpu.vector_store %arg36[%c120, %c0_321], %370 {strides = array<i32>} : memref<144x128xbf16, #tpu.memory_space<vmem>>, vector<8x128xbf16>,
    %372 = vector.extract_strided_slice %322 {offsets = [56, 128], sizes = [8, 128], strides = [1, 1]} : vector<64x256xf32> to vector<8x128xf32>
    %373 = arith.truncf %372 : vector<8x128xf32> to vector<8x128xbf16>
    %c128 = arith.constant 128 : index
    %c0_322 = arith.constant 0 : index
    %374 = vector.load %arg36[%c128, %c0_322] : memref<144x128xbf16, #tpu.memory_space<vmem>>, vector<8x128xbf16>
    tpu.vector_store %arg36[%c128, %c0_322], %373 {strides = array<i32>} : memref<144x128xbf16, #tpu.memory_space<vmem>>, vector<8x128xbf16>,
    %c0_323 = arith.constant 0 : index
    %c0_324 = arith.constant 0 : index
    %375 = vector.load %arg36[%c0_323, %c0_324] : memref<144x128xbf16, #tpu.memory_space<vmem>>, vector<128x128xbf16>
    %c0_325 = arith.constant 0 : index
    %c0_326 = arith.constant 0 : index
    %c0_327 = arith.constant 0 : index
    %376 = vector.load %arg22[%c0_325, %c0_326, %c0_327] : memref<3x128x128xbf16, #tpu.memory_space<vmem>>, vector<1x128x128xbf16>
    %377 = vector.shape_cast %376 : vector<1x128x128xbf16> to vector<128x128xbf16>
    %cst_328 = arith.constant dense<0.000000e+00> : vector<128x128xf32>
    %378 = tpu.matmul %375, %377, %cst_328 {dimension_numbers = #tpu.dot_dimension_numbers<[1], [0], [0], [1], [0, 0, 1, 1], [], []>} : vector<128x128xbf16>, vector<128x128xbf16>, vector<128x128xf32> -> vector<128x128xf32>
    %c8_329 = arith.constant 8 : index
    %c0_330 = arith.constant 0 : index
    %379 = vector.load %arg36[%c8_329, %c0_330] : memref<144x128xbf16, #tpu.memory_space<vmem>>, vector<128x128xbf16>
    %c1_331 = arith.constant 1 : index
    %c0_332 = arith.constant 0 : index
    %c0_333 = arith.constant 0 : index
    %380 = vector.load %arg22[%c1_331, %c0_332, %c0_333] : memref<3x128x128xbf16, #tpu.memory_space<vmem>>, vector<1x128x128xbf16>
    %381 = vector.shape_cast %380 : vector<1x128x128xbf16> to vector<128x128xbf16>
    %cst_334 = arith.constant dense<0.000000e+00> : vector<128x128xf32>
    %382 = tpu.matmul %379, %381, %cst_334 {dimension_numbers = #tpu.dot_dimension_numbers<[1], [0], [0], [1], [0, 0, 1, 1], [], []>} : vector<128x128xbf16>, vector<128x128xbf16>, vector<128x128xf32> -> vector<128x128xf32>
    %383 = arith.addf %378, %382 : vector<128x128xf32>
    %c16_335 = arith.constant 16 : index
    %c0_336 = arith.constant 0 : index
    %384 = vector.load %arg36[%c16_335, %c0_336] : memref<144x128xbf16, #tpu.memory_space<vmem>>, vector<128x128xbf16>
    %c2_337 = arith.constant 2 : index
    %c0_338 = arith.constant 0 : index
    %c0_339 = arith.constant 0 : index
    %385 = vector.load %arg22[%c2_337, %c0_338, %c0_339] : memref<3x128x128xbf16, #tpu.memory_space<vmem>>, vector<1x128x128xbf16>
    %386 = vector.shape_cast %385 : vector<1x128x128xbf16> to vector<128x128xbf16>
    %cst_340 = arith.constant dense<0.000000e+00> : vector<128x128xf32>
    %387 = tpu.matmul %384, %386, %cst_340 {dimension_numbers = #tpu.dot_dimension_numbers<[1], [0], [0], [1], [0, 0, 1, 1], [], []>} : vector<128x128xbf16>, vector<128x128xbf16>, vector<128x128xf32> -> vector<128x128xf32>
    %388 = arith.addf %383, %387 : vector<128x128xf32>
    %c0_341 = arith.constant 0 : index
    %c0_342 = arith.constant 0 : index
    %389 = vector.load %arg23[%c0_341, %c0_342] : memref<1x128xf32, #tpu.memory_space<vmem>>, vector<1x128xf32>
    %390 = vector.broadcast %389 : vector<1x128xf32> to vector<128x128xf32>
    %391 = arith.addf %388, %390 : vector<128x128xf32>
    %cst_343 = arith.constant 0.000000e+00 : f32
    %392 = vector.broadcast %cst_343 : f32 to vector<128x128xf32>
    %393 = arith.maximumf %391, %392 : vector<128x128xf32>
    %cst_344 = arith.constant 0.000000e+00 : bf16
    %394 = vector.broadcast %cst_344 : bf16 to vector<8x128xbf16>
    %c64_345 = arith.constant 64 : index
    %c0_346 = arith.constant 0 : index
    %395 = vector.load %arg37[%c64_345, %c0_346] : memref<72x128xbf16, #tpu.memory_space<vmem>>, vector<8x128xbf16>
    tpu.vector_store %arg37[%c64_345, %c0_346], %394 {strides = array<i32>} : memref<72x128xbf16, #tpu.memory_space<vmem>>, vector<8x128xbf16>,
    %396 = vector.extract_strided_slice %393 {offsets = [0, 0], sizes = [8, 128], strides = [1, 1]} : vector<128x128xf32> to vector<8x128xf32>
    %397 = arith.truncf %396 : vector<8x128xf32> to vector<8x128xbf16>
    %c0_347 = arith.constant 0 : index
    %c0_348 = arith.constant 0 : index
    %398 = vector.load %arg37[%c0_347, %c0_348] : memref<72x128xbf16, #tpu.memory_space<vmem>>, vector<8x128xbf16>
    tpu.vector_store %arg37[%c0_347, %c0_348], %397 {strides = array<i32>} : memref<72x128xbf16, #tpu.memory_space<vmem>>, vector<8x128xbf16>,
    %399 = vector.extract_strided_slice %393 {offsets = [8, 0], sizes = [8, 128], strides = [1, 1]} : vector<128x128xf32> to vector<8x128xf32>
    %400 = arith.truncf %399 : vector<8x128xf32> to vector<8x128xbf16>
    %c0_349 = arith.constant 0 : index
    %c0_350 = arith.constant 0 : index
    %401 = vector.load %arg38[%c0_349, %c0_350] : memref<64x128xbf16, #tpu.memory_space<vmem>>, vector<8x128xbf16>
    tpu.vector_store %arg38[%c0_349, %c0_350], %400 {strides = array<i32>} : memref<64x128xbf16, #tpu.memory_space<vmem>>, vector<8x128xbf16>,
    %402 = vector.extract_strided_slice %393 {offsets = [16, 0], sizes = [8, 128], strides = [1, 1]} : vector<128x128xf32> to vector<8x128xf32>
    %403 = arith.truncf %402 : vector<8x128xf32> to vector<8x128xbf16>
    %c8_351 = arith.constant 8 : index
    %c0_352 = arith.constant 0 : index
    %404 = vector.load %arg37[%c8_351, %c0_352] : memref<72x128xbf16, #tpu.memory_space<vmem>>, vector<8x128xbf16>
    tpu.vector_store %arg37[%c8_351, %c0_352], %403 {strides = array<i32>} : memref<72x128xbf16, #tpu.memory_space<vmem>>, vector<8x128xbf16>,
    %405 = vector.extract_strided_slice %393 {offsets = [24, 0], sizes = [8, 128], strides = [1, 1]} : vector<128x128xf32> to vector<8x128xf32>
    %406 = arith.truncf %405 : vector<8x128xf32> to vector<8x128xbf16>
    %c8_353 = arith.constant 8 : index
    %c0_354 = arith.constant 0 : index
    %407 = vector.load %arg38[%c8_353, %c0_354] : memref<64x128xbf16, #tpu.memory_space<vmem>>, vector<8x128xbf16>
    tpu.vector_store %arg38[%c8_353, %c0_354], %406 {strides = array<i32>} : memref<64x128xbf16, #tpu.memory_space<vmem>>, vector<8x128xbf16>,
    %408 = vector.extract_strided_slice %393 {offsets = [32, 0], sizes = [8, 128], strides = [1, 1]} : vector<128x128xf32> to vector<8x128xf32>
    %409 = arith.truncf %408 : vector<8x128xf32> to vector<8x128xbf16>
    %c16_355 = arith.constant 16 : index
    %c0_356 = arith.constant 0 : index
    %410 = vector.load %arg37[%c16_355, %c0_356] : memref<72x128xbf16, #tpu.memory_space<vmem>>, vector<8x128xbf16>
    tpu.vector_store %arg37[%c16_355, %c0_356], %409 {strides = array<i32>} : memref<72x128xbf16, #tpu.memory_space<vmem>>, vector<8x128xbf16>,
    %411 = vector.extract_strided_slice %393 {offsets = [40, 0], sizes = [8, 128], strides = [1, 1]} : vector<128x128xf32> to vector<8x128xf32>
    %412 = arith.truncf %411 : vector<8x128xf32> to vector<8x128xbf16>
    %c16_357 = arith.constant 16 : index
    %c0_358 = arith.constant 0 : index
    %413 = vector.load %arg38[%c16_357, %c0_358] : memref<64x128xbf16, #tpu.memory_space<vmem>>, vector<8x128xbf16>
    tpu.vector_store %arg38[%c16_357, %c0_358], %412 {strides = array<i32>} : memref<64x128xbf16, #tpu.memory_space<vmem>>, vector<8x128xbf16>,
    %414 = vector.extract_strided_slice %393 {offsets = [48, 0], sizes = [8, 128], strides = [1, 1]} : vector<128x128xf32> to vector<8x128xf32>
    %415 = arith.truncf %414 : vector<8x128xf32> to vector<8x128xbf16>
    %c24_359 = arith.constant 24 : index
    %c0_360 = arith.constant 0 : index
    %416 = vector.load %arg37[%c24_359, %c0_360] : memref<72x128xbf16, #tpu.memory_space<vmem>>, vector<8x128xbf16>
    tpu.vector_store %arg37[%c24_359, %c0_360], %415 {strides = array<i32>} : memref<72x128xbf16, #tpu.memory_space<vmem>>, vector<8x128xbf16>,
    %417 = vector.extract_strided_slice %393 {offsets = [56, 0], sizes = [8, 128], strides = [1, 1]} : vector<128x128xf32> to vector<8x128xf32>
    %418 = arith.truncf %417 : vector<8x128xf32> to vector<8x128xbf16>
    %c24_361 = arith.constant 24 : index
    %c0_362 = arith.constant 0 : index
    %419 = vector.load %arg38[%c24_361, %c0_362] : memref<64x128xbf16, #tpu.memory_space<vmem>>, vector<8x128xbf16>
    tpu.vector_store %arg38[%c24_361, %c0_362], %418 {strides = array<i32>} : memref<64x128xbf16, #tpu.memory_space<vmem>>, vector<8x128xbf16>,
    %420 = vector.extract_strided_slice %393 {offsets = [64, 0], sizes = [8, 128], strides = [1, 1]} : vector<128x128xf32> to vector<8x128xf32>
    %421 = arith.truncf %420 : vector<8x128xf32> to vector<8x128xbf16>
    %c32_363 = arith.constant 32 : index
    %c0_364 = arith.constant 0 : index
    %422 = vector.load %arg37[%c32_363, %c0_364] : memref<72x128xbf16, #tpu.memory_space<vmem>>, vector<8x128xbf16>
    tpu.vector_store %arg37[%c32_363, %c0_364], %421 {strides = array<i32>} : memref<72x128xbf16, #tpu.memory_space<vmem>>, vector<8x128xbf16>,
    %423 = vector.extract_strided_slice %393 {offsets = [72, 0], sizes = [8, 128], strides = [1, 1]} : vector<128x128xf32> to vector<8x128xf32>
    %424 = arith.truncf %423 : vector<8x128xf32> to vector<8x128xbf16>
    %c32_365 = arith.constant 32 : index
    %c0_366 = arith.constant 0 : index
    %425 = vector.load %arg38[%c32_365, %c0_366] : memref<64x128xbf16, #tpu.memory_space<vmem>>, vector<8x128xbf16>
    tpu.vector_store %arg38[%c32_365, %c0_366], %424 {strides = array<i32>} : memref<64x128xbf16, #tpu.memory_space<vmem>>, vector<8x128xbf16>,
    %426 = vector.extract_strided_slice %393 {offsets = [80, 0], sizes = [8, 128], strides = [1, 1]} : vector<128x128xf32> to vector<8x128xf32>
    %427 = arith.truncf %426 : vector<8x128xf32> to vector<8x128xbf16>
    %c40_367 = arith.constant 40 : index
    %c0_368 = arith.constant 0 : index
    %428 = vector.load %arg37[%c40_367, %c0_368] : memref<72x128xbf16, #tpu.memory_space<vmem>>, vector<8x128xbf16>
    tpu.vector_store %arg37[%c40_367, %c0_368], %427 {strides = array<i32>} : memref<72x128xbf16, #tpu.memory_space<vmem>>, vector<8x128xbf16>,
    %429 = vector.extract_strided_slice %393 {offsets = [88, 0], sizes = [8, 128], strides = [1, 1]} : vector<128x128xf32> to vector<8x128xf32>
    %430 = arith.truncf %429 : vector<8x128xf32> to vector<8x128xbf16>
    %c40_369 = arith.constant 40 : index
    %c0_370 = arith.constant 0 : index
    %431 = vector.load %arg38[%c40_369, %c0_370] : memref<64x128xbf16, #tpu.memory_space<vmem>>, vector<8x128xbf16>
    tpu.vector_store %arg38[%c40_369, %c0_370], %430 {strides = array<i32>} : memref<64x128xbf16, #tpu.memory_space<vmem>>, vector<8x128xbf16>,
    %432 = vector.extract_strided_slice %393 {offsets = [96, 0], sizes = [8, 128], strides = [1, 1]} : vector<128x128xf32> to vector<8x128xf32>
    %433 = arith.truncf %432 : vector<8x128xf32> to vector<8x128xbf16>
    %c48_371 = arith.constant 48 : index
    %c0_372 = arith.constant 0 : index
    %434 = vector.load %arg37[%c48_371, %c0_372] : memref<72x128xbf16, #tpu.memory_space<vmem>>, vector<8x128xbf16>
    tpu.vector_store %arg37[%c48_371, %c0_372], %433 {strides = array<i32>} : memref<72x128xbf16, #tpu.memory_space<vmem>>, vector<8x128xbf16>,
    %435 = vector.extract_strided_slice %393 {offsets = [104, 0], sizes = [8, 128], strides = [1, 1]} : vector<128x128xf32> to vector<8x128xf32>
    %436 = arith.truncf %435 : vector<8x128xf32> to vector<8x128xbf16>
    %c48_373 = arith.constant 48 : index
    %c0_374 = arith.constant 0 : index
    %437 = vector.load %arg38[%c48_373, %c0_374] : memref<64x128xbf16, #tpu.memory_space<vmem>>, vector<8x128xbf16>
    tpu.vector_store %arg38[%c48_373, %c0_374], %436 {strides = array<i32>} : memref<64x128xbf16, #tpu.memory_space<vmem>>, vector<8x128xbf16>,
    %438 = vector.extract_strided_slice %393 {offsets = [112, 0], sizes = [8, 128], strides = [1, 1]} : vector<128x128xf32> to vector<8x128xf32>
    %439 = arith.truncf %438 : vector<8x128xf32> to vector<8x128xbf16>
    %c56_375 = arith.constant 56 : index
    %c0_376 = arith.constant 0 : index
    %440 = vector.load %arg37[%c56_375, %c0_376] : memref<72x128xbf16, #tpu.memory_space<vmem>>, vector<8x128xbf16>
    tpu.vector_store %arg37[%c56_375, %c0_376], %439 {strides = array<i32>} : memref<72x128xbf16, #tpu.memory_space<vmem>>, vector<8x128xbf16>,
    %441 = vector.extract_strided_slice %393 {offsets = [120, 0], sizes = [8, 128], strides = [1, 1]} : vector<128x128xf32> to vector<8x128xf32>
    %442 = arith.truncf %441 : vector<8x128xf32> to vector<8x128xbf16>
    %c56_377 = arith.constant 56 : index
    %c0_378 = arith.constant 0 : index
    %443 = vector.load %arg38[%c56_377, %c0_378] : memref<64x128xbf16, #tpu.memory_space<vmem>>, vector<8x128xbf16>
    tpu.vector_store %arg38[%c56_377, %c0_378], %442 {strides = array<i32>} : memref<64x128xbf16, #tpu.memory_space<vmem>>, vector<8x128xbf16>,
    %c0_379 = arith.constant 0 : index
    %c0_380 = arith.constant 0 : index
    %444 = vector.load %arg37[%c0_379, %c0_380] : memref<72x128xbf16, #tpu.memory_space<vmem>>, vector<64x128xbf16>
    %c0_381 = arith.constant 0 : index
    %c0_382 = arith.constant 0 : index
    %c0_383 = arith.constant 0 : index
    %445 = vector.load %arg24[%c0_381, %c0_382, %c0_383] : memref<3x128x128xbf16, #tpu.memory_space<vmem>>, vector<1x128x128xbf16>
    %446 = vector.shape_cast %445 : vector<1x128x128xbf16> to vector<128x128xbf16>
    %cst_384 = arith.constant dense<0.000000e+00> : vector<64x128xf32>
    %447 = tpu.matmul %444, %446, %cst_384 {dimension_numbers = #tpu.dot_dimension_numbers<[1], [0], [0], [1], [0, 0, 1, 1], [], []>} : vector<64x128xbf16>, vector<128x128xbf16>, vector<64x128xf32> -> vector<64x128xf32>
    %c0_385 = arith.constant 0 : index
    %c0_386 = arith.constant 0 : index
    %448 = vector.load %arg38[%c0_385, %c0_386] : memref<64x128xbf16, #tpu.memory_space<vmem>>, vector<64x128xbf16>
    %c1_387 = arith.constant 1 : index
    %c0_388 = arith.constant 0 : index
    %c0_389 = arith.constant 0 : index
    %449 = vector.load %arg24[%c1_387, %c0_388, %c0_389] : memref<3x128x128xbf16, #tpu.memory_space<vmem>>, vector<1x128x128xbf16>
    %450 = vector.shape_cast %449 : vector<1x128x128xbf16> to vector<128x128xbf16>
    %cst_390 = arith.constant dense<0.000000e+00> : vector<64x128xf32>
    %451 = tpu.matmul %448, %450, %cst_390 {dimension_numbers = #tpu.dot_dimension_numbers<[1], [0], [0], [1], [0, 0, 1, 1], [], []>} : vector<64x128xbf16>, vector<128x128xbf16>, vector<64x128xf32> -> vector<64x128xf32>
    %452 = arith.addf %447, %451 : vector<64x128xf32>
    %c8_391 = arith.constant 8 : index
    %c0_392 = arith.constant 0 : index
    %453 = vector.load %arg37[%c8_391, %c0_392] : memref<72x128xbf16, #tpu.memory_space<vmem>>, vector<64x128xbf16>
    %c2_393 = arith.constant 2 : index
    %c0_394 = arith.constant 0 : index
    %c0_395 = arith.constant 0 : index
    %454 = vector.load %arg24[%c2_393, %c0_394, %c0_395] : memref<3x128x128xbf16, #tpu.memory_space<vmem>>, vector<1x128x128xbf16>
    %455 = vector.shape_cast %454 : vector<1x128x128xbf16> to vector<128x128xbf16>
    %cst_396 = arith.constant dense<0.000000e+00> : vector<64x128xf32>
    %456 = tpu.matmul %453, %455, %cst_396 {dimension_numbers = #tpu.dot_dimension_numbers<[1], [0], [0], [1], [0, 0, 1, 1], [], []>} : vector<64x128xbf16>, vector<128x128xbf16>, vector<64x128xf32> -> vector<64x128xf32>
    %457 = arith.addf %452, %456 : vector<64x128xf32>
    %c0_397 = arith.constant 0 : index
    %c0_398 = arith.constant 0 : index
    %458 = vector.load %arg25[%c0_397, %c0_398] : memref<1x128xf32, #tpu.memory_space<vmem>>, vector<1x128xf32>
    %459 = vector.broadcast %458 : vector<1x128xf32> to vector<64x128xf32>
    %460 = arith.addf %457, %459 : vector<64x128xf32>
    %461 = math.tanh %460 : vector<64x128xf32>
    %c0_399 = arith.constant 0 : index
    %c0_400 = arith.constant 0 : index
    %462 = vector.load %arg26[%c0_399, %c0_400] : memref<64x128xf32, #tpu.memory_space<vmem>>, vector<64x128xf32>
    tpu.vector_store %arg26[%c0_399, %c0_400], %461 {strides = array<i32>} : memref<64x128xf32, #tpu.memory_space<vmem>>, vector<64x128xf32>,
    return
  }
  func.func @transform_0(%arg0: i32) -> (i32, i32) {
    %c0_i32 = arith.constant 0 : i32
    %c0_i32_0 = arith.constant 0 : i32
    return %arg0, %c0_i32 : i32, i32
  }
  func.func @transform_1(%arg0: i32) -> (i32, i32) {
    %c0_i32 = arith.constant 0 : i32
    %c0_i32_0 = arith.constant 0 : i32
    %c0_i32_1 = arith.constant 0 : i32
    return %c0_i32, %c0_i32_0 : i32, i32
  }
  func.func @transform_2(%arg0: i32) -> (i32, i32) {
    %c0_i32 = arith.constant 0 : i32
    %c0_i32_0 = arith.constant 0 : i32
    %c0_i32_1 = arith.constant 0 : i32
    return %c0_i32, %c0_i32_0 : i32, i32
  }
  func.func @transform_3(%arg0: i32) -> (i32, i32, i32) {
    %c0_i32 = arith.constant 0 : i32
    %c0_i32_0 = arith.constant 0 : i32
    %c0_i32_1 = arith.constant 0 : i32
    %c0_i32_2 = arith.constant 0 : i32
    return %c0_i32, %c0_i32_0, %c0_i32_1 : i32, i32, i32
  }
  func.func @transform_4(%arg0: i32) -> (i32, i32) {
    %c0_i32 = arith.constant 0 : i32
    %c0_i32_0 = arith.constant 0 : i32
    %c0_i32_1 = arith.constant 0 : i32
    return %c0_i32, %c0_i32_0 : i32, i32
  }
  func.func @transform_5(%arg0: i32) -> (i32, i32, i32) {
    %c0_i32 = arith.constant 0 : i32
    %c0_i32_0 = arith.constant 0 : i32
    %c0_i32_1 = arith.constant 0 : i32
    %c0_i32_2 = arith.constant 0 : i32
    return %c0_i32, %c0_i32_0, %c0_i32_1 : i32, i32, i32
  }
  func.func @transform_6(%arg0: i32) -> (i32, i32) {
    %c0_i32 = arith.constant 0 : i32
    %c0_i32_0 = arith.constant 0 : i32
    %c0_i32_1 = arith.constant 0 : i32
    return %c0_i32, %c0_i32_0 : i32, i32
  }
  func.func @transform_7(%arg0: i32) -> (i32, i32, i32) {
    %c0_i32 = arith.constant 0 : i32
    %c0_i32_0 = arith.constant 0 : i32
    %c0_i32_1 = arith.constant 0 : i32
    %c0_i32_2 = arith.constant 0 : i32
    return %c0_i32, %c0_i32_0, %c0_i32_1 : i32, i32, i32
  }
  func.func @transform_8(%arg0: i32) -> (i32, i32) {
    %c0_i32 = arith.constant 0 : i32
    %c0_i32_0 = arith.constant 0 : i32
    %c0_i32_1 = arith.constant 0 : i32
    return %c0_i32, %c0_i32_0 : i32, i32
  }
  func.func @transform_9(%arg0: i32) -> (i32, i32, i32) {
    %c0_i32 = arith.constant 0 : i32
    %c0_i32_0 = arith.constant 0 : i32
    %c0_i32_1 = arith.constant 0 : i32
    %c0_i32_2 = arith.constant 0 : i32
    return %c0_i32, %c0_i32_0, %c0_i32_1 : i32, i32, i32
  }
  func.func @transform_10(%arg0: i32) -> (i32, i32) {
    %c0_i32 = arith.constant 0 : i32
    %c0_i32_0 = arith.constant 0 : i32
    %c0_i32_1 = arith.constant 0 : i32
    return %c0_i32, %c0_i32_0 : i32, i32
  }
  func.func @transform_11(%arg0: i32) -> (i32, i32, i32) {
    %c0_i32 = arith.constant 0 : i32
    %c0_i32_0 = arith.constant 0 : i32
    %c0_i32_1 = arith.constant 0 : i32
    %c0_i32_2 = arith.constant 0 : i32
    return %c0_i32, %c0_i32_0, %c0_i32_1 : i32, i32, i32
  }
  func.func @transform_12(%arg0: i32) -> (i32, i32) {
    %c0_i32 = arith.constant 0 : i32
    %c0_i32_0 = arith.constant 0 : i32
    %c0_i32_1 = arith.constant 0 : i32
    return %c0_i32, %c0_i32_0 : i32, i32
  }
  func.func @transform_13(%arg0: i32) -> (i32, i32, i32) {
    %c0_i32 = arith.constant 0 : i32
    %c0_i32_0 = arith.constant 0 : i32
    %c0_i32_1 = arith.constant 0 : i32
    %c0_i32_2 = arith.constant 0 : i32
    return %c0_i32, %c0_i32_0, %c0_i32_1 : i32, i32, i32
  }
  func.func @transform_14(%arg0: i32) -> (i32, i32, i32) {
    %c0_i32 = arith.constant 0 : i32
    %c0_i32_0 = arith.constant 0 : i32
    %c0_i32_1 = arith.constant 0 : i32
    %c0_i32_2 = arith.constant 0 : i32
    return %c0_i32, %c0_i32_0, %c0_i32_1 : i32, i32, i32
  }
  func.func @transform_15(%arg0: i32) -> (i32, i32, i32) {
    %c0_i32 = arith.constant 0 : i32
    %c0_i32_0 = arith.constant 0 : i32
    %c0_i32_1 = arith.constant 0 : i32
    %c0_i32_2 = arith.constant 0 : i32
    return %c0_i32, %c0_i32_0, %c0_i32_1 : i32, i32, i32
  }
  func.func @transform_16(%arg0: i32) -> (i32, i32) {
    %c0_i32 = arith.constant 0 : i32
    %c0_i32_0 = arith.constant 0 : i32
    %c0_i32_1 = arith.constant 0 : i32
    return %c0_i32, %c0_i32_0 : i32, i32
  }
  func.func @transform_17(%arg0: i32) -> (i32, i32, i32) {
    %c0_i32 = arith.constant 0 : i32
    %c0_i32_0 = arith.constant 0 : i32
    %c0_i32_1 = arith.constant 0 : i32
    %c0_i32_2 = arith.constant 0 : i32
    return %c0_i32, %c0_i32_0, %c0_i32_1 : i32, i32, i32
  }
  func.func @transform_18(%arg0: i32) -> (i32, i32) {
    %c0_i32 = arith.constant 0 : i32
    %c0_i32_0 = arith.constant 0 : i32
    %c0_i32_1 = arith.constant 0 : i32
    return %c0_i32, %c0_i32_0 : i32, i32
  }
  func.func @transform_19(%arg0: i32) -> (i32, i32, i32) {
    %c0_i32 = arith.constant 0 : i32
    %c0_i32_0 = arith.constant 0 : i32
    %c0_i32_1 = arith.constant 0 : i32
    %c0_i32_2 = arith.constant 0 : i32
    return %c0_i32, %c0_i32_0, %c0_i32_1 : i32, i32, i32
  }
  func.func @transform_20(%arg0: i32) -> (i32, i32) {
    %c0_i32 = arith.constant 0 : i32
    %c0_i32_0 = arith.constant 0 : i32
    %c0_i32_1 = arith.constant 0 : i32
    return %c0_i32, %c0_i32_0 : i32, i32
  }
  func.func @transform_21(%arg0: i32) -> (i32, i32, i32) {
    %c0_i32 = arith.constant 0 : i32
    %c0_i32_0 = arith.constant 0 : i32
    %c0_i32_1 = arith.constant 0 : i32
    %c0_i32_2 = arith.constant 0 : i32
    return %c0_i32, %c0_i32_0, %c0_i32_1 : i32, i32, i32
  }
  func.func @transform_22(%arg0: i32) -> (i32, i32) {
    %c0_i32 = arith.constant 0 : i32
    %c0_i32_0 = arith.constant 0 : i32
    %c0_i32_1 = arith.constant 0 : i32
    return %c0_i32, %c0_i32_0 : i32, i32
  }
  func.func @transform_23(%arg0: i32) -> (i32, i32, i32) {
    %c0_i32 = arith.constant 0 : i32
    %c0_i32_0 = arith.constant 0 : i32
    %c0_i32_1 = arith.constant 0 : i32
    %c0_i32_2 = arith.constant 0 : i32
    return %c0_i32, %c0_i32_0, %c0_i32_1 : i32, i32, i32
  }
  func.func @transform_24(%arg0: i32) -> (i32, i32) {
    %c0_i32 = arith.constant 0 : i32
    %c0_i32_0 = arith.constant 0 : i32
    %c0_i32_1 = arith.constant 0 : i32
    return %c0_i32, %c0_i32_0 : i32, i32
  }
  func.func @transform_25(%arg0: i32) -> (i32, i32) {
    %c0_i32 = arith.constant 0 : i32
    %c0_i32_0 = arith.constant 0 : i32
    return %arg0, %c0_i32 : i32, i32
  }
}

</mosaic_0001>

<bundles_post_ra>
// kernel: autoencoder_forward.1
= control target key start
LH: loop header
LB: loop body
LE: loop exit
PB: predicated region body
PF: predicated region fallthrough
CT: control target
= control target key end

     0   :  { %s8715_s29 = smov 0   ;;  %s9897_s0 = inlined_call_operand.vmem [shape: bf16[256,96], index: 0, kind: input, shape index: {}]   ;;  %s9898_s1 = inlined_call_operand.vmem [shape: bf16[96,128], index: 1, kind: input, shape index: {}]   ;;  %s9899_s2 = inlined_call_operand.vmem [shape: f32[1,128], index: 2, kind: input, shape index: {}]   ;;  %s9900_s3 = inlined_call_operand.vmem [shape: bf16[3,128,128], index: 3, kind: input, shape index: {}]   ;;  %s9901_s4 = inlined_call_operand.vmem [shape: f32[1,128], index: 4, kind: input, shape index: {}]   ;;  %s9902_s5 = inlined_call_operand.vmem [shape: bf16[3,128,128], index: 5, kind: input, shape index: {}]   ;;  %s9903_s6 = inlined_call_operand.vmem [shape: f32[1,128], index: 6, kind: input, shape index: {}]   ;;  %s9904_s7 = inlined_call_operand.vmem [shape: bf16[3,128,128], index: 7, kind: input, shape index: {}]   ;;  %s9905_s8 = inlined_call_operand.vmem [shape: f32[1,128], index: 8, kind: input, shape index: {}]   ;;  %s9906_s9 = inlined_call_operand.vmem [shape: bf16[3,128,64], index: 9, kind: input, shape index: {}]   ;;  %s9907_s10 = inlined_call_operand.vmem [shape: f32[1,64], index: 10, kind: input, shape index: {}]   ;;  %s9908_s11 = inlined_call_operand.vmem [shape: f32[4,64,32], index: 11, kind: input, shape index: {}]   ;;  %s9909_s12 = inlined_call_operand.vmem [shape: f32[1,32], index: 12, kind: input, shape index: {}]   ;;  %s9910_s13 = inlined_call_operand.vmem [shape: f32[4,32,64], index: 13, kind: input, shape index: {}]   ;;  %s9911_s14 = inlined_call_operand.vmem [shape: f32[4,1,64], index: 14, kind: input, shape index: {}]   ;;  %s9912_s15 = inlined_call_operand.vmem [shape: bf16[2,64,256], index: 15, kind: input, shape index: {}]   ;;  %s9913_s16 = inlined_call_operand.vmem [shape: f32[1,256], index: 16, kind: input, shape index: {}]   ;;  %s9914_s17 = inlined_call_operand.vmem [shape: bf16[3,128,128], index: 17, kind: input, shape index: {}]   ;;  %s9915_s18 = inlined_call_operand.vmem [shape: f32[1,128], index: 18, kind: input, shape index: {}]   ;;  %s9916_s19 = inlined_call_operand.vmem [shape: bf16[2,128,256], index: 19, kind: input, shape index: {}]   ;;  %s9917_s20 = inlined_call_operand.vmem [shape: f32[1,256], index: 20, kind: input, shape index: {}]   ;;  %s9918_s21 = inlined_call_operand.vmem [shape: bf16[3,128,128], index: 21, kind: input, shape index: {}]   ;;  %s9919_s22 = inlined_call_operand.vmem [shape: f32[1,128], index: 22, kind: input, shape index: {}]   ;;  %s9920_s23 = inlined_call_operand.vmem [shape: bf16[3,128,128], index: 23, kind: input, shape index: {}]   ;;  %s9921_s24 = inlined_call_operand.vmem [shape: f32[1,128], index: 24, kind: input, shape index: {}]   ;;  %s9922_s25 = inlined_call_operand.vmem [shape: f32[128,128], index: 25, kind: output, shape index: {}]  }
   0x1   :  { %9930 = sst [smem:[#allocation14_spill]] %s9897_s0 }
   0x2   :  { %9931 = sst [smem:[#allocation15_spill]] %s9898_s1 }
   0x3   :  { %9932 = sst [smem:[#allocation16_spill]] %s9899_s2 }
   0x4   :  { %9933 = sst [smem:[#allocation17_spill]] %s9900_s3 }
   0x5   :  { %9934 = sst [smem:[#allocation18_spill]] %s9901_s4 }
   0x6   :  { %9935 = sst [smem:[#allocation19_spill]] %s9902_s5 }
   0x7   :  { %9936 = sst [smem:[#allocation20_spill]] %s9903_s6 }
   0x8   :  { %9937 = sst [smem:[#allocation21_spill]] %s9904_s7 }
   0x9   :  { %9938 = sst [smem:[#allocation22_spill]] %s9905_s8 }
   0xa   :  { %9939 = sst [smem:[#allocation23_spill]] %s9906_s9 }
   0xb LB: > { %s9928_s2 = sadd.s32 4294967295, %s8579_s29   ;;  %p6278_p0 = scmp.ge.s32.totalorder %s8579_s29, 1  ;;  %s8579_s29 = sphi %s8715_s29, %s35_s29  }
   0xc   : > { %p688_p1 = scmp.lt.s32.totalorder %s8579_s29, 3 }
   0xe   : > { %p689_p2 = pnand %p6278_p0, %p688_p1 }
   0xf   : > { %s9940_s7 = sld [smem:[#allocation15_spill]] (!%p689_p2)  ;;  %s6279_s3 = sshll.u32 (!%p689_p2), %s9928_s2, 4  ;;  %vm880_vm0 = vcmask (!%p689_p2), 785408   ;;  %v8581_v20 = vmov (!%p689_p2), 0   ;;  %vm1036_vm1 = vcmask (!%p689_p2), 1043456   ;;  %vm8583_vm2 = vmmov (!%p689_p2), 0  }
  0x10   : > { %692 = sbr.rel (%p689_p2) target bundleno = 3367 (0xd27), region = 120  ;;  %p757_p3 = scmp.lt.s32.totalorder (!%p689_p2), %s6279_s3, 31  ;;  %1018 = vst [vmem:[#allocation2] sm:$0xf] (!%p689_p2), %v8581_v20  ;;  %1019 = vst [vmem:[#allocation2 + $0x40] sm:$0xf0] (!%p689_p2), %v8581_v20 }
  0x11   : > { %s9941_s5 = sld [smem:[#allocation14_spill]] (!%p689_p2)  ;;  %s9942_s26 = sld [smem:[#allocation17_spill]] (!%p689_p2)  ;;  %1662 = vst [vmem:[#allocation3] sm:$0xf] (!%p689_p2), %v8581_v20  ;;  %2212 = vst [vmem:[#allocation5] sm:$0xf] (!%p689_p2), %v8581_v20 }
  0x12   : > { %2213 = vst [vmem:[#allocation5 + $0x20] sm:$0xf0] (!%p689_p2), %v8581_v20  ;;  %2687 = vst [vmem:[#allocation6] sm:$0xf] (!%p689_p2), %v8581_v20  ;;  %s9947_s8 = sld [smem:[#allocation23_spill]] (!%p689_p2)  ;;  %s9948_s9 = sld [smem:[#allocation20_spill]] (!%p689_p2) }
  0x13   : > { %4061 = vst [vmem:[#allocation9] sm:$0xf] (!%p689_p2), %v8581_v20  ;;  %4062 = vst [vmem:[#allocation9 + $0x20] sm:$0xf0] (!%p689_p2), %v8581_v20  ;;  %s9949_s2 = sld [smem:[#allocation22_spill]] (!%p689_p2)  ;;  %vm3130_vm3 = vcmask (!%p689_p2), 523264  }
  0x14   : > { %4539 = vst [vmem:[#allocation10 + $0x20] sm:$0xf] (!%p689_p2), %v8581_v20  ;;  %5027 = vst [vmem:[#allocation11] sm:$0xf] (!%p689_p2), %v8581_v20  ;;  %vm3451_vm4 = vcmask (!%p689_p2), 519168   ;;  %vm3464_vm5 = vcmask (!%p689_p2), 261120  }
  0x15   : > { %v8265_v0 = vld [vmem:[%s9940_s7] sm:$0xff] (!%p689_p2)   ;;  %v8266_v1 = vld [vmem:[%s9940_s7 + $0x8] sm:$0xff] (!%p689_p2)   ;;  %v8267_v2 = vld [vmem:[%s9940_s7 + $0x10] sm:$0xff] (!%p689_p2)   ;;  %5028 = vst [vmem:[#allocation11 + $0x40] sm:$0xf0] (!%p689_p2), %v8581_v20  ;;  %s9950_s30 = sadd.s32 (!%p689_p2), 4294967295, %s8579_s29  }
  0x16   : > { %7333 = vmatprep.subr.bf16.mxu0 (!%p689_p2), %v8265_v0  ;;  %v8268_v5 = vld [vmem:[%s9940_s7 + $0x18] sm:$0xff] (!%p689_p2)   ;;  %v8269_v6 = vld [vmem:[%s9940_s7 + $0x20] sm:$0xff] (!%p689_p2)   ;;  %v8270_v7 = vld [vmem:[%s9940_s7 + $0x28] sm:$0xff] (!%p689_p2)   ;;  %5677 = vst [vmem:[#allocation12 + $0x20] sm:$0xf] (!%p689_p2), %v8581_v20  ;;  %s6281_s1 = sshll.u32 (!%p689_p2), %s9950_s30, 3 }
  0x17   : > { %7334 = vmatpush3.bf16.msra.mxu0 %v8265_v0  ;;  %s9952_s3 = smov (!%p757_p3, %s6279_s3), 31  ;;  %v8279_v3 = vld [vmem:[%s9942_s26 + $0x40] sm:$0xff]   ;;  %v8280_v15 = vld [vmem:[%s9942_s26 + $0x48] sm:$0xff]   ;;  %v8281_v16 = vld [vmem:[%s9942_s26 + $0x50] sm:$0xff]   ;;  %3452 = vst.msk [vmem:[#allocation8 + $0x10] sm:$0xf] %vm3451_vm4, %v8581_v20 }
  0x18   : > { %7335 = vmatprep.subr.bf16.mxu0 %v8266_v1  ;;  %s6280_s4 = sshll.u32 %s9952_s3, 2  ;;  %7361 = vmatprep.subr.bf16.mxu1 %v8279_v3  ;;  %v8282_v17 = vld [vmem:[%s9942_s26 + $0x58] sm:$0xff]   ;;  %v8283_v18 = vld [vmem:[%s9942_s26 + $0x60] sm:$0xff]   ;;  %v8284_v19 = vld [vmem:[%s9942_s26 + $0x68] sm:$0xff]   ;;  %s9943_s3 = sld [smem:[#allocation19_spill]] }
  0x19   : > { %s8737_s0 = scalar_lea.vmem %s9941_s5, %s6280_s4  ;;  %7362 = vmatpush3.bf16.msra.mxu1 %v8279_v3  ;;  %v8285_v21 = vld [vmem:[%s9942_s26 + $0x70] sm:$0xff]   ;;  %v8286_v22 = vld [vmem:[%s9942_s26 + $0x78] sm:$0xff]   ;;  %v8803_v23 = vld [vmem:[%s9942_s26] sm:$0xff]   ;;  %s9944_s5 = sld [smem:[#allocation16_spill]] }
  0x1a   : > { %v8271_v4 = vld [vmem:[%s8737_s0] sm:$0xff]   ;;  %v8272_v8 = vld [vmem:[%s8737_s0 + $0x8] sm:$0xff]   ;;  %v8273_v9 = vld [vmem:[%s8737_s0 + $0x10] sm:$0xff]   ;;  %7363 = vmatprep.subr.bf16.mxu1 %v8280_v15  ;;  %s9945_s4 = sld [smem:[#allocation21_spill]]  ;;  %p763_p4 = scmp.lt.s32.totalorder %s6281_s1, 15 }
  0x1b   : > { %7336 = vmatpush3.bf16.msra.mxu0 %v8266_v1  ;;  %7345 = vmatprep.mubr.msk.bf16.mxu0 %vm880_vm0, %v8271_v4  ;;  %v8274_v10 = vld [vmem:[%s8737_s0 + $0x18] sm:$0xff]   ;;  %v8275_v11 = vld [vmem:[%s8737_s0 + $0x20] sm:$0xff]   ;;  %v8276_v12 = vld [vmem:[%s8737_s0 + $0x28] sm:$0xff]  }
  0x1c   : > { %7337 = vmatprep.subr.bf16.mxu0 %v8267_v2  ;;  %v8277_v13 = vld [vmem:[%s8737_s0 + $0x30] sm:$0xff]   ;;  %v8278_v14 = vld [vmem:[%s8737_s0 + $0x38] sm:$0xff]   ;;  %s9954_s1 = smov (!%p763_p4, %s6281_s1), 15 }
  0x1d   : > { %7364 = vmatpush3.bf16.msra.mxu1 %v8280_v15  ;;  %s6282_s27 = sshll.u32 %s9954_s1, 3 }
  0x1e   : > { %7365 = vmatprep.subr.bf16.mxu1 %v8281_v16  ;;  %v8303_v24 = vld [vmem:[%s9943_s3 + $0x40] sm:$0xff]   ;;  %v8304_v25 = vld [vmem:[%s9943_s3 + $0x48] sm:$0xff]  }
  0x1f   : > { %7338 = vmatpush3.bf16.msra.mxu0 %v8267_v2  ;;  %v8815_v26 = vld [vmem:[%s9944_s5] ss:$0 sm:$0xff]  ;;  %s9946_s5 = sld [smem:[#allocation18_spill]] }
  0x20   : > { %7339 = vmatprep.subr.bf16.mxu0 %v8268_v5 }
  0x21   : > { %7366 = vmatpush3.bf16.msra.mxu1 %v8281_v16 }
  0x22   : > { %7367 = vmatprep.subr.bf16.mxu1 %v8282_v17 }
  0x23   : > { %7340 = vmatpush3.bf16.msra.mxu0 %v8268_v5 }
  0x24   : > { %7341 = vmatprep.subr.bf16.mxu0 %v8269_v6 }
  0x25   : > { %7368 = vmatpush3.bf16.msra.mxu1 %v8282_v17 }
  0x26   : > { %7369 = vmatprep.subr.bf16.mxu1 %v8283_v18 }
  0x27   : > { %7342 = vmatpush3.bf16.msra.mxu0 %v8269_v6 }
  0x28   : > { %7343 = vmatprep.subr.bf16.mxu0 %v8270_v7 }
  0x29   : > { %7370 = vmatpush3.bf16.msra.mxu1 %v8283_v18 }
  0x2a   : > { %7371 = vmatprep.subr.bf16.mxu1 %v8284_v19 }
  0x2b   : > { %7344 = vmatpush3.bf16.msra.mxu0 %v8270_v7 }
  0x2c   : > { %7457 = vmatprep.subr.bf16.mxu0 %v8303_v24 }
  0x2d   : > { %7372 = vmatpush3.bf16.msra.mxu1 %v8284_v19  ;;  %v8288_v19 = vld [vmem:[%s9942_s26 + $0x8] sm:$0xff]  }
  0x2e   : > { %7346 = vmatmul.mubr.msk.bf16.vlgmr.msra.gmra.mrb[0].mxu0 %vm880_vm0, %v8272_v8  ;;  %7373 = vmatprep.subr.bf16.mxu1 %v8285_v21 }
  0x2f   : > { %7349 = vmatprep.mubr.msk.bf16.mxu0 %vm880_vm0, %v8273_v9  ;;  %7458 = vmatpush3.bf16.msra.mxu0 %v8303_v24 }
  0x30   : > { %7459 = vmatprep.subr.bf16.mxu0 %v8304_v25 }
  0x31   : > { %7374 = vmatpush3.bf16.msra.mxu1 %v8285_v21 }
  0x32   : > { %7375 = vmatprep.subr.bf16.mxu1 %v8286_v22 }
  0x33   : > { %7460 = vmatpush3.bf16.msra.mxu0 %v8304_v25 }
  0x35   : > { %7376 = vmatpush3.bf16.msra.mxu1 %v8286_v22 }
  0x36   : > { %7350 = vmatmul.mubr.msk.bf16.gmra.mrb[4].mxu0 %vm880_vm0, %v8274_v10  ;;  %7393 = vmatprep.subr.bf16.mxu1 %v8803_v23 }
  0x37   : > { %7353 = vmatprep.mubr.msk.bf16.mxu0 %vm880_vm0, %v8275_v11 }
  0x3e   : > { %7354 = vmatmul.mubr.msk.bf16.gmra.mrb[8].mxu0 %vm880_vm0, %v8276_v12 }
  0x3f   : > { %7357 = vmatprep.mubr.msk.bf16.mxu0 %vm880_vm0, %v8277_v13 }
  0x46   : > { %7358 = vmatmul.mubr.msk.bf16.gmra.mrb[12].mxu0 %vm880_vm0, %v8278_v14 }
 0x101   : > { %v7347_v27 = vpop.f32.mrb[0].mxu0 }
 0x102   : > { %v948_v28 = vadd.f32 %v7347_v27, %v8815_v26  ;;  %v939_v29 = vpop.f32.mrb[1].mxu0 }
 0x103   : > { %v940_v30 = vadd.f32 %v8815_v26, %v939_v29  ;;  %v7348_v31 = vpop.f32.mrb[2].mxu0 }
 0x104   : > { %v951_v32 = vadd.f32 %v7348_v31, %v8815_v26  ;;  %v942_v33 = vpop.f32.mrb[3].mxu0  ;;  %v1004_v35 = vmax.f32 %v948_v28, 0.0 }
 0x105   : > { %v943_v34 = vadd.f32 %v8815_v26, %v942_v33  ;;  %v1002_v37 = vmax.f32 %v940_v30, 0.0  ;;  %v8289_v33 = vld [vmem:[%s9942_s26 + $0x10] sm:$0xff]  }
 0x106   : > { %v1005_v36 = vmax.f32 %v951_v32, 0.0 }
 0x107   : > { %v1003_v38 = vmax.f32 %v943_v34, 0.0 }
 0x108   : > { %v1021_v39 = vpack.c.bf16 %v1005_v36, %v1004_v35 }
 0x109   : > { %v1020_v40 = vpack.c.bf16 %v1003_v38, %v1002_v37  ;;  %v7351_v41 = vpop.f32.mrb[4].mxu0 }
 0x10a   : > { %v1038_v42 = vrot.slane %v1021_v39, 4  ;;  %v964_v43 = vadd.f32 %v7351_v41, %v8815_v26  ;;  %v955_v44 = vpop.f32.mrb[5].mxu0 }
 0x10b   : > { %v1037_v45 = vrot.slane %v1020_v40, 4  ;;  %v956_v46 = vadd.f32 %v8815_v26, %v955_v44  ;;  %v7352_v47 = vpop.f32.mrb[6].mxu0 }
 0x10c   : > { %v967_v48 = vadd.f32 %v7352_v47, %v8815_v26  ;;  %v958_v49 = vpop.f32.mrb[7].mxu0  ;;  %v1008_v52 = vmax.f32 %v964_v43, 0.0 }
 0x10d   : > { %v8825_v50 = vsel %vm1036_vm1, %v1037_v45, %v1038_v42  ;;  %1061 = vst [vmem:[#allocation2] sm:$0xf0] %v1037_v45  ;;  %v959_v51 = vadd.f32 %v8815_v26, %v958_v49  ;;  %v1006_v54 = vmax.f32 %v956_v46, 0.0  ;;  %v8290_v45 = vld [vmem:[%s9942_s26 + $0x18] sm:$0xff]  }
 0x10e   : > { %v1009_v53 = vmax.f32 %v967_v48, 0.0  ;;  %v1130_v4 = vrot.slane %v8825_v50, 4  ;;  %v8291_v48 = vld [vmem:[%s9942_s26 + $0x20] sm:$0xff]  }
 0x10f   : > { %v1007_v55 = vmax.f32 %v959_v51, 0.0 }
 0x110   : > { %v1023_v56 = vpack.c.bf16 %v1009_v53, %v1008_v52 }
 0x111   : > { %v1022_v57 = vpack.c.bf16 %v1007_v55, %v1006_v54  ;;  %v7355_v58 = vpop.f32.mrb[8].mxu0 }
 0x112   : > { %v1042_v59 = vrot.slane %v1023_v56, 4  ;;  %v980_v60 = vadd.f32 %v7355_v58, %v8815_v26  ;;  %v971_v61 = vpop.f32.mrb[9].mxu0  ;;  %v8292_v56 = vld [vmem:[%s9942_s26 + $0x28] sm:$0xff]   ;;  %v8293_v58 = vld [vmem:[%s9942_s26 + $0x30] sm:$0xff]  }
 0x113   : > { %v1040_v62 = vrot.slane %v1022_v57, 4  ;;  %v972_v63 = vadd.f32 %v8815_v26, %v971_v61  ;;  %v7356_v0 = vpop.f32.mrb[10].mxu0 }
 0x114   : > { %v983_v1 = vadd.f32 %v7356_v0, %v8815_v26  ;;  %v974_v2 = vpop.f32.mrb[11].mxu0  ;;  %v1094_v3 = vld [vmem:[#allocation2] sm:$0xf0]  ;;  %v1012_v7 = vmax.f32 %v980_v60, 0.0  ;;  %v8294_v60 = vld [vmem:[%s9942_s26 + $0x38] sm:$0xff]   ;;  %v8296_v0 = vld [vmem:[%s9942_s26 + $0x88] sm:$0xff]  }
 0x115   : > { %v8833_v5 = vsel %vm1036_vm1, %v1038_v42, %v1040_v62  ;;  %v8836_v6 = vsel %vm1036_vm1, %v1040_v62, %v1042_v59  ;;  %v975_v8 = vadd.f32 %v8815_v26, %v974_v2  ;;  %v1129_v10 = vrot.slane %v1094_v3, 4  ;;  %v1070_v62 = vld [vmem:[#allocation2] sm:$0xff]  ;;  %v8298_v2 = vld [vmem:[%s9942_s26 + $0x98] sm:$0xff]  }
 0x116   : > { %v1013_v9 = vmax.f32 %v983_v1, 0.0  ;;  %v1132_v11 = vrot.slane %v8833_v5, 4  ;;  %v1134_v12 = vrot.slane %v8836_v6, 4  ;;  %v1010_v13 = vmax.f32 %v972_v63, 0.0  ;;  %v8295_v63 = vld [vmem:[%s9942_s26 + $0x80] sm:$0xff]   ;;  %v8297_v1 = vld [vmem:[%s9942_s26 + $0x90] sm:$0xff]  }
 0x117   : > { %v1011_v14 = vmax.f32 %v975_v8, 0.0  ;;  %v1131_v16 = vsel %vm1036_vm1, %v1129_v10, %v1130_v4  ;;  %v8299_v3 = vld [vmem:[%s9942_s26 + $0xa0] sm:$0xff]   ;;  %v8302_v8 = vld [vmem:[%s9942_s26 + $0xb8] sm:$0xff]   ;;  %v8305_v10 = vld [vmem:[%s9943_s3 + $0x50] sm:$0xff]  }
 0x118   : > { %v1025_v15 = vpack.c.bf16 %v1013_v9, %v1012_v7  ;;  %v1133_v17 = vsel %vm1036_vm1, %v1130_v4, %v1132_v11  ;;  %v1135_v18 = vsel %vm1036_vm1, %v1132_v11, %v1134_v12  ;;  %7377 = vmatprep.mubr.bf16.mxu1 %v1131_v16  ;;  %v8300_v4 = vld [vmem:[%s9942_s26 + $0xa8] sm:$0xff]   ;;  %v8301_v7 = vld [vmem:[%s9942_s26 + $0xb0] sm:$0xff]   ;;  %7461 = vmatprep.subr.bf16.mxu0 %v8305_v10 }
 0x119   : > { %v1024_v21 = vpack.c.bf16 %v1011_v14, %v1010_v13  ;;  %v7359_v22 = vpop.f32.mrb[12].mxu0  ;;  %7378 = vmatmul.mubr.bf16.vlgmr.msra.gmra.mrb[0].mxu1 %v1133_v17  ;;  %7462 = vmatpush3.bf16.msra.mxu0 %v8305_v10  ;;  %v8309_v11 = vld [vmem:[%s9943_s3 + $0x70] sm:$0xff]   ;;  %v8312_v13 = vld [vmem:[%s9943_s3] sm:$0xff]  }
 0x11a   : > { %v1046_v24 = vrot.slane %v1025_v15, 4  ;;  %v996_v25 = vadd.f32 %v7359_v22, %v8815_v26  ;;  %v987_v27 = vpop.f32.mrb[13].mxu0  ;;  %7394 = vmatpush3.bf16.msra.mxu1 %v8803_v23  ;;  %7381 = vmatprep.mubr.bf16.mxu1 %v1135_v18  ;;  %v8339_v14 = vld [vmem:[%s9945_s4 + $0x40] sm:$0xff]  }
 0x11b   : > { %v1044_v28 = vrot.slane %v1024_v21, 4  ;;  %v988_v29 = vadd.f32 %v8815_v26, %v987_v27  ;;  %v7360_v30 = vpop.f32.mrb[14].mxu0  ;;  %7395 = vmatprep.subr.bf16.mxu1 %v8288_v19  ;;  %v8946_v15 = vld [vmem:[%s9946_s5] ss:$0 sm:$0xff] }
 0x11c   : > { %v999_v31 = vadd.f32 %v7360_v30, %v8815_v26  ;;  %v990_v32 = vpop.f32.mrb[15].mxu0  ;;  %v1016_v37 = vmax.f32 %v996_v25, 0.0 }
 0x11d   : > { %v8855_v34 = vsel %vm1036_vm1, %v1042_v59, %v1044_v28  ;;  %v8858_v35 = vsel %vm1036_vm1, %v1044_v28, %v1046_v24  ;;  %v991_v36 = vadd.f32 %v8815_v26, %v990_v32  ;;  %v1014_v40 = vmax.f32 %v988_v29, 0.0 }
 0x11e   : > { %v1017_v38 = vmax.f32 %v999_v31, 0.0  ;;  %v1136_v23 = vrot.slane %v8855_v34, 4  ;;  %v1138_v39 = vrot.slane %v8858_v35, 4  ;;  %7396 = vmatpush3.bf16.msra.mxu1 %v8288_v19 }
 0x11f   : > { %v1015_v41 = vmax.f32 %v991_v36, 0.0  ;;  %7397 = vmatprep.subr.bf16.mxu1 %v8289_v33 }
 0x120   : > { %v1027_v42 = vpack.c.bf16 %v1017_v38, %v1016_v37  ;;  %v1137_v43 = vsel %vm1036_vm1, %v1134_v12, %v1136_v23  ;;  %v1139_v44 = vsel %vm1036_vm1, %v1136_v23, %v1138_v39  ;;  %v8311_v12 = vld [vmem:[%s9943_s3 + $0x78] sm:$0xff]  }
 0x121   : > { %v1026_v26 = vpack.c.bf16 %v1015_v41, %v1014_v40  ;;  %7382 = vmatmul.mubr.bf16.gmra.mrb[4].mxu1 %v1137_v43 }
 0x122   : > { %v1050_v46 = vrot.slane %v1027_v42, 4  ;;  %7398 = vmatpush3.bf16.msra.mxu1 %v8289_v33  ;;  %7385 = vmatprep.mubr.bf16.mxu1 %v1139_v44 }
 0x123   : > { %v1048_v47 = vrot.slane %v1026_v26, 4  ;;  %7399 = vmatprep.subr.bf16.mxu1 %v8290_v45 }
 0x124   : > { %1069 = vst [vmem:[#allocation2 + $0x40] sm:$0xf] %v1050_v46 }
 0x125   : > { %v1049_v49 = vsel %vm1036_vm1, %v1046_v24, %v1048_v47  ;;  %v1051_v51 = vsel %vm1036_vm1, %v1048_v47, %v1050_v46 }
 0x126   : > { %v1140_v52 = vrot.slane %v1049_v49, 4  ;;  %v1142_v53 = vrot.slane %v1051_v51, 4  ;;  %7400 = vmatpush3.bf16.msra.mxu1 %v8290_v45 }
 0x127   : > { %7401 = vmatprep.subr.bf16.mxu1 %v8291_v48 }
 0x128   : > { %v1141_v54 = vsel %vm1036_vm1, %v1138_v39, %v1140_v52  ;;  %v1143_v55 = vsel %vm1036_vm1, %v1140_v52, %v1142_v53 }
 0x129   : > { %7386 = vmatmul.mubr.bf16.gmra.mrb[8].mxu1 %v1141_v54 }
 0x12a   : > { %7402 = vmatpush3.bf16.msra.mxu1 %v8291_v48  ;;  %7389 = vmatprep.mubr.bf16.mxu1 %v1143_v55 }
 0x12b   : > { %v1102_v57 = vld [vmem:[#allocation2 + $0x40] sm:$0xf]  ;;  %7403 = vmatprep.subr.bf16.mxu1 %v8292_v56 }
 0x12c   : > { %v1144_v59 = vrot.slane %v1102_v57, 4  ;;  %v1444_v9 = vld [vmem:[#allocation2 + $0x40] sm:$0xff] }
 0x12e   : > { %7404 = vmatpush3.bf16.msra.mxu1 %v8292_v56  ;;  %v1145_v61 = vsel %vm1036_vm1, %v1142_v53, %v1144_v59 }
 0x12f   : > { %7405 = vmatprep.subr.bf16.mxu1 %v8293_v58 }
 0x131   : > { %7390 = vmatmul.mubr.bf16.gmra.mrb[12].mxu1 %v1145_v61 }
 0x132   : > { %7406 = vmatpush3.bf16.msra.mxu1 %v8293_v58  ;;  %7409 = vmatprep.mubr.bf16.mxu1 %v1070_v62  ;;  %v8314_v58 = vld [vmem:[%s9943_s3 + $0x8] sm:$0xff]  }
 0x133   : > { %7407 = vmatprep.subr.bf16.mxu1 %v8294_v60 }
 0x136   : > { %7408 = vmatpush3.bf16.msra.mxu1 %v8294_v60 }
 0x137   : > { %7425 = vmatprep.subr.bf16.mxu1 %v8295_v63 }
 0x139   : > { %7410 = vmatmul.mubr.bf16.vlgmr.msra.gmra.mrb[0].mxu1 %v8825_v50 }
 0x13a   : > { %7426 = vmatpush3.bf16.msra.mxu1 %v8295_v63  ;;  %7413 = vmatprep.mubr.bf16.mxu1 %v8833_v5 }
 0x13b   : > { %7427 = vmatprep.subr.bf16.mxu1 %v8296_v0 }
 0x13e   : > { %7428 = vmatpush3.bf16.msra.mxu1 %v8296_v0 }
 0x13f   : > { %7429 = vmatprep.subr.bf16.mxu1 %v8297_v1 }
 0x141   : > { %7414 = vmatmul.mubr.bf16.gmra.mrb[4].mxu1 %v8836_v6 }
 0x142   : > { %7430 = vmatpush3.bf16.msra.mxu1 %v8297_v1  ;;  %7417 = vmatprep.mubr.bf16.mxu1 %v8855_v34 }
 0x143   : > { %7431 = vmatprep.subr.bf16.mxu1 %v8298_v2 }
 0x146   : > { %7432 = vmatpush3.bf16.msra.mxu1 %v8298_v2 }
 0x147   : > { %7433 = vmatprep.subr.bf16.mxu1 %v8299_v3 }
 0x149   : > { %7418 = vmatmul.mubr.bf16.gmra.mrb[8].mxu1 %v8858_v35 }
 0x14a   : > { %7434 = vmatpush3.bf16.msra.mxu1 %v8299_v3  ;;  %7421 = vmatprep.mubr.bf16.mxu1 %v1049_v49 }
 0x14b   : > { %7435 = vmatprep.subr.bf16.mxu1 %v8300_v4 }
 0x14e   : > { %7436 = vmatpush3.bf16.msra.mxu1 %v8300_v4 }
 0x14f   : > { %7437 = vmatprep.subr.bf16.mxu1 %v8301_v7 }
 0x151   : > { %7422 = vmatmul.mubr.bf16.gmra.mrb[12].mxu1 %v1051_v51 }
 0x152   : > { %7438 = vmatpush3.bf16.msra.mxu1 %v8301_v7  ;;  %7441 = vmatprep.mubr.bf16.mxu1 %v8825_v50  ;;  %v8306_v50 = vld [vmem:[%s9943_s3 + $0x58] sm:$0xff]  }
 0x153   : > { %7439 = vmatprep.subr.bf16.mxu1 %v8302_v8  ;;  %7463 = vmatprep.subr.bf16.mxu0 %v8306_v50 }
 0x154   : > { %7464 = vmatpush3.bf16.msra.mxu0 %v8306_v50 }
 0x156   : > { %7440 = vmatpush3.bf16.msra.mxu1 %v8302_v8  ;;  %v8315_v8 = vld [vmem:[%s9943_s3 + $0x10] sm:$0xff]  }
 0x157   : > { %7529 = vmatprep.subr.bf16.mxu1 %v8339_v14 }
 0x159   : > { %7442 = vmatmul.mubr.bf16.vlgmr.msra.gmra.mrb[0].mxu1 %v8833_v5  ;;  %v8307_v5 = vld [vmem:[%s9943_s3 + $0x60] sm:$0xff]  }
 0x15a   : > { %7445 = vmatprep.mubr.bf16.mxu1 %v8836_v6  ;;  %7465 = vmatprep.subr.bf16.mxu0 %v8307_v5  ;;  %v8308_v6 = vld [vmem:[%s9943_s3 + $0x68] sm:$0xff]  }
 0x15b   : > { %7466 = vmatpush3.bf16.msra.mxu0 %v8307_v5  ;;  %7530 = vmatpush3.bf16.msra.mxu1 %v8339_v14 }
 0x15c   : > { %7467 = vmatprep.subr.bf16.mxu0 %v8308_v6 }
 0x15f   : > { %7468 = vmatpush3.bf16.msra.mxu0 %v8308_v6 }
 0x160   : > { %7469 = vmatprep.subr.bf16.mxu0 %v8309_v11 }
 0x161   : > { %7446 = vmatmul.mubr.bf16.gmra.mrb[4].mxu1 %v8855_v34 }
 0x162   : > { %7449 = vmatprep.mubr.bf16.mxu1 %v8858_v35 }
 0x163   : > { %7470 = vmatpush3.bf16.msra.mxu0 %v8309_v11 }
 0x164   : > { %7471 = vmatprep.subr.bf16.mxu0 %v8311_v12 }
 0x167   : > { %7472 = vmatpush3.bf16.msra.mxu0 %v8311_v12  ;;  %v8317_v12 = vld [vmem:[%s9943_s3 + $0x18] sm:$0xff]  }
 0x168   : > { %7481 = vmatprep.subr.bf16.mxu0 %v8312_v13 }
 0x169   : > { %7450 = vmatmul.mubr.bf16.gmra.mrb[8].mxu1 %v1049_v49 }
 0x16a   : > { %7453 = vmatprep.mubr.bf16.mxu1 %v1051_v51 }
 0x171   : > { %7454 = vmatmul.mubr.bf16.gmra.mrb[12].mxu1 %v1444_v9 }
 0x22c   : > { %v7443_v16 = vpop.f32.mrb[0].mxu1 }
 0x22d   : > { %v1632_v17 = vadd.f32 %v7443_v16, %v8946_v15  ;;  %v1544_v18 = vpop.f32.mrb[1].mxu1 }
 0x22e   : > { %v1630_v19 = vadd.f32 %v8946_v15, %v1544_v18  ;;  %v7444_v21 = vpop.f32.mrb[2].mxu1 }
 0x22f   : > { %v1648_v22 = vmax.f32 %v1632_v17, 0.0  ;;  %v1547_v24 = vpop.f32.mrb[3].mxu1  ;;  %v1633_v34 = vadd.f32 %v7444_v21, %v8946_v15  ;;  %v8321_v17 = vld [vmem:[%s9943_s3 + $0x28] sm:$0xff]   ;;  %v8322_v21 = vld [vmem:[%s9943_s3 + $0x30] sm:$0xff]  }
 0x230   : > { %v1646_v25 = vmax.f32 %v1630_v19, 0.0  ;;  %v1631_v27 = vadd.f32 %v8946_v15, %v1547_v24  ;;  %v8325_v24 = vld [vmem:[%s9943_s3 + $0x80] sm:$0xff]  }
 0x231   : > { %v1649_v40 = vmax.f32 %v1633_v34, 0.0  ;;  %v8333_v34 = vld [vmem:[%s9943_s3 + $0xa8] sm:$0xff]  }
 0x232   : > { %v6892_v28 = vpack.c.bf16 %v1648_v22, %v1646_v25  ;;  %v1647_v29 = vmax.f32 %v1631_v27, 0.0  ;;  %v8323_v22 = vld [vmem:[%s9943_s3 + $0x38] sm:$0xff]   ;;  %v8327_v27 = vld [vmem:[%s9943_s3 + $0x88] sm:$0xff]  }
 0x234   : > { %6893 = vst [vmem:[#allocation4] sm:$0xff] %v6892_v28   ;;  %v1666_v30 = vpack.c.bf16 %v1647_v29, %v1647_v29  ;;  %v7447_v31 = vpop.f32.mrb[4].mxu1  ;;  %v8329_v29 = vld [vmem:[%s9943_s3 + $0x90] sm:$0xff]  }
 0x235   : > { %v1636_v32 = vadd.f32 %v7447_v31, %v8946_v15  ;;  %v1560_v33 = vpop.f32.mrb[5].mxu1  ;;  %v8331_v31 = vld [vmem:[%s9943_s3 + $0x98] sm:$0xff]  }
 0x236   : > { %1667 = vst [vmem:[#allocation3 + $0x4] sm:$0xf] %v1666_v30  ;;  %v1634_v35 = vadd.f32 %v8946_v15, %v1560_v33  ;;  %v7448_v36 = vpop.f32.mrb[6].mxu1  ;;  %v8332_v33 = vld [vmem:[%s9943_s3 + $0xa0] sm:$0xff]  }
 0x237   : > { %v1652_v37 = vmax.f32 %v1636_v32, 0.0  ;;  %v1563_v38 = vpop.f32.mrb[7].mxu1  ;;  %v1637_v47 = vadd.f32 %v7448_v36, %v8946_v15  ;;  %v8335_v36 = vld [vmem:[%s9943_s3 + $0xb8] sm:$0xff]  }
 0x238   : > { %v1650_v23 = vmax.f32 %v1634_v35, 0.0  ;;  %v1635_v39 = vadd.f32 %v8946_v15, %v1563_v38  ;;  %v8334_v35 = vld [vmem:[%s9943_s3 + $0xb0] sm:$0xff]  }
 0x239   : > { %v1653_v55 = vmax.f32 %v1637_v47, 0.0  ;;  %v8364_v47 = vld [vmem:[%s9947_s8 + $0x48] sm:$0xff]  }
 0x23a   : > { %v6902_v41 = vpack.c.bf16 %v1652_v37, %v1650_v23  ;;  %v1651_v42 = vmax.f32 %v1635_v39, 0.0  ;;  %v8340_v39 = vld [vmem:[%s9945_s4 + $0x48] sm:$0xff]  }
 0x23b   : > { %v8310_v43 = vld [vmem:[#allocation4] sm:$0xff]   ;;  %7531 = vmatprep.subr.bf16.mxu1 %v8340_v39 }
 0x23c   : > { %6980 = vst [vmem:[#allocation4 + $0x8] sm:$0xff] %v6902_v41   ;;  %v6897_v44 = vpack.c.bf16 %v1651_v42, %v1649_v40  ;;  %v7451_v45 = vpop.f32.mrb[8].mxu1  ;;  %7473 = vmatprep.mubr.bf16.mxu0 %v8310_v43  ;;  %7532 = vmatpush3.bf16.msra.mxu1 %v8340_v39  ;;  %v8341_v40 = vld [vmem:[%s9945_s4 + $0x50] sm:$0xff]   ;;  %v8342_v41 = vld [vmem:[%s9945_s4 + $0x58] sm:$0xff]   ;;  %v8343_v42 = vld [vmem:[%s9945_s4 + $0x60] sm:$0xff]  }
 0x23d   : > { %v1640_v26 = vadd.f32 %v7451_v45, %v8946_v15  ;;  %v1576_v46 = vpop.f32.mrb[9].mxu1  ;;  %v8320_v19 = vld [vmem:[#allocation3] sm:$0xff]   ;;  %7533 = vmatprep.subr.bf16.mxu1 %v8341_v40  ;;  %v8346_v45 = vld [vmem:[%s9945_s4 + $0x78] sm:$0xff]   ;;  %v8353_v39 = vld [vmem:[%s9945_s4 + $0x30] sm:$0xff]  }
 0x23e   : > { %6979 = vst [vmem:[#allocation3 + $0x8] sm:$0xff] %v6897_v44   ;;  %v1638_v48 = vadd.f32 %v8946_v15, %v1576_v46  ;;  %v7452_v49 = vpop.f32.mrb[10].mxu1  ;;  %v8344_v43 = vld [vmem:[%s9945_s4 + $0x68] sm:$0xff]   ;;  %v8345_v44 = vld [vmem:[%s9945_s4 + $0x70] sm:$0xff]   ;;  %v8363_v46 = vld [vmem:[%s9947_s8 + $0x40] sm:$0xff]  }
 0x23f   : > { %v1656_v51 = vmax.f32 %v1640_v26, 0.0  ;;  %v1579_v52 = vpop.f32.mrb[11].mxu1  ;;  %v1641_v0 = vadd.f32 %v7452_v49, %v8946_v15  ;;  %v8347_v26 = vld [vmem:[%s9945_s4] sm:$0xff]  }
 0x240   : > { %v1654_v53 = vmax.f32 %v1638_v48, 0.0  ;;  %v1639_v54 = vadd.f32 %v8946_v15, %v1579_v52  ;;  %7534 = vmatpush3.bf16.msra.mxu1 %v8341_v40  ;;  %v6431_v48 = vld [vmem:[%s9948_s9] ss:$0 sm:$0xff]  ;;  %v8354_v40 = vld [vmem:[%s9945_s4 + $0x38] sm:$0xff]  }
 0x241   : > { %v1657_v5 = vmax.f32 %v1641_v0, 0.0  ;;  %7535 = vmatprep.subr.bf16.mxu1 %v8342_v41 }
 0x242   : > { %v6912_v56 = vpack.c.bf16 %v1656_v51, %v1654_v53  ;;  %v1655_v57 = vmax.f32 %v1639_v54, 0.0 }
 0x243   : > { %v8313_v59 = vld [vmem:[#allocation4 + $0x8] sm:$0xff]  }
 0x244   : > { %6982 = vst [vmem:[#allocation4 + $0x10] sm:$0xff] %v6912_v56   ;;  %v6907_v60 = vpack.c.bf16 %v1655_v57, %v1653_v55  ;;  %v7455_v61 = vpop.f32.mrb[12].mxu1  ;;  %7474 = vmatmul.mubr.bf16.vlgmr.msra.gmra.mrb[16].mxu0 %v8313_v59  ;;  %7536 = vmatpush3.bf16.msra.mxu1 %v8342_v41  ;;  %v8355_v41 = vld [vmem:[%s9945_s4 + $0x80] sm:$0xff]  }
 0x245   : > { %v1644_v62 = vadd.f32 %v7455_v61, %v8946_v15  ;;  %v1592_v63 = vpop.f32.mrb[13].mxu1  ;;  %7482 = vmatpush3.bf16.msra.mxu0 %v8312_v13  ;;  %v8324_v25 = vld [vmem:[#allocation3 + $0x8] sm:$0xff]   ;;  %7537 = vmatprep.subr.bf16.mxu1 %v8343_v42 }
 0x246   : > { %6981 = vst [vmem:[#allocation3 + $0x10] sm:$0xff] %v6907_v60   ;;  %v1642_v1 = vadd.f32 %v8946_v15, %v1592_v63  ;;  %v7456_v2 = vpop.f32.mrb[14].mxu1  ;;  %7483 = vmatprep.subr.bf16.mxu0 %v8314_v58  ;;  %v8330_v32 = vld [vmem:[#allocation3 + $0x4] sm:$0xff]  }
 0x247   : > { %v1660_v3 = vmax.f32 %v1644_v62, 0.0  ;;  %v1645_v4 = vadd.f32 %v7456_v2, %v8946_v15  ;;  %v1595_v7 = vpop.f32.mrb[15].mxu1 }
 0x248   : > { %v1658_v9 = vmax.f32 %v1642_v1, 0.0  ;;  %v1643_v10 = vadd.f32 %v8946_v15, %v1595_v7  ;;  %v8318_v15 = vld [vmem:[%s9943_s3 + $0x20] sm:$0xff]   ;;  %7538 = vmatpush3.bf16.msra.mxu1 %v8343_v42  ;;  %v8356_v42 = vld [vmem:[%s9945_s4 + $0x88] sm:$0xff]  }
 0x249   : > { %v1661_v50 = vmax.f32 %v1645_v4, 0.0  ;;  %7484 = vmatpush3.bf16.msra.mxu0 %v8314_v58  ;;  %7539 = vmatprep.subr.bf16.mxu1 %v8344_v43 }
 0x24a   : > { %v6922_v6 = vpack.c.bf16 %v1660_v3, %v1658_v9  ;;  %v1659_v11 = vmax.f32 %v1643_v10, 0.0  ;;  %7485 = vmatprep.subr.bf16.mxu0 %v8315_v8 }
 0x24b   : > { %v1694_v13 = vpack.c.bf16 %v1661_v50, %v1661_v50  ;;  %v8316_v14 = vld [vmem:[#allocation4 + $0x10] sm:$0xff]  }
 0x24c   : > { %6984 = vst [vmem:[#allocation4 + $0x18] sm:$0xff] %v6922_v6   ;;  %v6917_v16 = vpack.c.bf16 %v1659_v11, %v1657_v5  ;;  %7477 = vmatprep.mubr.bf16.mxu0 %v8316_v14  ;;  %7540 = vmatpush3.bf16.msra.mxu1 %v8344_v43  ;;  %v8357_v43 = vld [vmem:[%s9945_s4 + $0x90] sm:$0xff]  }
 0x24d   : > { %1695 = vst [vmem:[#allocation3 + $0x20] sm:$0xf] %v1694_v13  ;;  %7486 = vmatpush3.bf16.msra.mxu0 %v8315_v8  ;;  %v8326_v28 = vld [vmem:[#allocation3 + $0x10] sm:$0xff]   ;;  %7541 = vmatprep.subr.bf16.mxu1 %v8345_v44 }
 0x24e   : > { %6983 = vst [vmem:[#allocation3 + $0x18] sm:$0xff] %v6917_v16   ;;  %7487 = vmatprep.subr.bf16.mxu0 %v8317_v12  ;;  %v8336_v37 = vld [vmem:[#allocation3 + $0xc] sm:$0xff]  }
 0x250   : > { %7542 = vmatpush3.bf16.msra.mxu1 %v8345_v44  ;;  %v8358_v44 = vld [vmem:[%s9945_s4 + $0x98] sm:$0xff]  }
 0x251   : > { %7488 = vmatpush3.bf16.msra.mxu0 %v8317_v12  ;;  %7543 = vmatprep.subr.bf16.mxu1 %v8346_v45 }
 0x252   : > { %7489 = vmatprep.subr.bf16.mxu0 %v8318_v15 }
 0x253   : > { %v8319_v18 = vld [vmem:[#allocation4 + $0x18] sm:$0xff]  }
 0x254   : > { %7478 = vmatmul.mubr.bf16.gmra.mrb[20].mxu0 %v8319_v18  ;;  %7544 = vmatpush3.bf16.msra.mxu1 %v8346_v45  ;;  %v8359_v45 = vld [vmem:[%s9945_s4 + $0xa0] sm:$0xff]  }
 0x255   : > { %7490 = vmatpush3.bf16.msra.mxu0 %v8318_v15  ;;  %7497 = vmatprep.mubr.bf16.mxu0 %v8320_v19  ;;  %v8328_v30 = vld [vmem:[#allocation3 + $0x18] sm:$0xff]  }
 0x256   : > { %7491 = vmatprep.subr.bf16.mxu0 %v8321_v17  ;;  %v8337_v38 = vld [vmem:[#allocation3 + $0x14] sm:$0xff]   ;;  %v8338_v23 = vld [vmem:[#allocation3 + $0x1c] sm:$0xff]   ;;  %7553 = vmatprep.subr.bf16.mxu1 %v8347_v26 }
 0x259   : > { %7492 = vmatpush3.bf16.msra.mxu0 %v8321_v17 }
 0x25a   : > { %7493 = vmatprep.subr.bf16.mxu0 %v8322_v21 }
 0x25d   : > { %7494 = vmatpush3.bf16.msra.mxu0 %v8322_v21 }
 0x25e   : > { %7495 = vmatprep.subr.bf16.mxu0 %v8323_v22 }
 0x261   : > { %7496 = vmatpush3.bf16.msra.mxu0 %v8323_v22 }
 0x262   : > { %7505 = vmatprep.subr.bf16.mxu0 %v8325_v24 }
 0x264   : > { %7498 = vmatmul.mubr.bf16.vlgmr.msra.gmra.mrb[16].mxu0 %v8324_v25 }
 0x265   : > { %7501 = vmatprep.mubr.bf16.mxu0 %v8326_v28  ;;  %7506 = vmatpush3.bf16.msra.mxu0 %v8325_v24 }
 0x266   : > { %7507 = vmatprep.subr.bf16.mxu0 %v8327_v27 }
 0x269   : > { %7508 = vmatpush3.bf16.msra.mxu0 %v8327_v27 }
 0x26a   : > { %7509 = vmatprep.subr.bf16.mxu0 %v8329_v29 }
 0x26c   : > { %7502 = vmatmul.mubr.bf16.gmra.mrb[20].mxu0 %v8328_v30 }
 0x26d   : > { %7510 = vmatpush3.bf16.msra.mxu0 %v8329_v29  ;;  %7521 = vmatprep.mubr.bf16.mxu0 %v8330_v32  ;;  %v8348_v29 = vld [vmem:[%s9945_s4 + $0x8] sm:$0xff]   ;;  %v8349_v32 = vld [vmem:[%s9945_s4 + $0x10] sm:$0xff]  }
 0x26e   : > { %7511 = vmatprep.subr.bf16.mxu0 %v8331_v31 }
 0x271   : > { %7512 = vmatpush3.bf16.msra.mxu0 %v8331_v31 }
 0x272   : > { %7513 = vmatprep.subr.bf16.mxu0 %v8332_v33 }
 0x275   : > { %7514 = vmatpush3.bf16.msra.mxu0 %v8332_v33 }
 0x276   : > { %7515 = vmatprep.subr.bf16.mxu0 %v8333_v34 }
 0x279   : > { %7516 = vmatpush3.bf16.msra.mxu0 %v8333_v34 }
 0x27a   : > { %7517 = vmatprep.subr.bf16.mxu0 %v8334_v35 }
 0x27d   : > { %7518 = vmatpush3.bf16.msra.mxu0 %v8334_v35  ;;  %v8350_v35 = vld [vmem:[%s9945_s4 + $0x18] sm:$0xff]  }
 0x27e   : > { %7519 = vmatprep.subr.bf16.mxu0 %v8335_v36 }
 0x281   : > { %7520 = vmatpush3.bf16.msra.mxu0 %v8335_v36 }
 0x282   : > { %7601 = vmatprep.subr.bf16.mxu0 %v8363_v46 }
 0x284   : > { %7522 = vmatmul.mubr.bf16.vlgmr.msra.gmra.mrb[16].mxu0 %v8336_v37 }
 0x285   : > { %7525 = vmatprep.mubr.bf16.mxu0 %v8337_v38  ;;  %7602 = vmatpush3.bf16.msra.mxu0 %v8363_v46  ;;  %v8351_v38 = vld [vmem:[%s9945_s4 + $0x20] sm:$0xff]   ;;  %v8361_v46 = vld [vmem:[%s9945_s4 + $0xb0] sm:$0xff]  }
 0x286   : > { %7603 = vmatprep.subr.bf16.mxu0 %v8364_v47 }
 0x289   : > { %7604 = vmatpush3.bf16.msra.mxu0 %v8364_v47  ;;  %v8362_v47 = vld [vmem:[%s9945_s4 + $0xb8] sm:$0xff]  }
 0x28c   : > { %7526 = vmatmul.mubr.bf16.gmra.mrb[20].mxu0 %v8338_v23  ;;  %v8352_v23 = vld [vmem:[%s9945_s4 + $0x28] sm:$0xff]  }
 0x357   : > { %v7523_v49 = vpop.f32.mrb[16].mxu0 }
 0x358   : > { %v2198_v51 = vadd.f32 %v7523_v49, %v6431_v48  ;;  %v2150_v52 = vpop.f32.mrb[17].mxu0  ;;  %v8365_v49 = vld [vmem:[%s9947_s8 + $0x50] sm:$0xff]  }
 0x359   : > { %v2196_v53 = vadd.f32 %v6431_v48, %v2150_v52  ;;  %v7524_v54 = vpop.f32.mrb[18].mxu0  ;;  %7605 = vmatprep.subr.bf16.mxu0 %v8365_v49  ;;  %v8367_v52 = vld [vmem:[%s9947_s8 + $0x60] sm:$0xff]  }
 0x35a   : > { %v2199_v55 = vadd.f32 %v7524_v54, %v6431_v48  ;;  %v2153_v56 = vpop.f32.mrb[19].mxu0  ;;  %v2206_v58 = vmax.f32 %v2198_v51, 0.0  ;;  %7606 = vmatpush3.bf16.msra.mxu0 %v8365_v49  ;;  %v8366_v51 = vld [vmem:[%s9947_s8 + $0x58] sm:$0xff]   ;;  %v8369_v54 = vld [vmem:[%s9947_s8 + $0x70] sm:$0xff]  }
 0x35b   : > { %v2197_v57 = vadd.f32 %v6431_v48, %v2153_v56  ;;  %v2204_v60 = vmax.f32 %v2196_v53, 0.0  ;;  %7607 = vmatprep.subr.bf16.mxu0 %v8366_v51  ;;  %v8368_v53 = vld [vmem:[%s9947_s8 + $0x68] sm:$0xff]   ;;  %v8372_v56 = vld [vmem:[%s9947_s8] sm:$0xff]   ;;  %v8391_v49 = vld [vmem:[%s9947_s8 + $0xb8] sm:$0xff]  }
 0x35c   : > { %v2207_v59 = vmax.f32 %v2199_v55, 0.0  ;;  %v8371_v55 = vld [vmem:[%s9947_s8 + $0x78] sm:$0xff]  }
 0x35d   : > { %v2205_v61 = vmax.f32 %v2197_v57, 0.0  ;;  %v8582_v57 = vmov 0.0|0.0  }
 0x35e   : > { %v2215_v62 = vpack.c.bf16 %v2207_v59, %v2206_v58  ;;  %7608 = vmatpush3.bf16.msra.mxu0 %v8366_v51  ;;  %v6552_v58 = vld [vmem:[%s9908_s11 + $0x40] sm:$0xff]  ;;  %v6553_v59 = vld [vmem:[%s9908_s11 + $0x48] sm:$0xff] }
 0x35f   : > { %v2214_v63 = vpack.c.bf16 %v2205_v61, %v2204_v60  ;;  %v7527_v0 = vpop.f32.mrb[20].mxu0  ;;  %7609 = vmatprep.subr.bf16.mxu0 %v8367_v52  ;;  %v8022_v60 = vpack.c.bf16 %v6553_v59, %v6552_v58  ;;  %v6554_v61 = vld [vmem:[%s9908_s11 + $0x50] sm:$0xff]  ;;  %v6562_v51 = vld [vmem:[%s9908_s11 + $0x80] sm:$0xff] }
 0x360   : > { %v2223_v1 = vrot.slane %v2215_v62, 4  ;;  %v2202_v2 = vadd.f32 %v7527_v0, %v6431_v48  ;;  %v2166_v3 = vpop.f32.mrb[21].mxu0  ;;  %v6555_v62 = vld [vmem:[%s9908_s11 + $0x58] sm:$0xff]  ;;  %v6488_v0 = vld [vmem:[%s9949_s2] ss:$0 sm:$0xff]  ;;  %s766_s2 = scalar_lea.vmem %s9922_s25, %s6282_s27 }
 0x361   : > { %v2222_v4 = vrot.slane %v2214_v63, 4  ;;  %v2200_v7 = vadd.f32 %v6431_v48, %v2166_v3  ;;  %v7528_v8 = vpop.f32.mrb[22].mxu0  ;;  %v8025_v63 = vpack.c.bf16 %v6555_v62, %v6554_v61  ;;  %v6566_v59 = vld [vmem:[%s9908_s11 + $0xa0] sm:$0xff] }
 0x362   : > { %v2203_v9 = vadd.f32 %v7528_v8, %v6431_v48  ;;  %v2169_v10 = vpop.f32.mrb[23].mxu0  ;;  %v2210_v6 = vmax.f32 %v2202_v2, 0.0  ;;  %7610 = vmatpush3.bf16.msra.mxu0 %v8367_v52  ;;  %v6563_v52 = vld [vmem:[%s9908_s11 + $0x88] sm:$0xff]  ;;  %v6556_v62 = vld [vmem:[%s9908_s11 + $0x60] sm:$0xff] }
 0x363   : > { %v9043_v50 = vsel %vm1036_vm1, %v2222_v4, %v2223_v1  ;;  %2234 = vst [vmem:[#allocation5] sm:$0xf0] %v2222_v4  ;;  %v2201_v5 = vadd.f32 %v6431_v48, %v2169_v10  ;;  %v2208_v12 = vmax.f32 %v2200_v7, 0.0  ;;  %7611 = vmatprep.subr.bf16.mxu0 %v8368_v53 }
 0x364   : > { %v2211_v11 = vmax.f32 %v2203_v9, 0.0  ;;  %v2287_v24 = vrot.slane %v9043_v50, 4 }
 0x365   : > { %v2209_v13 = vmax.f32 %v2201_v5, 0.0 }
 0x366   : > { %v2217_v14 = vpack.c.bf16 %v2211_v11, %v2210_v6  ;;  %7612 = vmatpush3.bf16.msra.mxu0 %v8368_v53  ;;  %v8046_v53 = vpack.c.bf16 %v6563_v52, %v6562_v51  ;;  %v3455_v52 = vld [vmem:[%s9910_s13 + $0x10] sm:$0xff] }
 0x367   : > { %v2216_v16 = vpack.c.bf16 %v2209_v13, %v2208_v12  ;;  %7613 = vmatprep.subr.bf16.mxu0 %v8369_v54 }
 0x368   : > { %v2227_v15 = vrot.slane %v2217_v14, 4 }
 0x369   : > { %v2225_v17 = vrot.slane %v2216_v16, 4 }
 0x36a   : > { %2238 = vst [vmem:[#allocation5 + $0x20] sm:$0xf] %v2227_v15  ;;  %v2259_v18 = vld [vmem:[#allocation5] sm:$0xf0]  ;;  %7614 = vmatpush3.bf16.msra.mxu0 %v8369_v54 }
 0x36b   : > { %v9046_v19 = vsel %vm1036_vm1, %v2223_v1, %v2225_v17  ;;  %v9049_v21 = vsel %vm1036_vm1, %v2225_v17, %v2227_v15  ;;  %v2286_v22 = vrot.slane %v2259_v18, 4  ;;  %v2239_v37 = vld [vmem:[#allocation5] sm:$0xff]  ;;  %7615 = vmatprep.subr.bf16.mxu0 %v8371_v55 }
 0x36c   : > { %v2289_v25 = vrot.slane %v9046_v19, 4  ;;  %v2291_v27 = vrot.slane %v9049_v21, 4 }
 0x36d   : > { %v2288_v28 = vsel %vm1036_vm1, %v2286_v22, %v2287_v24 }
 0x36e   : > { %7545 = vmatprep.mubr.bf16.mxu1 %v2288_v28  ;;  %v2290_v30 = vsel %vm1036_vm1, %v2287_v24, %v2289_v25  ;;  %v2292_v31 = vsel %vm1036_vm1, %v2289_v25, %v2291_v27  ;;  %7616 = vmatpush3.bf16.msra.mxu0 %v8371_v55  ;;  %v6564_v55 = vld [vmem:[%s9908_s11 + $0x90] sm:$0xff] }
 0x36f   : > { %7546 = vmatmul.mubr.bf16.vlgmr.msra.gmra.mrb[16].mxu1 %v2290_v30  ;;  %7621 = vmatprep.subr.bf16.mxu0 %v8372_v56 }
 0x370   : > { %7554 = vmatpush3.bf16.msra.mxu1 %v8347_v26  ;;  %7549 = vmatprep.mubr.bf16.mxu1 %v2292_v31  ;;  %v8360_v26 = vld [vmem:[%s9945_s4 + $0xa8] sm:$0xff]  }
 0x371   : > { %7555 = vmatprep.subr.bf16.mxu1 %v8348_v29  ;;  %v2263_v33 = vld [vmem:[#allocation5 + $0x20] sm:$0xf] }
 0x372   : > { %v2293_v34 = vrot.slane %v2263_v33, 4  ;;  %v2525_v48 = vld [vmem:[#allocation5 + $0x20] sm:$0xff]  ;;  %v8375_v33 = vld [vmem:[%s9947_s8 + $0x8] sm:$0xff]  }
 0x374   : > { %7556 = vmatpush3.bf16.msra.mxu1 %v8348_v29  ;;  %v2294_v36 = vsel %vm1036_vm1, %v2291_v27, %v2293_v34 }
 0x375   : > { %7557 = vmatprep.subr.bf16.mxu1 %v8349_v32 }
 0x377   : > { %7550 = vmatmul.mubr.bf16.gmra.mrb[20].mxu1 %v2294_v36  ;;  %v8376_v36 = vld [vmem:[%s9947_s8 + $0x10] sm:$0xff]  }
 0x378   : > { %7558 = vmatpush3.bf16.msra.mxu1 %v8349_v32  ;;  %7569 = vmatprep.mubr.bf16.mxu1 %v2239_v37  ;;  %v8377_v37 = vld [vmem:[%s9947_s8 + $0x18] sm:$0xff]  }
 0x379   : > { %7559 = vmatprep.subr.bf16.mxu1 %v8350_v35 }
 0x37c   : > { %7560 = vmatpush3.bf16.msra.mxu1 %v8350_v35 }
 0x37d   : > { %7561 = vmatprep.subr.bf16.mxu1 %v8351_v38 }
 0x380   : > { %7562 = vmatpush3.bf16.msra.mxu1 %v8351_v38  ;;  %v8378_v38 = vld [vmem:[%s9947_s8 + $0x20] sm:$0xff]  }
 0x381   : > { %7563 = vmatprep.subr.bf16.mxu1 %v8352_v23 }
 0x384   : > { %7564 = vmatpush3.bf16.msra.mxu1 %v8352_v23  ;;  %v8379_v23 = vld [vmem:[%s9947_s8 + $0x28] sm:$0xff]  }
 0x385   : > { %7565 = vmatprep.subr.bf16.mxu1 %v8353_v39 }
 0x388   : > { %7566 = vmatpush3.bf16.msra.mxu1 %v8353_v39  ;;  %v8380_v39 = vld [vmem:[%s9947_s8 + $0x30] sm:$0xff]  }
 0x389   : > { %7567 = vmatprep.subr.bf16.mxu1 %v8354_v40 }
 0x38c   : > { %7568 = vmatpush3.bf16.msra.mxu1 %v8354_v40  ;;  %v8381_v40 = vld [vmem:[%s9947_s8 + $0x38] sm:$0xff]  }
 0x38d   : > { %7577 = vmatprep.subr.bf16.mxu1 %v8355_v41 }
 0x38f   : > { %7570 = vmatmul.mubr.bf16.vlgmr.msra.gmra.mrb[16].mxu1 %v9043_v50 }
 0x390   : > { %7573 = vmatprep.mubr.bf16.mxu1 %v9046_v19  ;;  %7578 = vmatpush3.bf16.msra.mxu1 %v8355_v41  ;;  %v8383_v41 = vld [vmem:[%s9947_s8 + $0x80] sm:$0xff]  }
 0x391   : > { %7579 = vmatprep.subr.bf16.mxu1 %v8356_v42 }
 0x394   : > { %7580 = vmatpush3.bf16.msra.mxu1 %v8356_v42 }
 0x395   : > { %7581 = vmatprep.subr.bf16.mxu1 %v8357_v43 }
 0x397   : > { %7574 = vmatmul.mubr.bf16.gmra.mrb[20].mxu1 %v9049_v21 }
 0x398   : > { %7582 = vmatpush3.bf16.msra.mxu1 %v8357_v43  ;;  %7593 = vmatprep.mubr.bf16.mxu1 %v9043_v50  ;;  %v8385_v43 = vld [vmem:[%s9947_s8 + $0x88] sm:$0xff]  }
 0x399   : > { %7583 = vmatprep.subr.bf16.mxu1 %v8358_v44 }
 0x39c   : > { %7584 = vmatpush3.bf16.msra.mxu1 %v8358_v44 }
 0x39d   : > { %7585 = vmatprep.subr.bf16.mxu1 %v8359_v45 }
 0x3a0   : > { %7586 = vmatpush3.bf16.msra.mxu1 %v8359_v45  ;;  %v8386_v45 = vld [vmem:[%s9947_s8 + $0x90] sm:$0xff]  }
 0x3a1   : > { %7587 = vmatprep.subr.bf16.mxu1 %v8360_v26 }
 0x3a4   : > { %7588 = vmatpush3.bf16.msra.mxu1 %v8360_v26  ;;  %v8387_v26 = vld [vmem:[%s9947_s8 + $0x98] sm:$0xff]  }
 0x3a5   : > { %7589 = vmatprep.subr.bf16.mxu1 %v8361_v46 }
 0x3a8   : > { %7590 = vmatpush3.bf16.msra.mxu1 %v8361_v46  ;;  %v8388_v46 = vld [vmem:[%s9947_s8 + $0xa0] sm:$0xff]  }
 0x3a9   : > { %7591 = vmatprep.subr.bf16.mxu1 %v8362_v47 }
 0x3ac   : > { %7592 = vmatpush3.bf16.msra.mxu1 %v8362_v47  ;;  %v8389_v47 = vld [vmem:[%s9947_s8 + $0xa8] sm:$0xff]  }
 0x3ad   : > { %8021 = vmatprep.subr.bf16.mxu1 %v8582_v57 }
 0x3af   : > { %7594 = vmatmul.mubr.bf16.vlgmr.msra.gmra.mrb[16].mxu1 %v9046_v19 }
 0x3b0   : > { %7597 = vmatprep.mubr.bf16.mxu1 %v9049_v21  ;;  %8023 = vmatpush3.bf16.msra.mxu1 %v8022_v60  ;;  %v6567_v60 = vld [vmem:[%s9908_s11 + $0xa8] sm:$0xff] }
 0x3b1   : > { %8024 = vmatprep.subr.bf16.mxu1 %v8582_v57  ;;  %v8052_v61 = vpack.c.bf16 %v6567_v60, %v6566_v59 }
 0x3b4   : > { %8026 = vmatpush3.bf16.msra.mxu1 %v8025_v63  ;;  %v6557_v63 = vld [vmem:[%s9908_s11 + $0x68] sm:$0xff] }
 0x3b5   : > { %8027 = vmatprep.subr.bf16.mxu1 %v8582_v57 }
 0x3b7   : > { %7598 = vmatmul.mubr.bf16.gmra.mrb[20].mxu1 %v2525_v48  ;;  %v8390_v48 = vld [vmem:[%s9947_s8 + $0xb0] sm:$0xff]  }
 0x482   : > { %v7595_v1 = vpop.f32.mrb[16].mxu1 }
 0x483   : > { %v2673_v2 = vadd.f32 %v7595_v1, %v6488_v0  ;;  %v2625_v3 = vpop.f32.mrb[17].mxu1  ;;  %v6568_v1 = vld [vmem:[%s9908_s11 + $0xb0] sm:$0xff] }
 0x484   : > { %v2671_v4 = vadd.f32 %v6488_v0, %v2625_v3  ;;  %v7596_v7 = vpop.f32.mrb[18].mxu1 }
 0x485   : > { %v2681_v8 = vmax.f32 %v2673_v2, 0.0  ;;  %v2628_v9 = vpop.f32.mrb[19].mxu1  ;;  %v2674_v16 = vadd.f32 %v7596_v7, %v6488_v0  ;;  %v6569_v2 = vld [vmem:[%s9908_s11 + $0xb8] sm:$0xff] }
 0x486   : > { %v2679_v10 = vmax.f32 %v2671_v4, 0.0  ;;  %v2672_v50 = vadd.f32 %v6488_v0, %v2628_v9  ;;  %v8055_v3 = vpack.c.bf16 %v6569_v2, %v6568_v1  ;;  %v6558_v4 = vld [vmem:[%s9908_s11 + $0x70] sm:$0xff]  ;;  %v6559_v7 = vld [vmem:[%s9908_s11 + $0x78] sm:$0xff]  ;;  %v8584_v9 = vmov 0.0  }
 0x487   : > { %v2682_v27 = vmax.f32 %v2674_v16, 0.0  ;;  %7677 = vmatprep.mubr.msk.f32.mxu1 %vm8583_vm2, %v8584_v9 }
 0x488   : > { %v6927_v5 = vpack.c.bf16 %v2681_v8, %v2679_v10  ;;  %v2680_v6 = vmax.f32 %v2672_v50, 0.0  ;;  %v8031_v8 = vpack.c.bf16 %v6559_v7, %v6558_v4  ;;  %v6551_v10 = vld [vmem:[%s9907_s10] ss:$0 sm:$0xff]  ;;  %v6584_v4 = vld [vmem:[%s9910_s13 + $0x28] sm:$0xff] }
 0x48a   : > { %6928 = vst [vmem:[#allocation7] sm:$0xff] %v6927_v5   ;;  %v2691_v11 = vpack.c.bf16 %v2680_v6, %v2680_v6  ;;  %v7599_v12 = vpop.f32.mrb[20].mxu1 }
 0x48b   : > { %v2677_v13 = vadd.f32 %v7599_v12, %v6488_v0  ;;  %v2641_v14 = vpop.f32.mrb[21].mxu1  ;;  %v3113_v12 = vld [vmem:[%s9908_s11] sm:$0xff] }
 0x48c   : > { %2692 = vst [vmem:[#allocation6 + $0x4] sm:$0xf] %v2691_v11  ;;  %v2675_v15 = vadd.f32 %v6488_v0, %v2641_v14  ;;  %v7600_v17 = vpop.f32.mrb[22].mxu1 }
 0x48d   : > { %v2685_v18 = vmax.f32 %v2677_v13, 0.0  ;;  %v2678_v19 = vadd.f32 %v7600_v17, %v6488_v0  ;;  %v2644_v21 = vpop.f32.mrb[23].mxu1  ;;  %v3114_v13 = vld [vmem:[%s9908_s11 + $0x8] sm:$0xff] }
 0x48e   : > { %v2683_v22 = vmax.f32 %v2675_v15, 0.0  ;;  %v2676_v24 = vadd.f32 %v6488_v0, %v2644_v21  ;;  %v8028_v0 = vpack.c.bf16 %v6557_v63, %v6556_v62  ;;  %v8034_v17 = vpack.c.bf16 %v3114_v13, %v3113_v12  ;;  %v3116_v21 = vld [vmem:[%s9908_s11 + $0x18] sm:$0xff] }
 0x48f   : > { %v2686_v25 = vmax.f32 %v2678_v19, 0.0  ;;  %v3115_v19 = vld [vmem:[%s9908_s11 + $0x10] sm:$0xff]  ;;  %v6586_v12 = vld [vmem:[%s9910_s13 + $0x38] sm:$0xff] }
 0x490   : > { %v6937_v28 = vpack.c.bf16 %v2685_v18, %v2683_v22  ;;  %v2684_v29 = vmax.f32 %v2676_v24, 0.0  ;;  %8029 = vmatpush3.bf16.msra.mxu1 %v8028_v0  ;;  %v8037_v22 = vpack.c.bf16 %v3116_v21, %v3115_v19  ;;  %v3117_v24 = vld [vmem:[%s9908_s11 + $0x20] sm:$0xff] }
 0x491   : > { %v2703_v30 = vpack.c.bf16 %v2686_v25, %v2686_v25  ;;  %v8370_v31 = vld [vmem:[#allocation7] sm:$0xff]   ;;  %8030 = vmatprep.subr.bf16.mxu1 %v8582_v57 }
 0x492   : > { %6986 = vst [vmem:[#allocation7 + $0x8] sm:$0xff] %v6937_v28   ;;  %v6932_v32 = vpack.c.bf16 %v2684_v29, %v2682_v27  ;;  %7617 = vmatprep.mubr.bf16.mxu0 %v8370_v31  ;;  %v3118_v25 = vld [vmem:[%s9908_s11 + $0x28] sm:$0xff]  ;;  %v3119_v28 = vld [vmem:[%s9908_s11 + $0x30] sm:$0xff]  ;;  %v3120_v29 = vld [vmem:[%s9908_s11 + $0x38] sm:$0xff] }
 0x493   : > { %2704 = vst [vmem:[#allocation6 + $0x10] sm:$0xf] %v2703_v30  ;;  %v8374_v35 = vld [vmem:[#allocation6] sm:$0xff]   ;;  %v8040_v27 = vpack.c.bf16 %v3118_v25, %v3117_v24  ;;  %v8043_v30 = vpack.c.bf16 %v3120_v29, %v3119_v28  ;;  %v8395_v21 = vld [vmem:[%s9912_s15 + $0x44] ss:$8 sps:$4 sm:$0xff]  }
 0x494   : > { %6985 = vst [vmem:[#allocation6 + $0x8] sm:$0xff] %v6932_v32   ;;  %8032 = vmatpush3.bf16.msra.mxu1 %v8031_v8  ;;  %v6571_v32 = vld [vmem:[%s9908_s11 + $0xc0] sm:$0xff]  ;;  %v8398_v24 = vld [vmem:[%s9912_s15 + $0x54] ss:$8 sps:$4 sm:$0xff]   ;;  %v8402_v28 = vld [vmem:[%s9912_s15 + $0x70] ss:$8 sps:$4 sm:$0xff]  }
 0x495   : > { %8033 = vmatprep.subr.bf16.mxu1 %v8582_v57  ;;  %v6580_v8 = vld [vmem:[%s9909_s12] ss:$0 sm:$0xff]  ;;  %v8407_v29 = vld [vmem:[%s9912_s15 + $0x4] ss:$8 sps:$4 sm:$0xff]  }
 0x496   : > { %v8399_v25 = vld [vmem:[%s9912_s15 + $0x60] ss:$8 sps:$4 sm:$0xff]  }
 0x499   : > { %v8373_v34 = vld [vmem:[#allocation7 + $0x8] sm:$0xff]  }
 0x49a   : > { %7618 = vmatmul.mubr.bf16.vlgmr.msra.gmra.mrb[24].mxu0 %v8373_v34 }
 0x49b   : > { %7622 = vmatpush3.bf16.msra.mxu0 %v8372_v56  ;;  %7637 = vmatprep.mubr.bf16.mxu0 %v8374_v35  ;;  %v8382_v42 = vld [vmem:[#allocation6 + $0x8] sm:$0xff]   ;;  %v6565_v56 = vld [vmem:[%s9908_s11 + $0x98] sm:$0xff] }
 0x49c   : > { %7623 = vmatprep.subr.bf16.mxu0 %v8375_v33  ;;  %v8384_v44 = vld [vmem:[#allocation6 + $0x4] sm:$0xff]   ;;  %v8392_v54 = vld [vmem:[#allocation6 + $0xc] sm:$0xff]   ;;  %v8049_v58 = vpack.c.bf16 %v6565_v56, %v6564_v55  ;;  %v6592_v55 = vld [vmem:[%s9910_s13 + $0x50] sm:$0xff] }
 0x49d   : > { %v6593_v56 = vld [vmem:[%s9910_s13 + $0x58] sm:$0xff] }
 0x49f   : > { %7624 = vmatpush3.bf16.msra.mxu0 %v8375_v33  ;;  %v6572_v33 = vld [vmem:[%s9908_s11 + $0xc8] sm:$0xff] }
 0x4a0   : > { %7625 = vmatprep.subr.bf16.mxu0 %v8376_v36  ;;  %v8058_v34 = vpack.c.bf16 %v6572_v33, %v6571_v32  ;;  %v6581_v32 = vld [vmem:[%s9911_s14] ss:$0 sm:$0xff]  ;;  %v6595_v33 = vld [vmem:[%s9911_s14 + $0x2] ss:$0 sm:$0xff] }
 0x4a3   : > { %7626 = vmatpush3.bf16.msra.mxu0 %v8376_v36  ;;  %v6573_v36 = vld [vmem:[%s9908_s11 + $0xd0] sm:$0xff] }
 0x4a4   : > { %7627 = vmatprep.subr.bf16.mxu0 %v8377_v37 }
 0x4a7   : > { %7628 = vmatpush3.bf16.msra.mxu0 %v8377_v37  ;;  %v6574_v37 = vld [vmem:[%s9908_s11 + $0xd8] sm:$0xff] }
 0x4a8   : > { %7629 = vmatprep.subr.bf16.mxu0 %v8378_v38 }
 0x4ab   : > { %7630 = vmatpush3.bf16.msra.mxu0 %v8378_v38  ;;  %v8061_v38 = vpack.c.bf16 %v6574_v37, %v6573_v36 }
 0x4ac   : > { %7631 = vmatprep.subr.bf16.mxu0 %v8379_v23 }
 0x4af   : > { %7632 = vmatpush3.bf16.msra.mxu0 %v8379_v23  ;;  %v6575_v23 = vld [vmem:[%s9908_s11 + $0xe0] sm:$0xff] }
 0x4b0   : > { %7633 = vmatprep.subr.bf16.mxu0 %v8380_v39 }
 0x4b3   : > { %7634 = vmatpush3.bf16.msra.mxu0 %v8380_v39  ;;  %v6576_v39 = vld [vmem:[%s9908_s11 + $0xe8] sm:$0xff] }
 0x4b4   : > { %7635 = vmatprep.subr.bf16.mxu0 %v8381_v40 }
 0x4b7   : > { %7636 = vmatpush3.bf16.msra.mxu0 %v8381_v40  ;;  %v8064_v40 = vpack.c.bf16 %v6576_v39, %v6575_v23 }
 0x4b8   : > { %7641 = vmatprep.subr.bf16.mxu0 %v8383_v41 }
 0x4ba   : > { %7638 = vmatmul.mubr.bf16.vlgmr.msra.gmra.mrb[24].mxu0 %v8382_v42  ;;  %v6578_v42 = vld [vmem:[%s9908_s11 + $0xf8] sm:$0xff] }
 0x4bb   : > { %7642 = vmatpush3.bf16.msra.mxu0 %v8383_v41  ;;  %7657 = vmatprep.mubr.bf16.mxu0 %v8384_v44  ;;  %v6577_v41 = vld [vmem:[%s9908_s11 + $0xf0] sm:$0xff] }
 0x4bc   : > { %7643 = vmatprep.subr.bf16.mxu0 %v8385_v43 }
 0x4bf   : > { %7644 = vmatpush3.bf16.msra.mxu0 %v8385_v43  ;;  %v8067_v43 = vpack.c.bf16 %v6578_v42, %v6577_v41 }
 0x4c0   : > { %7645 = vmatprep.subr.bf16.mxu0 %v8386_v45 }
 0x4c3   : > { %7646 = vmatpush3.bf16.msra.mxu0 %v8386_v45 }
 0x4c4   : > { %7647 = vmatprep.subr.bf16.mxu0 %v8387_v26 }
 0x4c7   : > { %7648 = vmatpush3.bf16.msra.mxu0 %v8387_v26  ;;  %v3453_v26 = vld [vmem:[%s9910_s13] sm:$0xff] }
 0x4c8   : > { %7649 = vmatprep.subr.bf16.mxu0 %v8388_v46 }
 0x4cb   : > { %7650 = vmatpush3.bf16.msra.mxu0 %v8388_v46  ;;  %v3454_v46 = vld [vmem:[%s9910_s13 + $0x8] sm:$0xff] }
 0x4cc   : > { %7651 = vmatprep.subr.bf16.mxu0 %v8389_v47 }
 0x4cf   : > { %7652 = vmatpush3.bf16.msra.mxu0 %v8389_v47  ;;  %v6590_v47 = vld [vmem:[%s9910_s13 + $0x40] sm:$0xff] }
 0x4d0   : > { %7653 = vmatprep.subr.bf16.mxu0 %v8390_v48 }
 0x4d3   : > { %7654 = vmatpush3.bf16.msra.mxu0 %v8390_v48  ;;  %v8070_v48 = vpack.c.bf16 %v3454_v46, %v3453_v26 }
 0x4d4   : > { %7655 = vmatprep.subr.bf16.mxu0 %v8391_v49 }
 0x4d7   : > { %7656 = vmatpush3.bf16.msra.mxu0 %v8391_v49  ;;  %v6591_v49 = vld [vmem:[%s9910_s13 + $0x48] sm:$0xff] }
 0x4d8   : > { %8045 = vmatprep.subr.bf16.mxu0 %v8582_v57  ;;  %v8082_v51 = vpack.c.bf16 %v6591_v49, %v6590_v47 }
 0x4da   : > { %7658 = vmatmul.mubr.bf16.vlgmr.msra.gmra.mrb[24].mxu0 %v8392_v54 }
 0x4db   : > { %8047 = vmatpush3.bf16.msra.mxu0 %v8046_v53  ;;  %7715 = vmatprep.mubr.msk.f32.mxu0 %vm8583_vm2, %v8584_v9  ;;  %v3456_v53 = vld [vmem:[%s9910_s13 + $0x18] sm:$0xff] }
 0x4dc   : > { %8048 = vmatprep.subr.bf16.mxu0 %v8582_v57  ;;  %v8073_v54 = vpack.c.bf16 %v3456_v53, %v3455_v52 }
 0x4df   : > { %8050 = vmatpush3.bf16.msra.mxu0 %v8049_v58  ;;  %v8085_v58 = vpack.c.bf16 %v6593_v56, %v6592_v55  ;;  %v8405_v55 = vld [vmem:[%s9912_s15] ss:$8 sps:$4 sm:$0xff]  }
 0x4e0   : > { %8051 = vmatprep.subr.bf16.mxu0 %v8582_v57 }
 0x4e3   : > { %8053 = vmatpush3.bf16.msra.mxu0 %v8052_v61 }
 0x4e4   : > { %8054 = vmatprep.subr.bf16.mxu0 %v8582_v57 }
 0x4e7   : > { %8056 = vmatpush3.bf16.msra.mxu0 %v8055_v3  ;;  %v6583_v3 = vld [vmem:[%s9910_s13 + $0x20] sm:$0xff] }
 0x4e8   : > { %8069 = vmatprep.subr.bf16.mxu0 %v8582_v57 }
 0x5ad   : > { %v7659_v50 = vpop.f32.mrb[24].mxu0 }
 0x5ae   : > { %v3107_v5 = vadd.f32 %v7659_v50, %v6551_v10  ;;  %v3079_v6 = vpop.f32.mrb[25].mxu0 }
 0x5af   : > { %v7660_v11 = vpop.f32.mrb[26].mxu0  ;;  %v3105_v31 = vadd.f32 %v6551_v10, %v3079_v6 }
 0x5b0   : > { %v3111_v14 = vmax.f32 %v3107_v5, 0.0  ;;  %v3082_v16 = vpop.f32.mrb[27].mxu0  ;;  %v3108_v44 = vadd.f32 %v7660_v11, %v6551_v10  ;;  %v8076_v5 = vpack.c.bf16 %v6584_v4, %v6583_v3  ;;  %v6585_v11 = vld [vmem:[%s9910_s13 + $0x30] sm:$0xff] }
 0x5b1   : > { %v3106_v15 = vadd.f32 %v6551_v10, %v3082_v16  ;;  %v3109_v35 = vmax.f32 %v3105_v31, 0.0  ;;  %v8079_v13 = vpack.c.bf16 %v6586_v12, %v6585_v11  ;;  %v6598_v16 = vld [vmem:[%s9910_s13 + $0x68] sm:$0xff]  ;;  %v8419_v3 = vld [vmem:[%s9912_s15 + $0x34] ss:$8 sps:$4 sm:$0xff]   ;;  %v8417_v4 = vld [vmem:[%s9912_s15 + $0x30] ss:$8 sps:$4 sm:$0xff]  }
 0x5b2   : > { %7716 = vmatmul.mubr.msk.f32.vlgmr.msra.gmra.mrb[28].mxu0 %vm3130_vm3, %v3111_v14  ;;  %v3112_v45 = vmax.f32 %v3108_v44, 0.0  ;;  %v6597_v14 = vld [vmem:[%s9910_s13 + $0x60] sm:$0xff]  ;;  %v8422_v31 = vld [vmem:[%s9914_s17 + $0x48] sm:$0xff]   ;;  %v8427_v12 = vld [vmem:[%s9914_s17 + $0x70] sm:$0xff]  }
 0x5b3   : > { %v3110_v18 = vmax.f32 %v3106_v15, 0.0  ;;  %7745 = vmatprep.mubr.msk.f32.mxu0 %vm8583_vm2, %v8584_v9  ;;  %8071 = vmatpush3.bf16.msra.mxu0 %v8070_v48  ;;  %v8088_v15 = vpack.c.bf16 %v6598_v16, %v6597_v14  ;;  %v6602_v48 = vld [vmem:[%s9911_s14 + $0x3] ss:$0 sm:$0xff]  ;;  %v8426_v11 = vld [vmem:[%s9914_s17 + $0x68] sm:$0xff]  }
 0x5b4   : > { %8072 = vmatprep.subr.bf16.mxu0 %v8582_v57  ;;  %v9478_v14 = vld [vmem:[%s9914_s17] sm:$0xff]  }
 0x5b5   : > { %7678 = vmatmul.mubr.msk.f32.vlgmr.msra.gmra.mrb[24].mxu1 %vm3130_vm3, %v3110_v18  ;;  %v6600_v18 = vld [vmem:[%s9910_s13 + $0x78] sm:$0xff]  ;;  %v8445_v16 = vld [vmem:[%s9916_s19 + $0x80] ss:$8 sps:$4 sm:$0xff]  }
 0x5b6   : > { %8035 = vmatpush3.bf16.msra.mxu1 %v8034_v17  ;;  %7696 = vmatprep.mubr.msk.f32.mxu1 %vm8583_vm2, %v8584_v9  ;;  %v6599_v17 = vld [vmem:[%s9910_s13 + $0x70] sm:$0xff] }
 0x5b7   : > { %8036 = vmatprep.subr.bf16.mxu1 %v8582_v57  ;;  %8074 = vmatpush3.bf16.msra.mxu0 %v8073_v54  ;;  %v8091_v19 = vpack.c.bf16 %v6600_v18, %v6599_v17  ;;  %v8450_v17 = vld [vmem:[%s9916_s19 + $0x94] ss:$8 sps:$4 sm:$0xff]   ;;  %v8448_v18 = vld [vmem:[%s9916_s19 + $0x90] ss:$8 sps:$4 sm:$0xff]  }
 0x5b8   : > { %8075 = vmatprep.subr.bf16.mxu0 %v8582_v57 }
 0x5ba   : > { %8038 = vmatpush3.bf16.msra.mxu1 %v8037_v22  ;;  %v8393_v22 = vld [vmem:[%s9912_s15 + $0x40] ss:$8 sps:$4 sm:$0xff]  }
 0x5bb   : > { %8039 = vmatprep.subr.bf16.mxu1 %v8582_v57 }
 0x5be   : > { %8041 = vmatpush3.bf16.msra.mxu1 %v8040_v27  ;;  %v8404_v27 = vld [vmem:[%s9912_s15 + $0x74] ss:$8 sps:$4 sm:$0xff]  }
 0x5bf   : > { %8042 = vmatprep.subr.bf16.mxu1 %v8582_v57 }
 0x5c2   : > { %8044 = vmatpush3.bf16.msra.mxu1 %v8043_v30  ;;  %v8421_v30 = vld [vmem:[%s9914_s17 + $0x40] sm:$0xff]  }
 0x5c3   : > { %8057 = vmatprep.subr.bf16.mxu1 %v8582_v57 }
 0x5c5   : > { %7697 = vmatmul.mubr.msk.f32.vlgmr.msra.gmra.mrb[26].mxu1 %vm3130_vm3, %v3109_v35 }
 0x5c6   : > { %8059 = vmatpush3.bf16.msra.mxu1 %v8058_v34  ;;  %7734 = vmatprep.mubr.msk.f32.mxu1 %vm8583_vm2, %v8584_v9 }
 0x5c7   : > { %8060 = vmatprep.subr.bf16.mxu1 %v8582_v57 }
 0x5ca   : > { %8062 = vmatpush3.bf16.msra.mxu1 %v8061_v38 }
 0x5cb   : > { %8063 = vmatprep.subr.bf16.mxu1 %v8582_v57 }
 0x5ce   : > { %8065 = vmatpush3.bf16.msra.mxu1 %v8064_v40 }
 0x5cf   : > { %8066 = vmatprep.subr.bf16.mxu1 %v8582_v57 }
 0x5d2   : > { %8068 = vmatpush3.bf16.msra.mxu1 %v8067_v43  ;;  %v6588_v43 = vld [vmem:[%s9911_s14 + $0x1] ss:$0 sm:$0xff] }
 0x5d3   : > { %8081 = vmatprep.subr.bf16.mxu1 %v8582_v57 }
 0x5d5   : > { %7735 = vmatmul.mubr.msk.f32.vlgmr.msra.gmra.mrb[28].mxu1 %vm3130_vm3, %v3112_v45 }
 0x5d6   : > { %7767 = vmatprep.mubr.msk.f32.mxu1 %vm8583_vm2, %v8584_v9  ;;  %8083 = vmatpush3.bf16.msra.mxu1 %v8082_v51 }
 0x5d7   : > { %8084 = vmatprep.subr.bf16.mxu1 %v8582_v57 }
 0x5da   : > { %8086 = vmatpush3.bf16.msra.mxu1 %v8085_v58 }
 0x5db   : > { %3877 = vmatprep.subr.bf16.mxu1 %v8395_v21  ;;  %v8451_v21 = vld [vmem:[%s9916_s19 + $0xa0] ss:$8 sps:$4 sm:$0xff]  }
 0x685   : > { %v3355_v59 = vpop.f32.mrb[28].mxu0 }
 0x686   : > { %v7717_v60 = vpop.f32.mrb[29].mxu0 }
 0x687   : > { %v8412_v60 = vld [vmem:[%s9912_s15 + $0x14] ss:$8 sps:$4 sm:$0xff]  }
 0x688   : > { %v3200_v61 = vpop.f32.mrb[24].mxu1 }
 0x689   : > { %v7679_v62 = vpop.f32.mrb[25].mxu1 }
 0x68a   : > { %v8415_v62 = vld [vmem:[%s9912_s15 + $0x24] ss:$8 sps:$4 sm:$0xff]  }
 0x698   : > { %v3273_v63 = vpop.f32.mrb[26].mxu1 }
 0x699   : > { %v3274_v0 = vadd.f32 %v3273_v63, %v3200_v61  ;;  %v7698_v1 = vpop.f32.mrb[27].mxu1  ;;  %v8410_v61 = vld [vmem:[%s9912_s15 + $0x10] ss:$8 sps:$4 sm:$0xff]  }
 0x69a   : > { %v3811_v63 = vld [vmem:[#allocation8 + $0x10] sm:$0xf] }
 0x69b   : > { %v3359_v2 = vadd.f32 %v3355_v59, %v3274_v0  ;;  %v8413_v0 = vld [vmem:[%s9912_s15 + $0x20] ss:$8 sps:$4 sm:$0xff]  }
 0x6a8   : > { %v3438_v7 = vpop.f32.mrb[28].mxu1 }
 0x6a9   : > { %v3442_v10 = vadd.f32 %v3438_v7, %v3359_v2  ;;  %v7736_v50 = vpop.f32.mrb[29].mxu1 }
 0x6aa   : > { %v8423_v50 = vld [vmem:[%s9914_s17 + $0x50] sm:$0xff]  }
 0x6ab   : > { %v3450_v6 = vadd.f32 %v6580_v8, %v3442_v10 }
 0x6ad   : > { %7746 = vmatmul.mubr.msk.f32.vlgmr.msra.gmra.mrb[30].mxu0 %vm3464_vm5, %v3450_v6  ;;  %7768 = vmatmul.mubr.msk.f32.vlgmr.msra.gmra.mrb[30].mxu1 %vm3464_vm5, %v3450_v6 }
 0x6ae   : > { %8077 = vmatpush3.bf16.msra.mxu0 %v8076_v5  ;;  %7756 = vmatprep.mubr.msk.f32.mxu0 %vm8583_vm2, %v8584_v9  ;;  %v8424_v5 = vld [vmem:[%s9914_s17 + $0x58] sm:$0xff]  }
 0x6af   : > { %8078 = vmatprep.subr.bf16.mxu0 %v8582_v57  ;;  %3909 = vmatprep.mubr.bf16.mxu1 %v8581_v20 }
 0x6b0   : > { %3878 = vmatpush1.bf16.msra.mxu1 %v8393_v22  ;;  %v8456_v22 = vld [vmem:[%s9916_s19 + $0xb4] ss:$8 sps:$4 sm:$0xff]  }
 0x6b1   : > { %3879 = vmatprep.subr.bf16.mxu1 %v8398_v24  ;;  %v8454_v24 = vld [vmem:[%s9916_s19 + $0xb0] ss:$8 sps:$4 sm:$0xff]  }
 0x6b2   : > { %8080 = vmatpush3.bf16.msra.mxu0 %v8079_v13  ;;  %v8428_v13 = vld [vmem:[%s9914_s17 + $0x78] sm:$0xff]  }
 0x6b3   : > { %8087 = vmatprep.subr.bf16.mxu0 %v8582_v57 }
 0x6b5   : > { %7757 = vmatmul.mubr.msk.f32.vlgmr.msra.gmra.mrb[32].mxu0 %vm3464_vm5, %v3450_v6 }
 0x6b6   : > { %8089 = vmatpush3.bf16.msra.mxu0 %v8088_v15  ;;  %7778 = vmatprep.mubr.msk.f32.mxu0 %vm8583_vm2, %v8584_v9  ;;  %v8401_v9 = vld [vmem:[%s9912_s15 + $0x64] ss:$8 sps:$4 sm:$0xff]  }
 0x6b7   : > { %8090 = vmatprep.subr.bf16.mxu0 %v8582_v57  ;;  %v8396_v57 = vld [vmem:[%s9912_s15 + $0x50] ss:$8 sps:$4 sm:$0xff]   ;;  %v8447_v15 = vld [vmem:[%s9916_s19 + $0x84] ss:$8 sps:$4 sm:$0xff]  }
 0x6b8   : > { %3880 = vmatpush1.bf16.msra.mxu1 %v8396_v57  ;;  %v4035_v57 = vlaneseq }
 0x6b9   : > { %3881 = vmatprep.subr.bf16.mxu1 %v8401_v9 }
 0x6ba   : > { %8092 = vmatpush3.bf16.msra.mxu0 %v8091_v19  ;;  %v8453_v19 = vld [vmem:[%s9916_s19 + $0xa4] ss:$8 sps:$4 sm:$0xff]   ;;  %v9505_v9 = vshrl.u32 %v4035_v57, 7  ;;  %v8435_v57 = vld [vmem:[%s9914_s17 + $0x30] sm:$0xff]  }
 0x6bb   : > { %7781 = vmatprep.subr.bf16.mxu0 %v8421_v30 }
 0x6bc   : > { %3882 = vmatpush1.bf16.msra.mxu1 %v8399_v25  ;;  %v4037_v25 = vsub.s32 0, %v9505_v9 }
 0x6bd   : > { %7779 = vmatmul.mubr.msk.f32.vlgmr.msra.gmra.mrb[34].mxu0 %vm3464_vm5, %v3450_v6  ;;  %3883 = vmatprep.subr.bf16.mxu1 %v8404_v27  ;;  %v8425_v6 = vld [vmem:[%s9914_s17 + $0x60] sm:$0xff]  }
 0x6be   : > { %7782 = vmatpush3.bf16.msra.mxu0 %v8421_v30  ;;  %v4033_v27 = vld [vmem:[%s9913_s16] sm:$0x3] }
 0x6bf   : > { %7783 = vmatprep.subr.bf16.mxu0 %v8422_v31 }
 0x6c0   : > { %3884 = vmatpush1.bf16.msra.mxu1 %v8402_v28  ;;  %v4041_v28 = vsub.s32 1, %v9505_v9 }
 0x6c1   : > { %3980 = vmatprep.subr.bf16.mxu1 %v8407_v29  ;;  %v4038_v29 = vrot.slane %v4033_v27, %v4037_v25 }
 0x6c2   : > { %7784 = vmatpush3.bf16.msra.mxu0 %v8422_v31  ;;  %v4042_v30 = vrot.slane %v4033_v27, %v4041_v28  ;;  %v8436_v27 = vld [vmem:[%s9914_s17 + $0x38] sm:$0xff]  }
 0x6c3   : > { %7785 = vmatprep.subr.bf16.mxu0 %v8423_v50 }
 0x6c6   : > { %7786 = vmatpush3.bf16.msra.mxu0 %v8423_v50 }
 0x6c7   : > { %7787 = vmatprep.subr.bf16.mxu0 %v8424_v5 }
 0x6ca   : > { %7788 = vmatpush3.bf16.msra.mxu0 %v8424_v5 }
 0x6cb   : > { %7789 = vmatprep.subr.bf16.mxu0 %v8425_v6 }
 0x6ce   : > { %7790 = vmatpush3.bf16.msra.mxu0 %v8425_v6 }
 0x6cf   : > { %7791 = vmatprep.subr.bf16.mxu0 %v8426_v11 }
 0x6d2   : > { %7792 = vmatpush3.bf16.msra.mxu0 %v8426_v11  ;;  %v8430_v11 = vld [vmem:[%s9914_s17 + $0x8] sm:$0xff]  }
 0x6d3   : > { %7793 = vmatprep.subr.bf16.mxu0 %v8427_v12 }
 0x6d6   : > { %7794 = vmatpush3.bf16.msra.mxu0 %v8427_v12 }
 0x6d7   : > { %7795 = vmatprep.subr.bf16.mxu0 %v8428_v13 }
 0x6da   : > { %7796 = vmatpush3.bf16.msra.mxu0 %v8428_v13 }
 0x6db   : > { %7805 = vmatprep.subr.bf16.mxu0 %v9478_v14 }
 0x780   : > { %v3534_v34 = vpop.f32.mrb[30].mxu0  ;;  %v3706_v35 = vpop.f32.mrb[30].mxu1 }
 0x781   : > { %v3535_v36 = vadd.f32 %v6581_v32, %v3534_v34  ;;  %v3707_v37 = vadd.f32 %v6595_v33, %v3706_v35  ;;  %v7747_v38 = vpop.f32.mrb[31].mxu0  ;;  %v7769_v23 = vpop.f32.mrb[31].mxu1 }
 0x783   : > { %v3538_v39 = vmax.f32 %v3535_v36, 0.0  ;;  %v3710_v40 = vmax.f32 %v3707_v37, 0.0 }
 0x785   : > { %v3539_v41 = vpack.c.bf16 %v3538_v39, %v3538_v39  ;;  %v3711_v42 = vpack.c.bf16 %v3710_v40, %v3710_v40 }
 0x787   : > { %3540 = vst.msk [vmem:[#allocation8] sm:$0xf] %vm3451_vm4, %v3539_v41  ;;  %3712 = vst.msk [vmem:[#allocation8 + $0x8] sm:$0xf] %vm3451_vm4, %v3711_v42 }
 0x788   : > { %v3620_v44 = vpop.f32.mrb[32].mxu0 }
 0x789   : > { %v3621_v45 = vadd.f32 %v6588_v43, %v3620_v44  ;;  %v7758_v26 = vpop.f32.mrb[33].mxu0 }
 0x78b   : > { %v3624_v46 = vmax.f32 %v3621_v45, 0.0 }
 0x78d   : > { %v3625_v47 = vpack.c.bf16 %v3624_v46, %v3624_v46 }
 0x78e   : > { %v3801_v58 = vld [vmem:[#allocation8 + $0x8] sm:$0xf]  ;;  %v3799_v7 = vld [vmem:[#allocation8] sm:$0xf] }
 0x78f   : > { %3626 = vst.msk [vmem:[#allocation8 + $0x4] sm:$0xf] %vm3451_vm4, %v3625_v47 }
 0x790   : > { %v3792_v49 = vpop.f32.mrb[34].mxu0 }
 0x791   : > { %v3793_v51 = vadd.f32 %v6602_v48, %v3792_v49  ;;  %v7780_v52 = vpop.f32.mrb[35].mxu0 }
 0x793   : > { %v3796_v53 = vmax.f32 %v3793_v51, 0.0 }
 0x795   : > { %v3797_v54 = vpack.c.bf16 %v3796_v53, %v3796_v53 }
 0x796   : > { %v3800_v56 = vld [vmem:[#allocation8 + $0x4] sm:$0xf] }
 0x797   : > { %3798 = vst.msk [vmem:[#allocation8 + $0xc] sm:$0xf] %vm3451_vm4, %v3797_v54  ;;  %v6612_v59 = vcombine.low %v3800_v56, %v3801_v58  ;;  %v6624_v8 = vcombine.low %v3799_v7, %v3800_v56 }
 0x799   : > { %6622 = vmatmul.mubr.msk.bf16.vlgmr.msra.gmra.mrb[32].mxu1 %vm3130_vm3, %v6612_v59 }
 0x79a   : > { %3981 = vmatpush1.bf16.msra.mxu1 %v8405_v55  ;;  %3919 = vmatprep.mubr.bf16.mxu1 %v8581_v20 }
 0x79b   : > { %3982 = vmatprep.subr.bf16.mxu1 %v8412_v60 }
 0x79e   : > { %3983 = vmatpush1.bf16.msra.mxu1 %v8410_v61  ;;  %v3802_v1 = vld [vmem:[#allocation8 + $0xc] sm:$0xf] }
 0x79f   : > { %3984 = vmatprep.subr.bf16.mxu1 %v8415_v62  ;;  %v6613_v2 = vcombine.low %v3802_v1, %v3811_v63  ;;  %v6625_v10 = vcombine.low %v3801_v58, %v3802_v1 }
 0x7a1   : > { %6623 = vmatmul.mubr.msk.bf16.gmra.mrb[36].mxu1 %vm3130_vm3, %v6613_v2 }
 0x7a2   : > { %3985 = vmatpush1.bf16.msra.mxu1 %v8413_v0  ;;  %4012 = vmatprep.mubr.bf16.mxu1 %v8581_v20 }
 0x7a3   : > { %3986 = vmatprep.subr.bf16.mxu1 %v8419_v3 }
 0x7a6   : > { %3987 = vmatpush1.bf16.msra.mxu1 %v8417_v4 }
 0x7a7   : > { %4733 = vmatprep.subr.bf16.mxu1 %v8447_v15 }
 0x7a9   : > { %6634 = vmatmul.mubr.msk.bf16.vlgmr.msra.gmra.mrb[32].mxu1 %vm3130_vm3, %v6624_v8 }
 0x7aa   : > { %4022 = vmatprep.mubr.bf16.mxu1 %v8581_v20  ;;  %4734 = vmatpush1.bf16.msra.mxu1 %v8445_v16 }
 0x7ab   : > { %4735 = vmatprep.subr.bf16.mxu1 %v8450_v17  ;;  %v8431_v17 = vld [vmem:[%s9914_s17 + $0x10] sm:$0xff]  }
 0x7ae   : > { %4736 = vmatpush1.bf16.msra.mxu1 %v8448_v18 }
 0x7af   : > { %4737 = vmatprep.subr.bf16.mxu1 %v8453_v19  ;;  %v8432_v19 = vld [vmem:[%s9914_s17 + $0x18] sm:$0xff]  }
 0x7b1   : > { %6635 = vmatmul.mubr.msk.bf16.gmra.mrb[36].mxu1 %vm3130_vm3, %v6625_v10 }
 0x7b2   : > { %4765 = vmatprep.mubr.bf16.mxu1 %v8581_v20  ;;  %4738 = vmatpush1.bf16.msra.mxu1 %v8451_v21 }
 0x7b3   : > { %4739 = vmatprep.subr.bf16.mxu1 %v8456_v22 }
 0x7b6   : > { %4740 = vmatpush1.bf16.msra.mxu1 %v8454_v24  ;;  %v8434_v24 = vld [vmem:[%s9914_s17 + $0x28] sm:$0xff]  }
 0x87c   : > { %v4014_v31 = vpop.f32.mrb[32].mxu1 }
 0x87d   : > { %v4045_v32 = vadd.f32 %v4038_v29, %v4014_v31  ;;  %v4016_v33 = vpop.f32.mrb[33].mxu1  ;;  %v8439_v31 = vld [vmem:[%s9914_s17 + $0x90] sm:$0xff]  }
 0x87e   : > { %v4046_v34 = vadd.f32 %v4042_v30, %v4016_v33  ;;  %v4018_v35 = vpop.f32.mrb[34].mxu1  ;;  %v8441_v33 = vld [vmem:[%s9914_s17 + $0xa0] sm:$0xff]  }
 0x87f   : > { %v4053_v36 = vmax.f32 %v4045_v32, 0.0  ;;  %v4047_v37 = vadd.f32 %v4038_v29, %v4018_v35  ;;  %v4020_v38 = vpop.f32.mrb[35].mxu1  ;;  %v8440_v32 = vld [vmem:[%s9914_s17 + $0x98] sm:$0xff]   ;;  %v8443_v35 = vld [vmem:[%s9914_s17 + $0xb0] sm:$0xff]  }
 0x880   : > { %v4054_v23 = vmax.f32 %v4046_v34, 0.0  ;;  %v4048_v39 = vadd.f32 %v4042_v30, %v4020_v38  ;;  %v8442_v34 = vld [vmem:[%s9914_s17 + $0xa8] sm:$0xff]  }
 0x881   : > { %v4063_v40 = vpack.c.bf16 %v4053_v36, %v4053_v36  ;;  %v4055_v41 = vmax.f32 %v4047_v37, 0.0  ;;  %v8444_v36 = vld [vmem:[%s9914_s17 + $0xb8] sm:$0xff]   ;;  %v8459_v38 = vld [vmem:[%s9916_s19 + $0xc4] ss:$8 sps:$4 sm:$0xff]  }
 0x882   : > { %v4068_v42 = vpack.c.bf16 %v4054_v23, %v4054_v23  ;;  %v4056_v43 = vmax.f32 %v4048_v39, 0.0  ;;  %v8457_v23 = vld [vmem:[%s9916_s19 + $0xc0] ss:$8 sps:$4 sm:$0xff]   ;;  %4741 = vmatprep.subr.bf16.mxu1 %v8459_v38  ;;  %v8462_v39 = vld [vmem:[%s9916_s19 + $0xd4] ss:$8 sps:$4 sm:$0xff]  }
 0x883   : > { %v4065_v44 = vrot.slane %v4063_v40, 4  ;;  %v4070_v45 = vpack.c.bf16 %v4055_v41, %v4055_v41  ;;  %4742 = vmatpush1.bf16.msra.mxu1 %v8457_v23  ;;  %v8460_v40 = vld [vmem:[%s9916_s19 + $0xd0] ss:$8 sps:$4 sm:$0xff]   ;;  %v8465_v41 = vld [vmem:[%s9916_s19 + $0xe4] ss:$8 sps:$4 sm:$0xff]  }
 0x884   : > { %4069 = vst [vmem:[#allocation9 + $0x8] sm:$0xf] %v4068_v42  ;;  %v4075_v26 = vpack.c.bf16 %v4056_v43, %v4056_v43  ;;  %v4024_v46 = vpop.f32.mrb[36].mxu1  ;;  %4743 = vmatprep.subr.bf16.mxu1 %v8462_v39  ;;  %v8463_v42 = vld [vmem:[%s9916_s19 + $0xe0] ss:$8 sps:$4 sm:$0xff]  }
 0x885   : > { %4067 = vst [vmem:[#allocation9] sm:$0xf0] %v4065_v44  ;;  %v4072_v47 = vrot.slane %v4070_v45, 4  ;;  %v4049_v48 = vadd.f32 %v4038_v29, %v4024_v46  ;;  %v4026_v49 = vpop.f32.mrb[37].mxu1  ;;  %v8468_v43 = vld [vmem:[%s9916_s19 + $0xf4] ss:$8 sps:$4 sm:$0xff]  }
 0x886   : > { %4076 = vst [vmem:[#allocation9 + $0x10] sm:$0xf] %v4075_v26  ;;  %v4050_v51 = vadd.f32 %v4042_v30, %v4026_v49  ;;  %v4028_v52 = vpop.f32.mrb[38].mxu1  ;;  %v8466_v44 = vld [vmem:[%s9916_s19 + $0xf0] ss:$8 sps:$4 sm:$0xff]  }
 0x887   : > { %4074 = vst [vmem:[#allocation9 + $0x8] sm:$0xf0] %v4072_v47  ;;  %v4057_v53 = vmax.f32 %v4049_v48, 0.0  ;;  %v4051_v54 = vadd.f32 %v4038_v29, %v4028_v52  ;;  %v4030_v55 = vpop.f32.mrb[39].mxu1  ;;  %v8437_v29 = vld [vmem:[%s9914_s17 + $0x80] sm:$0xff]   ;;  %4744 = vmatpush1.bf16.msra.mxu1 %v8460_v40  ;;  %v8503_v40 = vld [vmem:[%s9918_s21 + $0x50] sm:$0xff]  }
 0x888   : > { %v4058_v56 = vmax.f32 %v4050_v51, 0.0  ;;  %v4052_v58 = vadd.f32 %v4042_v30, %v4030_v55  ;;  %v8438_v30 = vld [vmem:[%s9914_s17 + $0x88] sm:$0xff]   ;;  %4745 = vmatprep.subr.bf16.mxu1 %v8465_v41  ;;  %v6692_v26 = vld [vmem:[%s9915_s18] ss:$0 sm:$0xff]  ;;  %v8504_v41 = vld [vmem:[%s9918_s21 + $0x58] sm:$0xff]  }
 0x889   : > { %v4077_v59 = vpack.c.bf16 %v4057_v53, %v4057_v53  ;;  %v4059_v60 = vmax.f32 %v4051_v54, 0.0  ;;  %v8471_v45 = vld [vmem:[%s9916_s19 + $0x4] ss:$8 sps:$4 sm:$0xff]  }
 0x88a   : > { %v4082_v61 = vpack.c.bf16 %v4058_v56, %v4058_v56  ;;  %v4060_v62 = vmax.f32 %v4052_v58, 0.0 }
 0x88b   : > { %v4079_v63 = vrot.slane %v4077_v59, 4  ;;  %v4084_v0 = vpack.c.bf16 %v4059_v60, %v4059_v60  ;;  %4746 = vmatpush1.bf16.msra.mxu1 %v8463_v42  ;;  %v8505_v42 = vld [vmem:[%s9918_s21 + $0x60] sm:$0xff]  }
 0x88c   : > { %4083 = vst [vmem:[#allocation9 + $0x18] sm:$0xf] %v4082_v61  ;;  %v4089_v1 = vpack.c.bf16 %v4060_v62, %v4060_v62  ;;  %v4111_v2 = vld [vmem:[#allocation9] sm:$0xf0]  ;;  %4747 = vmatprep.subr.bf16.mxu1 %v8468_v43  ;;  %v8507_v43 = vld [vmem:[%s9918_s21 + $0x70] sm:$0xff]  }
 0x88d   : > { %4081 = vst [vmem:[#allocation9 + $0x10] sm:$0xf0] %v4079_v63  ;;  %v4086_v3 = vrot.slane %v4084_v0, 4  ;;  %v4138_v7 = vrot.slane %v4111_v2, 4  ;;  %v4091_v22 = vld [vmem:[#allocation9] sm:$0xff] }
 0x88e   : > { %4090 = vst [vmem:[#allocation9 + $0x20] sm:$0xf] %v4089_v1  ;;  %v4112_v4 = vld [vmem:[#allocation9 + $0x8] sm:$0xff] }
 0x88f   : > { %4088 = vst [vmem:[#allocation9 + $0x18] sm:$0xf0] %v4086_v3  ;;  %v4139_v8 = vrot.slane %v4112_v4, 4  ;;  %4748 = vmatpush1.bf16.msra.mxu1 %v8466_v44  ;;  %v8508_v44 = vld [vmem:[%s9918_s21 + $0x78] sm:$0xff]  }
 0x890   : > { %4910 = vmatprep.subr.bf16.mxu1 %v8471_v45  ;;  %v9680_v45 = vld [vmem:[%s9918_s21] sm:$0xff]  }
 0x891   : > { %v4140_v10 = vsel %vm1036_vm1, %v4138_v7, %v4139_v8 }
 0x892   : > { %7797 = vmatprep.mubr.bf16.mxu0 %v4140_v10 }
 0x894   : > { %v9517_v50 = vld [vmem:[#allocation9 + $0x10] sm:$0xff] }
 0x895   : > { %v4141_v5 = vrot.slane %v9517_v50, 4  ;;  %v4115_v16 = vld [vmem:[#allocation9 + $0x20] sm:$0xf] }
 0x896   : > { %v4114_v6 = vld [vmem:[#allocation9 + $0x18] sm:$0xff]  ;;  %v4145_v18 = vrot.slane %v4115_v16, 4  ;;  %v4377_v37 = vld [vmem:[#allocation9 + $0x20] sm:$0xff] }
 0x897   : > { %v4142_v12 = vsel %vm1036_vm1, %v4139_v8, %v4141_v5  ;;  %v4143_v13 = vrot.slane %v4114_v6, 4 }
 0x898   : > { %7798 = vmatmul.mubr.bf16.vlgmr.msra.gmra.mrb[36].mxu0 %v4142_v12  ;;  %v8475_v12 = vld [vmem:[%s9916_s19 + $0x14] ss:$8 sps:$4 sm:$0xff]  }
 0x899   : > { %7806 = vmatpush3.bf16.msra.mxu0 %v9478_v14  ;;  %v4144_v15 = vsel %vm1036_vm1, %v4141_v5, %v4143_v13  ;;  %v4146_v21 = vsel %vm1036_vm1, %v4143_v13, %v4145_v18  ;;  %v8433_v14 = vld [vmem:[%s9914_s17 + $0x20] sm:$0xff]  }
 0x89a   : > { %7801 = vmatprep.mubr.bf16.mxu0 %v4144_v15  ;;  %7807 = vmatprep.subr.bf16.mxu0 %v8430_v11  ;;  %v8473_v15 = vld [vmem:[%s9916_s19 + $0x10] ss:$8 sps:$4 sm:$0xff]   ;;  %v8476_v18 = vld [vmem:[%s9916_s19 + $0x20] ss:$8 sps:$4 sm:$0xff]  }
 0x89d   : > { %7808 = vmatpush3.bf16.msra.mxu0 %v8430_v11  ;;  %v8469_v11 = vld [vmem:[%s9916_s19] ss:$8 sps:$4 sm:$0xff]  }
 0x89e   : > { %7809 = vmatprep.subr.bf16.mxu0 %v8431_v17 }
 0x8a0   : > { %7802 = vmatmul.mubr.bf16.gmra.mrb[40].mxu0 %v4146_v21 }
 0x8a1   : > { %7810 = vmatpush3.bf16.msra.mxu0 %v8431_v17  ;;  %7821 = vmatprep.mubr.bf16.mxu0 %v4091_v22  ;;  %v8478_v17 = vld [vmem:[%s9916_s19 + $0x24] ss:$8 sps:$4 sm:$0xff]   ;;  %v8480_v22 = vld [vmem:[%s9916_s19 + $0x30] ss:$8 sps:$4 sm:$0xff]  }
 0x8a2   : > { %7811 = vmatprep.subr.bf16.mxu0 %v8432_v19 }
 0x8a5   : > { %7812 = vmatpush3.bf16.msra.mxu0 %v8432_v19  ;;  %v8482_v19 = vld [vmem:[%s9916_s19 + $0x34] ss:$8 sps:$4 sm:$0xff]  }
 0x8a6   : > { %7813 = vmatprep.subr.bf16.mxu0 %v8433_v14 }
 0x8a9   : > { %7814 = vmatpush3.bf16.msra.mxu0 %v8433_v14  ;;  %v8485_v14 = vld [vmem:[%s9916_s19 + $0x44] ss:$8 sps:$4 sm:$0xff]  }
 0x8aa   : > { %7815 = vmatprep.subr.bf16.mxu0 %v8434_v24 }
 0x8ad   : > { %7816 = vmatpush3.bf16.msra.mxu0 %v8434_v24  ;;  %v8483_v24 = vld [vmem:[%s9916_s19 + $0x40] ss:$8 sps:$4 sm:$0xff]  }
 0x8ae   : > { %7817 = vmatprep.subr.bf16.mxu0 %v8435_v57 }
 0x8b1   : > { %7818 = vmatpush3.bf16.msra.mxu0 %v8435_v57 }
 0x8b2   : > { %7819 = vmatprep.subr.bf16.mxu0 %v8436_v27 }
 0x8b5   : > { %7820 = vmatpush3.bf16.msra.mxu0 %v8436_v27  ;;  %v8489_v27 = vld [vmem:[%s9916_s19 + $0x54] ss:$8 sps:$4 sm:$0xff]  }
 0x8b6   : > { %7829 = vmatprep.subr.bf16.mxu0 %v8437_v29 }
 0x8b8   : > { %7822 = vmatmul.mubr.bf16.vlgmr.msra.gmra.mrb[36].mxu0 %v4112_v4 }
 0x8b9   : > { %7825 = vmatprep.mubr.bf16.mxu0 %v9517_v50  ;;  %7830 = vmatpush3.bf16.msra.mxu0 %v8437_v29  ;;  %v8487_v29 = vld [vmem:[%s9916_s19 + $0x50] ss:$8 sps:$4 sm:$0xff]  }
 0x8ba   : > { %7831 = vmatprep.subr.bf16.mxu0 %v8438_v30 }
 0x8bd   : > { %7832 = vmatpush3.bf16.msra.mxu0 %v8438_v30  ;;  %v8492_v30 = vld [vmem:[%s9916_s19 + $0x64] ss:$8 sps:$4 sm:$0xff]  }
 0x8be   : > { %7833 = vmatprep.subr.bf16.mxu0 %v8439_v31 }
 0x8c0   : > { %7826 = vmatmul.mubr.bf16.gmra.mrb[40].mxu0 %v4114_v6 }
 0x8c1   : > { %7834 = vmatpush3.bf16.msra.mxu0 %v8439_v31  ;;  %7845 = vmatprep.mubr.bf16.mxu0 %v4112_v4  ;;  %v8490_v31 = vld [vmem:[%s9916_s19 + $0x60] ss:$8 sps:$4 sm:$0xff]  }
 0x8c2   : > { %7835 = vmatprep.subr.bf16.mxu0 %v8440_v32 }
 0x8c5   : > { %7836 = vmatpush3.bf16.msra.mxu0 %v8440_v32 }
 0x8c6   : > { %7837 = vmatprep.subr.bf16.mxu0 %v8441_v33 }
 0x8c9   : > { %7838 = vmatpush3.bf16.msra.mxu0 %v8441_v33  ;;  %v8496_v33 = vld [vmem:[%s9916_s19 + $0x74] ss:$8 sps:$4 sm:$0xff]  }
 0x8ca   : > { %7839 = vmatprep.subr.bf16.mxu0 %v8442_v34 }
 0x8cd   : > { %7840 = vmatpush3.bf16.msra.mxu0 %v8442_v34  ;;  %v8494_v34 = vld [vmem:[%s9916_s19 + $0x70] ss:$8 sps:$4 sm:$0xff]  }
 0x8ce   : > { %7841 = vmatprep.subr.bf16.mxu0 %v8443_v35 }
 0x8d1   : > { %7842 = vmatpush3.bf16.msra.mxu0 %v8443_v35  ;;  %v8501_v35 = vld [vmem:[%s9918_s21 + $0x40] sm:$0xff]  }
 0x8d2   : > { %7843 = vmatprep.subr.bf16.mxu0 %v8444_v36 }
 0x8d5   : > { %7844 = vmatpush3.bf16.msra.mxu0 %v8444_v36 }
 0x8d8   : > { %7846 = vmatmul.mubr.bf16.vlgmr.msra.gmra.mrb[36].mxu0 %v9517_v50 }
 0x8d9   : > { %7849 = vmatprep.mubr.bf16.mxu0 %v4114_v6 }
 0x8e0   : > { %7850 = vmatmul.mubr.bf16.gmra.mrb[40].mxu0 %v4377_v37  ;;  %v8502_v37 = vld [vmem:[%s9918_s21 + $0x48] sm:$0xff]  }
 0x9ab   : > { %v7847_v46 = vpop.f32.mrb[36].mxu0 }
 0x9ac   : > { %v4525_v47 = vadd.f32 %v7847_v46, %v6692_v26  ;;  %v4477_v48 = vpop.f32.mrb[37].mxu0  ;;  %v8526_v46 = vld [vmem:[%s9920_s23 + $0x48] sm:$0xff]  }
 0x9ad   : > { %v4523_v49 = vadd.f32 %v6692_v26, %v4477_v48  ;;  %v7848_v51 = vpop.f32.mrb[38].mxu0 }
 0x9ae   : > { %v4526_v52 = vadd.f32 %v7848_v51, %v6692_v26  ;;  %v4480_v53 = vpop.f32.mrb[39].mxu0  ;;  %v4533_v55 = vmax.f32 %v4525_v47, 0.0  ;;  %v4983_v47 = vld [vmem:[%s9917_s20] sm:$0x3] }
 0x9af   : > { %v4524_v54 = vadd.f32 %v6692_v26, %v4480_v53  ;;  %v4531_v58 = vmax.f32 %v4523_v49, 0.0  ;;  %v9694_v48 = vrot.slane %v4983_v47, %v4037_v25  ;;  %v9698_v49 = vrot.slane %v4983_v47, %v4041_v28 }
 0x9b0   : > { %v4534_v56 = vmax.f32 %v4526_v52, 0.0 }
 0x9b1   : > { %v4532_v59 = vmax.f32 %v4524_v54, 0.0 }
 0x9b2   : > { %v6947_v60 = vpack.c.bf16 %v4534_v56, %v4533_v55 }
 0x9b3   : > { %v6942_v61 = vpack.c.bf16 %v4532_v59, %v4531_v58  ;;  %v7851_v62 = vpop.f32.mrb[40].mxu0 }
 0x9b4   : > { %6987 = vst [vmem:[#allocation10 + $0x8] sm:$0xff] %v6947_v60   ;;  %v4529_v63 = vadd.f32 %v7851_v62, %v6692_v26  ;;  %v4493_v0 = vpop.f32.mrb[41].mxu0 }
 0x9b5   : > { %6943 = vst [vmem:[#allocation10] sm:$0xff] %v6942_v61   ;;  %v4527_v1 = vadd.f32 %v6692_v26, %v4493_v0  ;;  %v7852_v2 = vpop.f32.mrb[42].mxu0 }
 0x9b6   : > { %v4530_v3 = vadd.f32 %v7852_v2, %v6692_v26  ;;  %v4496_v4 = vpop.f32.mrb[43].mxu0  ;;  %v4537_v8 = vmax.f32 %v4529_v63, 0.0 }
 0x9b7   : > { %v4528_v7 = vadd.f32 %v6692_v26, %v4496_v4  ;;  %v4535_v50 = vmax.f32 %v4527_v1, 0.0  ;;  %v8525_v26 = vld [vmem:[%s9920_s23 + $0x40] sm:$0xff]  }
 0x9b8   : > { %v4538_v10 = vmax.f32 %v4530_v3, 0.0  ;;  %7949 = vmatprep.subr.bf16.mxu0 %v8525_v26 }
 0x9b9   : > { %v4536_v5 = vmax.f32 %v4528_v7, 0.0  ;;  %7950 = vmatpush3.bf16.msra.mxu0 %v8525_v26 }
 0x9ba   : > { %v6957_v6 = vpack.c.bf16 %v4538_v10, %v4537_v8  ;;  %7951 = vmatprep.subr.bf16.mxu0 %v8526_v46 }
 0x9bb   : > { %v6952_v13 = vpack.c.bf16 %v4536_v5, %v4535_v50  ;;  %v8498_v38 = vld [vmem:[#allocation10 + $0x8] sm:$0xff]  }
 0x9bc   : > { %6989 = vst [vmem:[#allocation10 + $0x18] sm:$0xff] %v6957_v6   ;;  %v8472_v16 = vld [vmem:[#allocation10 + $0x4] sm:$0xff]  }
 0x9bd   : > { %6988 = vst [vmem:[#allocation10 + $0x10] sm:$0xff] %v6952_v13   ;;  %4766 = vmatmul.mubr.bf16.vlgmr.msra.gmra.mrb[40].mxu1 %v8472_v16  ;;  %v8497_v36 = vld [vmem:[#allocation10] sm:$0xff]   ;;  %7952 = vmatpush3.bf16.msra.mxu0 %v8526_v46 }
 0x9be   : > { %4911 = vmatpush1.bf16.msra.mxu1 %v8469_v11  ;;  %4775 = vmatprep.mubr.bf16.mxu1 %v8581_v20 }
 0x9bf   : > { %4912 = vmatprep.subr.bf16.mxu1 %v8475_v12 }
 0x9c2   : > { %4913 = vmatpush1.bf16.msra.mxu1 %v8473_v15 }
 0x9c3   : > { %4914 = vmatprep.subr.bf16.mxu1 %v8478_v17  ;;  %v8493_v32 = vld [vmem:[#allocation10 + $0x1c] sm:$0xff]  }
 0x9c4   : > { %v8479_v21 = vld [vmem:[#allocation10 + $0xc] sm:$0xff]   ;;  %v8486_v57 = vld [vmem:[#allocation10 + $0x14] sm:$0xff]  }
 0x9c5   : > { %4776 = vmatmul.mubr.bf16.gmra.mrb[44].mxu1 %v8479_v21  ;;  %v8499_v23 = vld [vmem:[#allocation10 + $0x10] sm:$0xff]   ;;  %v8500_v39 = vld [vmem:[#allocation10 + $0x18] sm:$0xff]  }
 0x9c6   : > { %4915 = vmatpush1.bf16.msra.mxu1 %v8476_v18  ;;  %4785 = vmatprep.mubr.bf16.mxu1 %v8581_v20 }
 0x9c7   : > { %4916 = vmatprep.subr.bf16.mxu1 %v8482_v19 }
 0x9ca   : > { %4917 = vmatpush1.bf16.msra.mxu1 %v8480_v22 }
 0x9cb   : > { %4918 = vmatprep.subr.bf16.mxu1 %v8485_v14 }
 0x9cd   : > { %4786 = vmatmul.mubr.bf16.gmra.mrb[48].mxu1 %v8486_v57 }
 0x9ce   : > { %4919 = vmatpush1.bf16.msra.mxu1 %v8483_v24  ;;  %4795 = vmatprep.mubr.bf16.mxu1 %v8581_v20 }
 0x9cf   : > { %4920 = vmatprep.subr.bf16.mxu1 %v8489_v27 }
 0x9d2   : > { %4921 = vmatpush1.bf16.msra.mxu1 %v8487_v29 }
 0x9d3   : > { %4922 = vmatprep.subr.bf16.mxu1 %v8492_v30 }
 0x9d5   : > { %4796 = vmatmul.mubr.bf16.gmra.mrb[52].mxu1 %v8493_v32 }
 0x9d6   : > { %4923 = vmatpush1.bf16.msra.mxu1 %v8490_v31  ;;  %4942 = vmatprep.mubr.bf16.mxu1 %v8581_v20 }
 0x9d7   : > { %4924 = vmatprep.subr.bf16.mxu1 %v8496_v33 }
 0x9da   : > { %4925 = vmatpush1.bf16.msra.mxu1 %v8494_v34 }
 0x9db   : > { %7853 = vmatprep.subr.bf16.mxu1 %v8501_v35 }
 0x9dd   : > { %4943 = vmatmul.mubr.bf16.vlgmr.msra.gmra.mrb[40].mxu1 %v8497_v36 }
 0x9de   : > { %4952 = vmatprep.mubr.bf16.mxu1 %v8581_v20  ;;  %7854 = vmatpush3.bf16.msra.mxu1 %v8501_v35 }
 0x9df   : > { %7855 = vmatprep.subr.bf16.mxu1 %v8502_v37 }
 0x9e2   : > { %7856 = vmatpush3.bf16.msra.mxu1 %v8502_v37 }
 0x9e3   : > { %7857 = vmatprep.subr.bf16.mxu1 %v8503_v40 }
 0x9e5   : > { %4953 = vmatmul.mubr.bf16.gmra.mrb[44].mxu1 %v8498_v38 }
 0x9e6   : > { %4962 = vmatprep.mubr.bf16.mxu1 %v8581_v20  ;;  %7858 = vmatpush3.bf16.msra.mxu1 %v8503_v40 }
 0x9e7   : > { %7859 = vmatprep.subr.bf16.mxu1 %v8504_v41 }
 0x9ea   : > { %7860 = vmatpush3.bf16.msra.mxu1 %v8504_v41 }
 0x9eb   : > { %7861 = vmatprep.subr.bf16.mxu1 %v8505_v42 }
 0x9ed   : > { %4963 = vmatmul.mubr.bf16.gmra.mrb[48].mxu1 %v8499_v23 }
 0x9ee   : > { %4972 = vmatprep.mubr.bf16.mxu1 %v8581_v20  ;;  %7862 = vmatpush3.bf16.msra.mxu1 %v8505_v42  ;;  %v8506_v20 = vld [vmem:[%s9918_s21 + $0x68] sm:$0xff]  }
 0x9ef   : > { %7863 = vmatprep.subr.bf16.mxu1 %v8506_v20 }
 0x9f2   : > { %7864 = vmatpush3.bf16.msra.mxu1 %v8506_v20 }
 0x9f3   : > { %7865 = vmatprep.subr.bf16.mxu1 %v8507_v43 }
 0x9f5   : > { %4973 = vmatmul.mubr.bf16.gmra.mrb[52].mxu1 %v8500_v39 }
 0x9f6   : > { %7866 = vmatpush3.bf16.msra.mxu1 %v8507_v43 }
 0x9f7   : > { %7867 = vmatprep.subr.bf16.mxu1 %v8508_v44 }
 0x9fa   : > { %7868 = vmatpush3.bf16.msra.mxu1 %v8508_v44 }
 0x9fb   : > { %7885 = vmatprep.subr.bf16.mxu1 %v9680_v45 }
 0xab0   : > { %v4944_v51 = vpop.f32.mrb[40].mxu1 }
 0xab1   : > { %v4995_v52 = vadd.f32 %v9694_v48, %v4944_v51  ;;  %v4946_v53 = vpop.f32.mrb[41].mxu1 }
 0xab2   : > { %v4996_v54 = vadd.f32 %v9698_v49, %v4946_v53  ;;  %v4948_v55 = vpop.f32.mrb[42].mxu1 }
 0xab3   : > { %v5011_v56 = vmax.f32 %v4995_v52, 0.0  ;;  %v4997_v58 = vadd.f32 %v9694_v48, %v4948_v55  ;;  %v4950_v59 = vpop.f32.mrb[43].mxu1 }
 0xab4   : > { %v5012_v60 = vmax.f32 %v4996_v54, 0.0  ;;  %v4998_v61 = vadd.f32 %v9698_v49, %v4950_v59 }
 0xab5   : > { %v5029_v25 = vpack.c.bf16 %v5011_v56, %v5011_v56  ;;  %v5013_v62 = vmax.f32 %v4997_v58, 0.0  ;;  %v8510_v58 = vld [vmem:[%s9918_s21 + $0x8] sm:$0xff]  }
 0xab6   : > { %v5034_v63 = vpack.c.bf16 %v5012_v60, %v5012_v60  ;;  %v5014_v9 = vmax.f32 %v4998_v61, 0.0 }
 0xab7   : > { %v5031_v28 = vrot.slane %v5029_v25, 4  ;;  %v5036_v0 = vpack.c.bf16 %v5013_v62, %v5013_v62 }
 0xab8   : > { %5035 = vst [vmem:[#allocation11 + $0x8] sm:$0xf] %v5034_v63  ;;  %v5041_v1 = vpack.c.bf16 %v5014_v9, %v5014_v9  ;;  %v4954_v2 = vpop.f32.mrb[44].mxu1 }
 0xab9   : > { %5033 = vst [vmem:[#allocation11] sm:$0xf0] %v5031_v28  ;;  %v5038_v3 = vrot.slane %v5036_v0, 4  ;;  %v4999_v4 = vadd.f32 %v9694_v48, %v4954_v2  ;;  %v4956_v7 = vpop.f32.mrb[45].mxu1 }
 0xaba   : > { %5042 = vst [vmem:[#allocation11 + $0x10] sm:$0xf] %v5041_v1  ;;  %v5000_v8 = vadd.f32 %v9698_v49, %v4956_v7  ;;  %v4958_v10 = vpop.f32.mrb[46].mxu1 }
 0xabb   : > { %5040 = vst [vmem:[#allocation11 + $0x8] sm:$0xf0] %v5038_v3  ;;  %v5015_v50 = vmax.f32 %v4999_v4, 0.0  ;;  %v5001_v5 = vadd.f32 %v9694_v48, %v4958_v10  ;;  %v4960_v6 = vpop.f32.mrb[47].mxu1 }
 0xabc   : > { %v5016_v11 = vmax.f32 %v5000_v8, 0.0  ;;  %v5002_v12 = vadd.f32 %v9698_v49, %v4960_v6 }
 0xabd   : > { %v5043_v13 = vpack.c.bf16 %v5015_v50, %v5015_v50  ;;  %v5017_v16 = vmax.f32 %v5001_v5, 0.0  ;;  %v8512_v5 = vld [vmem:[%s9918_s21 + $0x18] sm:$0xff]  }
 0xabe   : > { %v5048_v15 = vpack.c.bf16 %v5016_v11, %v5016_v11  ;;  %v5018_v17 = vmax.f32 %v5002_v12, 0.0 }
 0xabf   : > { %v5045_v18 = vrot.slane %v5043_v13, 4  ;;  %v5050_v19 = vpack.c.bf16 %v5017_v16, %v5017_v16  ;;  %v8513_v13 = vld [vmem:[%s9918_s21 + $0x20] sm:$0xff]  }
 0xac0   : > { %5049 = vst [vmem:[#allocation11 + $0x18] sm:$0xf] %v5048_v15  ;;  %v5055_v21 = vpack.c.bf16 %v5018_v17, %v5018_v17  ;;  %v4964_v22 = vpop.f32.mrb[48].mxu1  ;;  %v5109_v14 = vld [vmem:[#allocation11] sm:$0xf0] }
 0xac1   : > { %5047 = vst [vmem:[#allocation11 + $0x10] sm:$0xf0] %v5045_v18  ;;  %v5052_v24 = vrot.slane %v5050_v19, 4  ;;  %v5003_v57 = vadd.f32 %v9694_v48, %v4964_v22  ;;  %v4966_v27 = vpop.f32.mrb[49].mxu1  ;;  %v5144_v35 = vrot.slane %v5109_v14, 4  ;;  %v8514_v18 = vld [vmem:[%s9918_s21 + $0x28] sm:$0xff]  }
 0xac2   : > { %5056 = vst [vmem:[#allocation11 + $0x20] sm:$0xf] %v5055_v21  ;;  %v5004_v29 = vadd.f32 %v9698_v49, %v4966_v27  ;;  %v4968_v30 = vpop.f32.mrb[50].mxu1  ;;  %v9710_v31 = vld [vmem:[#allocation11 + $0x8] sm:$0xff]  ;;  %v8516_v27 = vld [vmem:[%s9918_s21 + $0x38] sm:$0xff]  }
 0xac3   : > { %5054 = vst [vmem:[#allocation11 + $0x18] sm:$0xf0] %v5052_v24  ;;  %v5019_v32 = vmax.f32 %v5003_v57, 0.0  ;;  %v5005_v33 = vadd.f32 %v9694_v48, %v4968_v30  ;;  %v4970_v34 = vpop.f32.mrb[51].mxu1  ;;  %v5145_v36 = vrot.slane %v9710_v31, 4  ;;  %v8515_v24 = vld [vmem:[%s9918_s21 + $0x30] sm:$0xff]  }
 0xac4   : > { %v5020_v37 = vmax.f32 %v5004_v29, 0.0  ;;  %v5006_v38 = vadd.f32 %v9698_v49, %v4970_v34  ;;  %v5085_v30 = vld [vmem:[#allocation11] sm:$0xff]  ;;  %v8519_v34 = vld [vmem:[%s9918_s21 + $0x90] sm:$0xff]  }
 0xac5   : > { %v5057_v23 = vpack.c.bf16 %v5019_v32, %v5019_v32  ;;  %v5021_v39 = vmax.f32 %v5005_v33, 0.0  ;;  %v5146_v40 = vsel %vm1036_vm1, %v5144_v35, %v5145_v36  ;;  %v8517_v32 = vld [vmem:[%s9918_s21 + $0x80] sm:$0xff]   ;;  %v8518_v33 = vld [vmem:[%s9918_s21 + $0x88] sm:$0xff]   ;;  %v8520_v35 = vld [vmem:[%s9918_s21 + $0x98] sm:$0xff]  }
 0xac6   : > { %v5062_v41 = vpack.c.bf16 %v5020_v37, %v5020_v37  ;;  %v5022_v42 = vmax.f32 %v5006_v38, 0.0  ;;  %7869 = vmatprep.mubr.bf16.mxu1 %v5146_v40  ;;  %v8522_v37 = vld [vmem:[%s9918_s21 + $0xa8] sm:$0xff]   ;;  %v8523_v38 = vld [vmem:[%s9918_s21 + $0xb0] sm:$0xff]  }
 0xac7   : > { %v5059_v20 = vrot.slane %v5057_v23, 4  ;;  %v5064_v43 = vpack.c.bf16 %v5021_v39, %v5021_v39  ;;  %v8524_v23 = vld [vmem:[%s9918_s21 + $0xb8] sm:$0xff]   ;;  %v8527_v40 = vld [vmem:[%s9920_s23 + $0x50] sm:$0xff]  }
 0xac8   : > { %5063 = vst [vmem:[#allocation11 + $0x28] sm:$0xf] %v5062_v41  ;;  %v5069_v44 = vpack.c.bf16 %v5022_v42, %v5022_v42  ;;  %v4974_v26 = vpop.f32.mrb[52].mxu1  ;;  %v9716_v46 = vld [vmem:[#allocation11 + $0x10] sm:$0xff]  ;;  %7953 = vmatprep.subr.bf16.mxu0 %v8527_v40  ;;  %v8529_v41 = vld [vmem:[%s9920_s23 + $0x60] sm:$0xff]   ;;  %v8530_v42 = vld [vmem:[%s9920_s23 + $0x68] sm:$0xff]  }
 0xac9   : > { %5061 = vst [vmem:[#allocation11 + $0x20] sm:$0xf0] %v5059_v20  ;;  %v5066_v47 = vrot.slane %v5064_v43, 4  ;;  %v5007_v51 = vadd.f32 %v9694_v48, %v4974_v26  ;;  %v4976_v52 = vpop.f32.mrb[53].mxu1  ;;  %v5147_v53 = vrot.slane %v9716_v46, 4  ;;  %7954 = vmatpush3.bf16.msra.mxu0 %v8527_v40  ;;  %v8531_v20 = vld [vmem:[%s9920_s23 + $0x70] sm:$0xff]  }
 0xaca   : > { %5070 = vst [vmem:[#allocation11 + $0x30] sm:$0xf] %v5069_v44  ;;  %v5008_v54 = vadd.f32 %v9698_v49, %v4976_v52  ;;  %v4978_v55 = vpop.f32.mrb[54].mxu1  ;;  %v9721_v56 = vld [vmem:[#allocation11 + $0x18] sm:$0xff]  ;;  %v9816_v44 = vld [vmem:[%s9920_s23] sm:$0xff]  }
 0xacb   : > { %5068 = vst [vmem:[#allocation11 + $0x28] sm:$0xf0] %v5066_v47  ;;  %v5023_v59 = vmax.f32 %v5007_v51, 0.0  ;;  %v5009_v60 = vadd.f32 %v9694_v48, %v4978_v55  ;;  %v4980_v61 = vpop.f32.mrb[55].mxu1  ;;  %v5148_v25 = vsel %vm1036_vm1, %v5145_v36, %v5147_v53  ;;  %v5149_v62 = vrot.slane %v9721_v56, 4  ;;  %v8511_v48 = vld [vmem:[%s9918_s21 + $0x10] sm:$0xff]  }
 0xacc   : > { %v5024_v63 = vmax.f32 %v5008_v54, 0.0  ;;  %v5010_v9 = vadd.f32 %v9698_v49, %v4980_v61  ;;  %7870 = vmatmul.mubr.bf16.vlgmr.msra.gmra.mrb[56].mxu1 %v5148_v25  ;;  %v8521_v36 = vld [vmem:[%s9918_s21 + $0xa0] sm:$0xff]   ;;  %v8532_v43 = vld [vmem:[%s9920_s23 + $0x78] sm:$0xff]  }
 0xacd   : > { %v5071_v28 = vpack.c.bf16 %v5023_v59, %v5023_v59  ;;  %v5025_v0 = vmax.f32 %v5009_v60, 0.0  ;;  %7886 = vmatpush3.bf16.msra.mxu1 %v9680_v45  ;;  %v5150_v1 = vsel %vm1036_vm1, %v5147_v53, %v5149_v62  ;;  %v9822_v26 = vld [vmem:[%s9919_s22] ss:$0 sm:$0xff] }
 0xace   : > { %v5076_v2 = vpack.c.bf16 %v5024_v63, %v5024_v63  ;;  %v5026_v3 = vmax.f32 %v5010_v9, 0.0  ;;  %7873 = vmatprep.mubr.bf16.mxu1 %v5150_v1  ;;  %7887 = vmatprep.subr.bf16.mxu1 %v8510_v58 }
 0xacf   : > { %v5073_v4 = vrot.slane %v5071_v28, 4  ;;  %v5078_v7 = vpack.c.bf16 %v5025_v0, %v5025_v0 }
 0xad0   : > { %5077 = vst [vmem:[#allocation11 + $0x38] sm:$0xf] %v5076_v2  ;;  %v5083_v8 = vpack.c.bf16 %v5026_v3, %v5026_v3  ;;  %v9735_v49 = vld [vmem:[#allocation11 + $0x20] sm:$0xff] }
 0xad1   : > { %5075 = vst [vmem:[#allocation11 + $0x30] sm:$0xf0] %v5073_v4  ;;  %v5080_v10 = vrot.slane %v5078_v7, 4  ;;  %7888 = vmatpush3.bf16.msra.mxu1 %v8510_v58  ;;  %v5151_v45 = vrot.slane %v9735_v49, 4 }
 0xad2   : > { %5084 = vst [vmem:[#allocation11 + $0x40] sm:$0xf] %v5083_v8  ;;  %7889 = vmatprep.subr.bf16.mxu1 %v8511_v48  ;;  %v9738_v50 = vld [vmem:[#allocation11 + $0x28] sm:$0xff] }
 0xad3   : > { %5082 = vst [vmem:[#allocation11 + $0x38] sm:$0xf0] %v5080_v10  ;;  %v5152_v6 = vsel %vm1036_vm1, %v5149_v62, %v5151_v45  ;;  %v5153_v11 = vrot.slane %v9738_v50, 4 }
 0xad4   : > { %7874 = vmatmul.mubr.bf16.gmra.mrb[60].mxu1 %v5152_v6 }
 0xad5   : > { %7890 = vmatpush3.bf16.msra.mxu1 %v8511_v48  ;;  %v5154_v12 = vsel %vm1036_vm1, %v5151_v45, %v5153_v11 }
 0xad6   : > { %7877 = vmatprep.mubr.bf16.mxu1 %v5154_v12  ;;  %7891 = vmatprep.subr.bf16.mxu1 %v8512_v5 }
 0xad8   : > { %v5115_v16 = vld [vmem:[#allocation11 + $0x30] sm:$0xff] }
 0xad9   : > { %7892 = vmatpush3.bf16.msra.mxu1 %v8512_v5  ;;  %v5155_v15 = vrot.slane %v5115_v16, 4  ;;  %v5117_v22 = vld [vmem:[#allocation11 + $0x40] sm:$0xf] }
 0xada   : > { %7893 = vmatprep.subr.bf16.mxu1 %v8513_v13  ;;  %v5116_v17 = vld [vmem:[#allocation11 + $0x38] sm:$0xff]  ;;  %v5159_v57 = vrot.slane %v5117_v22, 4  ;;  %v5459_v39 = vld [vmem:[#allocation11 + $0x40] sm:$0xff] }
 0xadb   : > { %v5156_v19 = vsel %vm1036_vm1, %v5153_v11, %v5155_v15  ;;  %v5157_v21 = vrot.slane %v5116_v17, 4 }
 0xadc   : > { %7878 = vmatmul.mubr.bf16.gmra.mrb[64].mxu1 %v5156_v19 }
 0xadd   : > { %7894 = vmatpush3.bf16.msra.mxu1 %v8513_v13  ;;  %v5158_v14 = vsel %vm1036_vm1, %v5155_v15, %v5157_v21  ;;  %v5160_v29 = vsel %vm1036_vm1, %v5157_v21, %v5159_v57 }
 0xade   : > { %7881 = vmatprep.mubr.bf16.mxu1 %v5158_v14  ;;  %7895 = vmatprep.subr.bf16.mxu1 %v8514_v18 }
 0xae1   : > { %7896 = vmatpush3.bf16.msra.mxu1 %v8514_v18 }
 0xae2   : > { %7897 = vmatprep.subr.bf16.mxu1 %v8515_v24 }
 0xae4   : > { %7882 = vmatmul.mubr.bf16.gmra.mrb[68].mxu1 %v5160_v29 }
 0xae5   : > { %7898 = vmatpush3.bf16.msra.mxu1 %v8515_v24  ;;  %7901 = vmatprep.mubr.bf16.mxu1 %v5085_v30 }
 0xae6   : > { %7899 = vmatprep.subr.bf16.mxu1 %v8516_v27 }
 0xae9   : > { %7900 = vmatpush3.bf16.msra.mxu1 %v8516_v27 }
 0xaea   : > { %7917 = vmatprep.subr.bf16.mxu1 %v8517_v32 }
 0xaec   : > { %7902 = vmatmul.mubr.bf16.vlgmr.msra.gmra.mrb[56].mxu1 %v9710_v31 }
 0xaed   : > { %7918 = vmatpush3.bf16.msra.mxu1 %v8517_v32  ;;  %7905 = vmatprep.mubr.bf16.mxu1 %v9716_v46 }
 0xaee   : > { %7919 = vmatprep.subr.bf16.mxu1 %v8518_v33 }
 0xaf1   : > { %7920 = vmatpush3.bf16.msra.mxu1 %v8518_v33 }
 0xaf2   : > { %7921 = vmatprep.subr.bf16.mxu1 %v8519_v34 }
 0xaf4   : > { %7906 = vmatmul.mubr.bf16.gmra.mrb[60].mxu1 %v9721_v56 }
 0xaf5   : > { %7922 = vmatpush3.bf16.msra.mxu1 %v8519_v34  ;;  %7909 = vmatprep.mubr.bf16.mxu1 %v9735_v49 }
 0xaf6   : > { %7923 = vmatprep.subr.bf16.mxu1 %v8520_v35 }
 0xaf9   : > { %7924 = vmatpush3.bf16.msra.mxu1 %v8520_v35 }
 0xafa   : > { %7925 = vmatprep.subr.bf16.mxu1 %v8521_v36 }
 0xafc   : > { %7910 = vmatmul.mubr.bf16.gmra.mrb[64].mxu1 %v9738_v50 }
 0xafd   : > { %7926 = vmatpush3.bf16.msra.mxu1 %v8521_v36  ;;  %7913 = vmatprep.mubr.bf16.mxu1 %v5115_v16 }
 0xafe   : > { %7927 = vmatprep.subr.bf16.mxu1 %v8522_v37 }
 0xb01   : > { %7928 = vmatpush3.bf16.msra.mxu1 %v8522_v37  ;;  %v8534_v37 = vld [vmem:[%s9920_s23 + $0x8] sm:$0xff]  }
 0xb02   : > { %7929 = vmatprep.subr.bf16.mxu1 %v8523_v38 }
 0xb04   : > { %7914 = vmatmul.mubr.bf16.gmra.mrb[68].mxu1 %v5116_v17 }
 0xb05   : > { %7930 = vmatpush3.bf16.msra.mxu1 %v8523_v38  ;;  %7933 = vmatprep.mubr.bf16.mxu1 %v9710_v31  ;;  %v8528_v31 = vld [vmem:[%s9920_s23 + $0x58] sm:$0xff]  }
 0xb06   : > { %7931 = vmatprep.subr.bf16.mxu1 %v8524_v23  ;;  %7955 = vmatprep.subr.bf16.mxu0 %v8528_v31 }
 0xb07   : > { %7956 = vmatpush3.bf16.msra.mxu0 %v8528_v31 }
 0xb08   : > { %7957 = vmatprep.subr.bf16.mxu0 %v8529_v41 }
 0xb09   : > { %7932 = vmatpush3.bf16.msra.mxu1 %v8524_v23 }
 0xb0b   : > { %7958 = vmatpush3.bf16.msra.mxu0 %v8529_v41 }
 0xb0c   : > { %7934 = vmatmul.mubr.bf16.vlgmr.msra.gmra.mrb[56].mxu1 %v9716_v46  ;;  %7959 = vmatprep.subr.bf16.mxu0 %v8530_v42 }
 0xb0d   : > { %7937 = vmatprep.mubr.bf16.mxu1 %v9721_v56 }
 0xb0f   : > { %7960 = vmatpush3.bf16.msra.mxu0 %v8530_v42 }
 0xb10   : > { %7961 = vmatprep.subr.bf16.mxu0 %v8531_v20 }
 0xb13   : > { %7962 = vmatpush3.bf16.msra.mxu0 %v8531_v20 }
 0xb14   : > { %7938 = vmatmul.mubr.bf16.gmra.mrb[60].mxu1 %v9735_v49  ;;  %7963 = vmatprep.subr.bf16.mxu0 %v8532_v43 }
 0xb15   : > { %7941 = vmatprep.mubr.bf16.mxu1 %v9738_v50 }
 0xb17   : > { %7964 = vmatpush3.bf16.msra.mxu0 %v8532_v43 }
 0xb18   : > { %7973 = vmatprep.subr.bf16.mxu0 %v9816_v44 }
 0xb1c   : > { %7942 = vmatmul.mubr.bf16.gmra.mrb[64].mxu1 %v5115_v16 }
 0xb1d   : > { %7945 = vmatprep.mubr.bf16.mxu1 %v5116_v17 }
 0xb24   : > { %7946 = vmatmul.mubr.bf16.gmra.mrb[68].mxu1 %v5459_v39 }
 0xbdf   : > { %v7935_v46 = vpop.f32.mrb[56].mxu1 }
 0xbe0   : > { %v5647_v47 = vadd.f32 %v7935_v46, %v9822_v26  ;;  %v5559_v51 = vpop.f32.mrb[57].mxu1  ;;  %v8535_v46 = vld [vmem:[%s9920_s23 + $0x10] sm:$0xff]  }
 0xbe1   : > { %v5645_v52 = vadd.f32 %v9822_v26, %v5559_v51  ;;  %v7936_v53 = vpop.f32.mrb[58].mxu1 }
 0xbe2   : > { %v5663_v54 = vmax.f32 %v5647_v47, 0.0  ;;  %v5648_v55 = vadd.f32 %v7936_v53, %v9822_v26  ;;  %v5562_v56 = vpop.f32.mrb[59].mxu1 }
 0xbe3   : > { %v5661_v58 = vmax.f32 %v5645_v52, 0.0  ;;  %v5646_v59 = vadd.f32 %v9822_v26, %v5562_v56  ;;  %v8539_v56 = vld [vmem:[%s9920_s23 + $0x28] sm:$0xff]  }
 0xbe4   : > { %v5664_v60 = vmax.f32 %v5648_v55, 0.0  ;;  %v8537_v55 = vld [vmem:[%s9920_s23 + $0x20] sm:$0xff]  }
 0xbe5   : > { %v6962_v61 = vpack.c.bf16 %v5663_v54, %v5661_v58  ;;  %v5662_v25 = vmax.f32 %v5646_v59, 0.0 }
 0xbe6   : > { %v5684_v62 = vpack.c.bf16 %v5664_v60, %v5664_v60  ;;  %v8540_v60 = vld [vmem:[%s9920_s23 + $0x30] sm:$0xff]  }
 0xbe7   : > { %6963 = vst [vmem:[#allocation12] sm:$0xff] %v6962_v61   ;;  %v5680_v63 = vpack.c.bf16 %v5662_v25, %v5662_v25  ;;  %v7939_v9 = vpop.f32.mrb[60].mxu1  ;;  %v8541_v61 = vld [vmem:[%s9920_s23 + $0x38] sm:$0xff]   ;;  %v8543_v25 = vld [vmem:[%s9920_s23 + $0x80] sm:$0xff]  }
 0xbe8   : > { %v5686_v28 = vrot.slane %v5684_v62, 4  ;;  %v5651_v0 = vadd.f32 %v7939_v9, %v9822_v26  ;;  %v5575_v1 = vpop.f32.mrb[61].mxu1 }
 0xbe9   : > { %5681 = vst [vmem:[#allocation13] sm:$0xf] %v5680_v63  ;;  %v5649_v2 = vadd.f32 %v9822_v26, %v5575_v1  ;;  %v7940_v3 = vpop.f32.mrb[62].mxu1  ;;  %v8545_v63 = vld [vmem:[%s9920_s23 + $0x88] sm:$0xff]   ;;  %v8549_v1 = vld [vmem:[%s9920_s23 + $0x98] sm:$0xff]  }
 0xbea   : > { %5688 = vst [vmem:[#allocation13] sm:$0xf0] %v5686_v28  ;;  %v5667_v48 = vmax.f32 %v5651_v0, 0.0  ;;  %v5652_v4 = vadd.f32 %v7940_v3, %v9822_v26  ;;  %v5578_v7 = vpop.f32.mrb[63].mxu1  ;;  %v8547_v28 = vld [vmem:[%s9920_s23 + $0x90] sm:$0xff]   ;;  %v8550_v3 = vld [vmem:[%s9920_s23 + $0xa0] sm:$0xff]  }
 0xbeb   : > { %v5665_v8 = vmax.f32 %v5649_v2, 0.0  ;;  %v5650_v49 = vadd.f32 %v9822_v26, %v5578_v7  ;;  %v8553_v7 = vld [vmem:[%s9920_s23 + $0xb8] sm:$0xff]  }
 0xbec   : > { %v5668_v10 = vmax.f32 %v5652_v4, 0.0  ;;  %v8552_v4 = vld [vmem:[%s9920_s23 + $0xb0] sm:$0xff]  }
 0xbed   : > { %v6967_v45 = vpack.c.bf16 %v5667_v48, %v5665_v8  ;;  %v5666_v50 = vmax.f32 %v5650_v49, 0.0  ;;  %v8551_v48 = vld [vmem:[%s9920_s23 + $0xa8] sm:$0xff]  }
 0xbee   : > { %v5695_v5 = vpack.c.bf16 %v5668_v10, %v5668_v10  ;;  %v8538_v59 = vld [vmem:[#allocation12] sm:$0xff]  }
 0xbef   : > { %6990 = vst [vmem:[#allocation12 + $0x8] sm:$0xff] %v6967_v45   ;;  %v5691_v6 = vpack.c.bf16 %v5666_v50, %v5666_v50  ;;  %v7943_v11 = vpop.f32.mrb[64].mxu1  ;;  %v6878_v45 = vld [vmem:[%s9921_s24] ss:$0 sm:$0xff] }
 0xbf0   : > { %v5697_v12 = vrot.slane %v5695_v5, 4  ;;  %v5655_v13 = vadd.f32 %v7943_v11, %v9822_v26  ;;  %v5591_v16 = vpop.f32.mrb[65].mxu1 }
 0xbf1   : > { %5692 = vst [vmem:[#allocation13 + $0x8] sm:$0xf] %v5691_v6  ;;  %v5653_v15 = vadd.f32 %v9822_v26, %v5591_v16  ;;  %v7944_v17 = vpop.f32.mrb[66].mxu1  ;;  %v5746_v18 = vld [vmem:[#allocation13] sm:$0xff] }
 0xbf2   : > { %5699 = vst [vmem:[#allocation13 + $0x8] sm:$0xf0] %v5697_v12  ;;  %v5671_v19 = vmax.f32 %v5655_v13, 0.0  ;;  %v5656_v21 = vadd.f32 %v7944_v17, %v9822_v26  ;;  %v5594_v22 = vpop.f32.mrb[67].mxu1  ;;  %7965 = vmatprep.mubr.bf16.mxu0 %v5746_v18 }
 0xbf3   : > { %v5669_v14 = vmax.f32 %v5653_v15, 0.0  ;;  %v5654_v24 = vadd.f32 %v9822_v26, %v5594_v22 }
 0xbf4   : > { %v5672_v57 = vmax.f32 %v5656_v21, 0.0 }
 0xbf5   : > { %v6972_v27 = vpack.c.bf16 %v5671_v19, %v5669_v14  ;;  %v5670_v29 = vmax.f32 %v5654_v24, 0.0 }
 0xbf6   : > { %v5706_v30 = vpack.c.bf16 %v5672_v57, %v5672_v57  ;;  %v8542_v62 = vld [vmem:[#allocation12 + $0x8] sm:$0xff]  }
 0xbf7   : > { %6991 = vst [vmem:[#allocation12 + $0x10] sm:$0xff] %v6972_v27   ;;  %v5702_v32 = vpack.c.bf16 %v5670_v29, %v5670_v29  ;;  %v7947_v33 = vpop.f32.mrb[68].mxu1  ;;  %v8548_v2 = vld [vmem:[#allocation12 + $0x4] sm:$0xff]  }
 0xbf8   : > { %v5708_v34 = vrot.slane %v5706_v30, 4  ;;  %v5659_v35 = vadd.f32 %v7947_v33, %v9822_v26  ;;  %v5607_v36 = vpop.f32.mrb[69].mxu1 }
 0xbf9   : > { %5703 = vst [vmem:[#allocation13 + $0x10] sm:$0xf] %v5702_v32  ;;  %v5657_v38 = vadd.f32 %v9822_v26, %v5607_v36  ;;  %v7948_v23 = vpop.f32.mrb[70].mxu1  ;;  %v5747_v39 = vld [vmem:[#allocation13 + $0x8] sm:$0xff] }
 0xbfa   : > { %5710 = vst [vmem:[#allocation13 + $0x10] sm:$0xf0] %v5708_v34  ;;  %v5675_v40 = vmax.f32 %v5659_v35, 0.0  ;;  %v5660_v31 = vadd.f32 %v7948_v23, %v9822_v26  ;;  %v5610_v41 = vpop.f32.mrb[71].mxu1  ;;  %7966 = vmatmul.mubr.bf16.vlgmr.msra.gmra.mrb[44].mxu0 %v5747_v39 }
 0xbfb   : > { %v5673_v42 = vmax.f32 %v5657_v38, 0.0  ;;  %v5658_v20 = vadd.f32 %v9822_v26, %v5610_v41  ;;  %7974 = vmatpush3.bf16.msra.mxu0 %v9816_v44  ;;  %v8536_v26 = vld [vmem:[%s9920_s23 + $0x18] sm:$0xff]  }
 0xbfc   : > { %v5676_v43 = vmax.f32 %v5660_v31, 0.0  ;;  %7975 = vmatprep.subr.bf16.mxu0 %v8534_v37 }
 0xbfd   : > { %v6977_v47 = vpack.c.bf16 %v5675_v40, %v5673_v42  ;;  %v5674_v51 = vmax.f32 %v5658_v20, 0.0 }
 0xbfe   : > { %v5717_v52 = vpack.c.bf16 %v5676_v43, %v5676_v43  ;;  %v8544_v9 = vld [vmem:[#allocation12 + $0x10] sm:$0xff]  }
 0xbff   : > { %6992 = vst [vmem:[#allocation12 + $0x18] sm:$0xff] %v6977_v47   ;;  %v5713_v53 = vpack.c.bf16 %v5674_v51, %v5674_v51  ;;  %7976 = vmatpush3.bf16.msra.mxu0 %v8534_v37  ;;  %v8554_v8 = vld [vmem:[#allocation12 + $0xc] sm:$0xff]  }
 0xc00   : > { %v5719_v54 = vrot.slane %v5717_v52, 4  ;;  %7977 = vmatprep.subr.bf16.mxu0 %v8535_v46 }
 0xc01   : > { %5714 = vst [vmem:[#allocation13 + $0x18] sm:$0xf] %v5713_v53  ;;  %v5748_v44 = vld [vmem:[#allocation13 + $0x10] sm:$0xff] }
 0xc02   : > { %5721 = vst [vmem:[#allocation13 + $0x18] sm:$0xf0] %v5719_v54  ;;  %7969 = vmatprep.mubr.bf16.mxu0 %v5748_v44 }
 0xc03   : > { %7978 = vmatpush3.bf16.msra.mxu0 %v8535_v46 }
 0xc04   : > { %7979 = vmatprep.subr.bf16.mxu0 %v8536_v26 }
 0xc06   : > { %v8546_v0 = vld [vmem:[#allocation12 + $0x18] sm:$0xff]  }
 0xc07   : > { %7980 = vmatpush3.bf16.msra.mxu0 %v8536_v26  ;;  %v8555_v49 = vld [vmem:[#allocation12 + $0x14] sm:$0xff]   ;;  %v8556_v10 = vld [vmem:[#allocation12 + $0x1c] sm:$0xff]  }
 0xc08   : > { %7981 = vmatprep.subr.bf16.mxu0 %v8537_v55 }
 0xc09   : > { %v5749_v58 = vld [vmem:[#allocation13 + $0x18] sm:$0xff] }
 0xc0a   : > { %7970 = vmatmul.mubr.bf16.gmra.mrb[48].mxu0 %v5749_v58 }
 0xc0b   : > { %7982 = vmatpush3.bf16.msra.mxu0 %v8537_v55  ;;  %7989 = vmatprep.mubr.bf16.mxu0 %v8538_v59 }
 0xc0c   : > { %7983 = vmatprep.subr.bf16.mxu0 %v8539_v56 }
 0xc0f   : > { %7984 = vmatpush3.bf16.msra.mxu0 %v8539_v56 }
 0xc10   : > { %7985 = vmatprep.subr.bf16.mxu0 %v8540_v60 }
 0xc13   : > { %7986 = vmatpush3.bf16.msra.mxu0 %v8540_v60 }
 0xc14   : > { %7987 = vmatprep.subr.bf16.mxu0 %v8541_v61 }
 0xc17   : > { %7988 = vmatpush3.bf16.msra.mxu0 %v8541_v61 }
 0xc18   : > { %7997 = vmatprep.subr.bf16.mxu0 %v8543_v25 }
 0xc1a   : > { %7990 = vmatmul.mubr.bf16.vlgmr.msra.gmra.mrb[44].mxu0 %v8542_v62 }
 0xc1b   : > { %7993 = vmatprep.mubr.bf16.mxu0 %v8544_v9  ;;  %7998 = vmatpush3.bf16.msra.mxu0 %v8543_v25 }
 0xc1c   : > { %7999 = vmatprep.subr.bf16.mxu0 %v8545_v63 }
 0xc1f   : > { %8000 = vmatpush3.bf16.msra.mxu0 %v8545_v63 }
 0xc20   : > { %8001 = vmatprep.subr.bf16.mxu0 %v8547_v28 }
 0xc22   : > { %7994 = vmatmul.mubr.bf16.gmra.mrb[48].mxu0 %v8546_v0 }
 0xc23   : > { %8002 = vmatpush3.bf16.msra.mxu0 %v8547_v28  ;;  %8013 = vmatprep.mubr.bf16.mxu0 %v8548_v2 }
 0xc24   : > { %8003 = vmatprep.subr.bf16.mxu0 %v8549_v1 }
 0xc27   : > { %8004 = vmatpush3.bf16.msra.mxu0 %v8549_v1 }
 0xc28   : > { %8005 = vmatprep.subr.bf16.mxu0 %v8550_v3 }
 0xc2b   : > { %8006 = vmatpush3.bf16.msra.mxu0 %v8550_v3 }
 0xc2c   : > { %8007 = vmatprep.subr.bf16.mxu0 %v8551_v48 }
 0xc2f   : > { %8008 = vmatpush3.bf16.msra.mxu0 %v8551_v48 }
 0xc30   : > { %8009 = vmatprep.subr.bf16.mxu0 %v8552_v4 }
 0xc33   : > { %8010 = vmatpush3.bf16.msra.mxu0 %v8552_v4 }
 0xc34   : > { %8011 = vmatprep.subr.bf16.mxu0 %v8553_v7 }
 0xc37   : > { %8012 = vmatpush3.bf16.msra.mxu0 %v8553_v7 }
 0xc3a   : > { %8014 = vmatmul.mubr.bf16.vlgmr.msra.gmra.mrb[44].mxu0 %v8554_v8 }
 0xc3b   : > { %8017 = vmatprep.mubr.bf16.mxu0 %v8555_v49 }
 0xc42   : > { %8018 = vmatmul.mubr.bf16.gmra.mrb[48].mxu0 %v8556_v10 }
 0xd0d   : > { %v8015_v50 = vpop.f32.mrb[44].mxu0 }
 0xd0e   : > { %v6196_v5 = vadd.f32 %v8015_v50, %v6878_v45  ;;  %v6148_v6 = vpop.f32.mrb[45].mxu0 }
 0xd0f   : > { %v6194_v11 = vadd.f32 %v6878_v45, %v6148_v6  ;;  %v8016_v12 = vpop.f32.mrb[46].mxu0 }
 0xd10   : > { %8557 = vtanh.f32 %v6196_v5  ;;  %v6197_v13 = vadd.f32 %v8016_v12, %v6878_v45  ;;  %v6151_v16 = vpop.f32.mrb[47].mxu0 }
 0xd11   : > { %8559 = vtanh.f32 %v6194_v11  ;;  %v6195_v15 = vadd.f32 %v6878_v45, %v6151_v16 }
 0xd12   : > { %8561 = vtanh.f32 %v6197_v13 }
 0xd13   : > { %8563 = vtanh.f32 %v6195_v15 }
 0xd15   : > { %v8019_v17 = vpop.f32.mrb[48].mxu0 }
 0xd16   : > { %v6200_v18 = vadd.f32 %v8019_v17, %v6878_v45  ;;  %v6164_v19 = vpop.f32.mrb[49].mxu0 }
 0xd17   : > { %v6198_v21 = vadd.f32 %v6878_v45, %v6164_v19  ;;  %v8020_v22 = vpop.f32.mrb[50].mxu0 }
 0xd18   : > { %8565 = vtanh.f32 %v6200_v18  ;;  %v6201_v14 = vadd.f32 %v8020_v22, %v6878_v45  ;;  %v6167_v24 = vpop.f32.mrb[51].mxu0 }
 0xd19   : > { %8567 = vtanh.f32 %v6198_v21  ;;  %v6199_v57 = vadd.f32 %v6878_v45, %v6167_v24 }
 0xd1a   : > { %v8558_v27 = vpop.eup %8557  ;;  %8569 = vtanh.f32 %v6201_v14 }
 0xd1b   : > { %v8560_v29 = vpop.eup %8559  ;;  %6212 = vst [vmem:[%s766_s2 + $0x10] sm:$0xff] %v8558_v27  ;;  %8571 = vtanh.f32 %v6199_v57 }
 0xd1c   : > { %v8562_v30 = vpop.eup %8561  ;;  %6210 = vst [vmem:[%s766_s2] sm:$0xff] %v8560_v29 }
 0xd1d   : > { %v8564_v32 = vpop.eup %8563  ;;  %6213 = vst [vmem:[%s766_s2 + $0x18] sm:$0xff] %v8562_v30 }
 0xd1e   : > { %6211 = vst [vmem:[%s766_s2 + $0x8] sm:$0xff] %v8564_v32 }
 0xd22   : > { %v8566_v33 = vpop.eup %8565 }
 0xd23   : > { %v8568_v34 = vpop.eup %8567  ;;  %6216 = vst [vmem:[%s766_s2 + $0x30] sm:$0xff] %v8566_v33 }
 0xd24   : > { %v8570_v35 = vpop.eup %8569  ;;  %6214 = vst [vmem:[%s766_s2 + $0x20] sm:$0xff] %v8568_v34 }
 0xd25   : > { %v8572_v36 = vpop.eup %8571  ;;  %6217 = vst [vmem:[%s766_s2 + $0x38] sm:$0xff] %v8570_v35 }
 0xd26   : > { %6215 = vst [vmem:[%s766_s2 + $0x28] sm:$0xff] %v8572_v36 }
 0xd27 PF: > { %s35_s29 = sadd.s32 1, %s8579_s29  }
 0xd28   : > { %p32_p5 = scmp.ge.s32.totalorder %s35_s29, 4  }
 0xd2a   :  { %34 = sbr.rel (!%p32_p5) target bundleno = 11 (0xb), region = 175 }

</bundles_post_ra>
